<compile_context>
chip_gen: v6e
topology: v6e:2x2x1
jax: 0.10.0
libtpu: 0.0.40
codegen_flags: <defaults>
</compile_context>

<pallas_src>
from typing import Dict, List, Tuple

import numpy as np
import jax
import jax.numpy as jnp
from jax import lax
from jax.experimental import pallas as pl
from jax.experimental.pallas import tpu as pltpu

EPS = 1e-5
ROW_TILE = 256          # rows (nodes/edges) processed per grid step
LANE = 128              # feature dim padded to a multiple of the TPU lane width
_DOT_PREC = jax.lax.Precision.HIGHEST   # full-precision f32 MXU passes for the stats


def _round_up(x: int, m: int) -> int:
    return ((x + m - 1) // m) * m


def _stats_kernel(seg_ref, x_ref, counts_ref, gamma_ref, beta_ref,
                  scale_ref, shift_ref, sum_ref, sq_ref):
    """One grid step per ROW_TILE rows (reduction axis, 'arbitrary').

    seg_ref    : VMEM i32[1, T]    per-row graph id (column layout)
    x_ref      : VMEM   [T, Dp]    feature rows of this tile (lane-dense)
    counts_ref : VMEM f32[Bp, 1]   rows per graph (0 for padding segments)
    gamma_ref  : VMEM f32[1, Dp]
    beta_ref   : VMEM f32[1, Dp]
    scale_ref  : VMEM f32[Bp, Dp]  OUT: per-graph scale  (gamma/(std+eps) or gamma)
    shift_ref  : VMEM f32[Bp, Dp]  OUT: per-graph shift  (beta - mean*scale or beta)
    sum_ref    : VMEM f32[Bp, Dp]  scratch accumulator  sum(x)
    sq_ref     : VMEM f32[Bp, Dp]  scratch accumulator  sum(x*x)
    """
    i = pl.program_id(0)

    @pl.when(i == 0)
    def _init():
        sum_ref[...] = jnp.zeros_like(sum_ref)
        sq_ref[...] = jnp.zeros_like(sq_ref)

    x = x_ref[...].astype(jnp.float32)                               # (T, Dp)
    t = x.shape[0]
    bp = sum_ref.shape[0]
    # One-hot segment matrix (Bp, T): the per-graph segment reduction becomes a
    # single MXU matmul instead of per-graph masked XLU reductions.
    onehot = (seg_ref[...] ==
              lax.broadcasted_iota(jnp.int32, (bp, t), 0)).astype(jnp.float32)
    sum_ref[...] += jnp.dot(onehot, x, preferred_element_type=jnp.float32,
                            precision=_DOT_PREC)
    sq_ref[...] += jnp.dot(onehot, x * x, preferred_element_type=jnp.float32,
                           precision=_DOT_PREC)

    @pl.when(i == pl.num_programs(0) - 1)
    def _finalize():
        n = counts_ref[...]                                          # (Bp, 1)
        n_safe = jnp.maximum(n, 1.0)                                 # guard n == 0
        mean = sum_ref[...] / n_safe
        # Single-pass population variance (E[x^2]-mean^2), accumulated in f32.
        # Fine for roughly-centered activations; clamp guards tiny negatives.
        var = jnp.maximum(sq_ref[...] / n_safe - mean * mean, 0.0)
        std = jnp.sqrt(var)
        inv = pl.reciprocal(std + EPS, approx=False)   # eps on std (matches torch)
        gamma = gamma_ref[...]
        beta = beta_ref[...]
        do_norm = n > 1.0                    # single-row graphs pass through
        scale = jnp.where(do_norm, gamma * inv, gamma)
        shift = jnp.where(do_norm, beta - mean * scale, beta)
        scale_ref[...] = scale
        shift_ref[...] = shift


def _apply_kernel(seg_ref, x_ref, scale_ref, shift_ref, o_ref):
    """One grid step per ROW_TILE rows, fully parallel.

    seg_ref   : VMEM i32[T, 1]    per-row graph id (row layout)
    x_ref     : VMEM   [T, Dp]
    scale_ref : VMEM f32[Bp, Dp]
    shift_ref : VMEM f32[Bp, Dp]
    o_ref     : VMEM   [T, Dp]
    """
    x = x_ref[...].astype(jnp.float32)                               # (T, Dp)
    t = x.shape[0]
    bp = scale_ref.shape[0]
    onehot = (seg_ref[...] ==
              lax.broadcasted_iota(jnp.int32, (t, bp), 1)).astype(jnp.float32)
    row_scale = jnp.dot(onehot, scale_ref[...], preferred_element_type=jnp.float32,
                        precision=_DOT_PREC)
    row_shift = jnp.dot(onehot, shift_ref[...], preferred_element_type=jnp.float32,
                        precision=_DOT_PREC)
    o_ref[...] = (x * row_scale + row_shift).astype(o_ref.dtype)


@jax.jit
def _segment_norm_jit(features, seg_row, seg_col, counts_arr, gamma, beta):
    n_total, d = features.shape
    n_pad = seg_row.shape[0]
    b_pad = counts_arr.shape[0]
    d_pad = _round_up(d, LANE)
    num_tiles = n_pad // ROW_TILE

    # single vectorized pad (no Python loop of dynamic-update-slices)
    x = jnp.pad(features, ((0, n_pad - n_total), (0, d_pad - d)))
    gamma_p = jnp.pad(gamma.reshape(1, d).astype(jnp.float32),
                      ((0, 0), (0, d_pad - d)))
    beta_p = jnp.pad(beta.reshape(1, d).astype(jnp.float32),
                     ((0, 0), (0, d_pad - d)))

    cparams = pltpu.CompilerParams(vmem_limit_bytes=32 * 1024 * 1024,
                                   dimension_semantics=("arbitrary",))
    scale, shift = pl.pallas_call(
        _stats_kernel,
        out_shape=(jax.ShapeDtypeStruct((b_pad, d_pad), jnp.float32),
                   jax.ShapeDtypeStruct((b_pad, d_pad), jnp.float32)),
        grid=(num_tiles,),
        in_specs=[
            pl.BlockSpec((1, ROW_TILE), lambda i: (0, i)),
            pl.BlockSpec((ROW_TILE, d_pad), lambda i: (i, 0)),
            pl.BlockSpec((b_pad, 1), lambda i: (0, 0)),
            pl.BlockSpec((1, d_pad), lambda i: (0, 0)),
            pl.BlockSpec((1, d_pad), lambda i: (0, 0)),
        ],
        out_specs=(pl.BlockSpec((b_pad, d_pad), lambda i: (0, 0)),
                   pl.BlockSpec((b_pad, d_pad), lambda i: (0, 0))),
        scratch_shapes=[pltpu.VMEM((b_pad, d_pad), jnp.float32),
                        pltpu.VMEM((b_pad, d_pad), jnp.float32)],
        compiler_params=cparams,
    )(seg_col, x, counts_arr, gamma_p, beta_p)

    out = pl.pallas_call(
        _apply_kernel,
        out_shape=jax.ShapeDtypeStruct((n_pad, d_pad), features.dtype),
        grid=(num_tiles,),
        in_specs=[
            pl.BlockSpec((ROW_TILE, 1), lambda i: (i, 0)),
            pl.BlockSpec((ROW_TILE, d_pad), lambda i: (i, 0)),
            pl.BlockSpec((b_pad, d_pad), lambda i: (0, 0)),
            pl.BlockSpec((b_pad, d_pad), lambda i: (0, 0)),
        ],
        out_specs=pl.BlockSpec((ROW_TILE, d_pad), lambda i: (i, 0)),
        compiler_params=pltpu.CompilerParams(
            vmem_limit_bytes=32 * 1024 * 1024,
            dimension_semantics=("parallel",)),
    )(seg_row, x, scale, shift)

    return out[:n_total, :d]


def _segment_normalize_affine(features: jnp.ndarray,
                              counts: List[int],
                              gamma: jnp.ndarray,
                              beta: jnp.ndarray) -> jnp.ndarray:
    """Normalize each per-graph segment of `features` ([N_total, D]) and apply affine."""
    n_total, d = features.shape
    b = len(counts)
    n_pad = _round_up(max(n_total, 1), ROW_TILE)
    b_pad = _round_up(b + 1, 8)      # +1: dummy segment id for padding rows

    # Per-row segment ids: counts are Python ints, so this is pure (cheap) numpy —
    # no per-graph XLA ops, no padding to the global max graph size.
    seg = np.full((n_pad,), b, dtype=np.int32)
    if n_total:
        seg[:n_total] = np.repeat(np.arange(b, dtype=np.int32),
                                  np.asarray(counts, dtype=np.int64))
    seg_row = jnp.asarray(seg.reshape(n_pad, 1))
    seg_col = jnp.asarray(seg.reshape(1, n_pad))

    cnt = np.zeros((b_pad, 1), dtype=np.float32)
    cnt[:b, 0] = np.asarray(counts, dtype=np.float32)
    counts_arr = jnp.asarray(cnt)

    return _segment_norm_jit(features, seg_row, seg_col, counts_arr, gamma, beta)


class GraphNormalizationPallas:
    """JAX/Pallas port of nsc.modules.normalization.GraphNormalization."""

    def __init__(self, node_types: List[str], edge_types: List[str],
                 node_hidden_dim: int, edge_hidden_dim: int, affine: bool = True):
        self.eps = EPS
        self.affine = affine
        # deterministic init, same as PyTorch: gamma = ones, beta = zeros
        self.node_gamma = {t: jnp.ones((node_hidden_dim,), jnp.float32) for t in node_types}
        self.node_beta = {t: jnp.zeros((node_hidden_dim,), jnp.float32) for t in node_types}
        self.edge_gamma = {t: jnp.ones((edge_hidden_dim,), jnp.float32) for t in edge_types}
        self.edge_beta = {t: jnp.zeros((edge_hidden_dim,), jnp.float32) for t in edge_types}

    def __call__(self,
                 batch_num_nodes: Dict[str, List[int]],
                 batch_num_edges: Dict[Tuple[str, str, str], List[int]],
                 feat: Tuple[Dict[str, jnp.ndarray],
                             Dict[Tuple[str, str, str], jnp.ndarray]]):
        node_output = {}
        for node_type, features in feat[0].items():
            g = self.node_gamma[node_type] if self.affine else jnp.ones(features.shape[1], jnp.float32)
            b = self.node_beta[node_type] if self.affine else jnp.zeros(features.shape[1], jnp.float32)
            node_output[node_type] = _segment_normalize_affine(
                features, batch_num_nodes[node_type], g, b)
        edge_output = {}
        for edge_type, features in feat[1].items():
            g = self.edge_gamma[edge_type[1]] if self.affine else jnp.ones(features.shape[1], jnp.float32)
            b = self.edge_beta[edge_type[1]] if self.affine else jnp.zeros(features.shape[1], jnp.float32)
            edge_output[edge_type] = _segment_normalize_affine(
                features, batch_num_edges[edge_type], g, b)
        return node_output, edge_output


# ----------------------------- reference (pure JAX) -----------------------------
def _reference_segment_norm(features, counts, gamma, beta):
    outs, off = [], 0
    for c in counts:
        bf = features[off:off + c]
        if c > 1:
            mean = bf.mean(axis=0, keepdims=True)
            std = jnp.sqrt(((bf - mean) ** 2).mean(axis=0, keepdims=True))
            bf = (bf - mean) / (std + EPS)
        outs.append(bf)
        off += c
    return jnp.concatenate(outs, axis=0) * gamma + beta


if __name__ == "__main__":
    key = jax.random.PRNGKey(0)
    node_hidden_dim, edge_hidden_dim = 32, 16
    node_types = ["atom", "residue"]
    edge_rel_types = ["bond", "contact"]

    # TODO(synk): DGLHeteroGraph itself has no JAX equivalent; per-graph node/edge
    # counts are passed as explicit Python lists (g.batch_num_nodes/num_edges).
    module = GraphNormalizationPallas(node_types, edge_rel_types,
                                      node_hidden_dim, edge_hidden_dim)

    # batch of 2 graphs with variable node/edge counts (includes a size-1 segment)
    batch_num_nodes = {"atom": [5, 7], "residue": [3, 1]}
    batch_num_edges = {("atom", "bond", "atom"): [6, 4],
                       ("residue", "contact", "residue"): [2, 5]}

    k1, k2, k3, k4 = jax.random.split(key, 4)
    node_feat = {
        "atom": jax.random.normal(k1, (sum(batch_num_nodes["atom"]), node_hidden_dim), jnp.float32),
        "residue": jax.random.normal(k2, (sum(batch_num_nodes["residue"]), node_hidden_dim), jnp.float32),
    }
    edge_feat = {
        ("atom", "bond", "atom"):
            jax.random.normal(k3, (sum(batch_num_edges[("atom", "bond", "atom")]), edge_hidden_dim), jnp.float32),
        ("residue", "contact", "residue"):
            jax.random.normal(k4, (sum(batch_num_edges[("residue", "contact", "residue")]), edge_hidden_dim), jnp.float32),
    }

    node_out, edge_out = module(batch_num_nodes, batch_num_edges, (node_feat, edge_feat))
    jax.block_until_ready((node_out, edge_out))

    # correctness check against a pure-JAX reference
    for nt, f in node_feat.items():
        ref = _reference_segment_norm(f, batch_num_nodes[nt],
                                      module.node_gamma[nt], module.node_beta[nt])
        assert np.allclose(np.asarray(node_out[nt]), np.asarray(ref), rtol=1e-4, atol=1e-4), nt
    for et, f in edge_feat.items():
        ref = _reference_segment_norm(f, batch_num_edges[et],
                                      module.edge_gamma[et[1]], module.edge_beta[et[1]])
        assert np.allclose(np.asarray(edge_out[et]), np.asarray(ref), rtol=1e-4, atol=1e-4), et

    print("KERNEL_OK")
</pallas_src>

<mosaic_0001>
module attributes {stable_mosaic.version = 11 : i64} {
  func.func @_stats_kernel(%arg0: i32, %arg1: memref<1x256xi32, #tpu.memory_space<vmem>>, %arg2: memref<256x128xf32, #tpu.memory_space<vmem>>, %arg3: memref<8x1xf32, #tpu.memory_space<vmem>>, %arg4: memref<1x128xf32, #tpu.memory_space<vmem>>, %arg5: memref<1x128xf32, #tpu.memory_space<vmem>>, %arg6: memref<8x128xf32, #tpu.memory_space<vmem>>, %arg7: memref<8x128xf32, #tpu.memory_space<vmem>>, %arg8: memref<8x128xf32, #tpu.memory_space<vmem>>, %arg9: memref<8x128xf32, #tpu.memory_space<vmem>>) attributes {dimension_semantics = [#tpu.dimension_semantics<arbitrary>], iteration_bounds = array<i64: 1>, scalar_prefetch = 0 : i64, scratch_operands = 2 : i64, tpu.core_type = #tpu.core_type<tc>, window_params = [{transform_indices = @transform_0, window_bounds = array<i64: 1, 256>}, {transform_indices = @transform_1, window_bounds = array<i64: 256, 128>}, {pipeline_mode = #tpu.pipeline_mode<synchronous>, transform_indices = @transform_2, window_bounds = array<i64: 8, 1>}, {pipeline_mode = #tpu.pipeline_mode<synchronous>, transform_indices = @transform_3, window_bounds = array<i64: 1, 128>}, {pipeline_mode = #tpu.pipeline_mode<synchronous>, transform_indices = @transform_4, window_bounds = array<i64: 1, 128>}, {pipeline_mode = #tpu.pipeline_mode<synchronous>, transform_indices = @transform_5, window_bounds = array<i64: 8, 128>}, {pipeline_mode = #tpu.pipeline_mode<synchronous>, transform_indices = @transform_6, window_bounds = array<i64: 8, 128>}]} {
    %c0_i32 = arith.constant 0 : i32
    %0 = arith.cmpi eq, %arg0, %c0_i32 : i32
    %1 = arith.extui %0 : i1 to i32
    %c0_i32_0 = arith.constant 0 : i32
    %2 = arith.cmpi ne, %1, %c0_i32_0 : i32
    scf.if %2 {
      %cst_15 = arith.constant 0.000000e+00 : f32
      %22 = vector.broadcast %cst_15 : f32 to vector<8x128xf32>
      %c0_16 = arith.constant 0 : index
      %c0_17 = arith.constant 0 : index
      %23 = vector.load %arg8[%c0_16, %c0_17] : memref<8x128xf32, #tpu.memory_space<vmem>>, vector<8x128xf32>
      tpu.vector_store %arg8[%c0_16, %c0_17], %22 {strides = array<i32>} : memref<8x128xf32, #tpu.memory_space<vmem>>, vector<8x128xf32>,
      %cst_18 = arith.constant 0.000000e+00 : f32
      %24 = vector.broadcast %cst_18 : f32 to vector<8x128xf32>
      %c0_19 = arith.constant 0 : index
      %c0_20 = arith.constant 0 : index
      %25 = vector.load %arg9[%c0_19, %c0_20] : memref<8x128xf32, #tpu.memory_space<vmem>>, vector<8x128xf32>
      tpu.vector_store %arg9[%c0_19, %c0_20], %24 {strides = array<i32>} : memref<8x128xf32, #tpu.memory_space<vmem>>, vector<8x128xf32>,
    } else {
    }
    %c0 = arith.constant 0 : index
    %c0_1 = arith.constant 0 : index
    %3 = vector.load %arg2[%c0, %c0_1] : memref<256x128xf32, #tpu.memory_space<vmem>>, vector<256x128xf32>
    %c0_2 = arith.constant 0 : index
    %c0_3 = arith.constant 0 : index
    %4 = vector.load %arg1[%c0_2, %c0_3] : memref<1x256xi32, #tpu.memory_space<vmem>>, vector<1x256xi32>
    %5 = tpu.iota {dimensions = array<i32: 0>} : vector<8x256xi32>
    %6 = vector.broadcast %4 : vector<1x256xi32> to vector<8x256xi32>
    %7 = arith.cmpi eq, %6, %5 : vector<8x256xi32>
    %8 = arith.extui %7 : vector<8x256xi1> to vector<8x256xi32>
    %9 = arith.sitofp %8 : vector<8x256xi32> to vector<8x256xf32>
    %c0_4 = arith.constant 0 : index
    %c0_5 = arith.constant 0 : index
    %10 = vector.load %arg8[%c0_4, %c0_5] : memref<8x128xf32, #tpu.memory_space<vmem>>, vector<8x128xf32>
    %cst = arith.constant dense<0.000000e+00> : vector<8x128xf32>
    %11 = tpu.matmul %9, %3, %cst {dimension_numbers = #tpu.dot_dimension_numbers<[1], [0], [0], [1], [0, 0, 1, 1], [], []>, precision = #tpu.contract_precision<fp32>} : vector<8x256xf32>, vector<256x128xf32>, vector<8x128xf32> -> vector<8x128xf32>
    %12 = arith.addf %10, %11 : vector<8x128xf32>
    %c0_6 = arith.constant 0 : index
    %c0_7 = arith.constant 0 : index
    %13 = vector.load %arg8[%c0_6, %c0_7] : memref<8x128xf32, #tpu.memory_space<vmem>>, vector<8x128xf32>
    tpu.vector_store %arg8[%c0_6, %c0_7], %12 {strides = array<i32>} : memref<8x128xf32, #tpu.memory_space<vmem>>, vector<8x128xf32>,
    %c0_8 = arith.constant 0 : index
    %c0_9 = arith.constant 0 : index
    %14 = vector.load %arg9[%c0_8, %c0_9] : memref<8x128xf32, #tpu.memory_space<vmem>>, vector<8x128xf32>
    %15 = arith.mulf %3, %3 : vector<256x128xf32>
    %cst_10 = arith.constant dense<0.000000e+00> : vector<8x128xf32>
    %16 = tpu.matmul %9, %15, %cst_10 {dimension_numbers = #tpu.dot_dimension_numbers<[1], [0], [0], [1], [0, 0, 1, 1], [], []>, precision = #tpu.contract_precision<fp32>} : vector<8x256xf32>, vector<256x128xf32>, vector<8x128xf32> -> vector<8x128xf32>
    %17 = arith.addf %14, %16 : vector<8x128xf32>
    %c0_11 = arith.constant 0 : index
    %c0_12 = arith.constant 0 : index
    %18 = vector.load %arg9[%c0_11, %c0_12] : memref<8x128xf32, #tpu.memory_space<vmem>>, vector<8x128xf32>
    tpu.vector_store %arg9[%c0_11, %c0_12], %17 {strides = array<i32>} : memref<8x128xf32, #tpu.memory_space<vmem>>, vector<8x128xf32>,
    %c0_i32_13 = arith.constant 0 : i32
    %19 = arith.cmpi eq, %arg0, %c0_i32_13 : i32
    %20 = arith.extui %19 : i1 to i32
    %c0_i32_14 = arith.constant 0 : i32
    %21 = arith.cmpi ne, %20, %c0_i32_14 : i32
    scf.if %21 {
      %c0_15 = arith.constant 0 : index
      %c0_16 = arith.constant 0 : index
      %22 = vector.load %arg3[%c0_15, %c0_16] : memref<8x1xf32, #tpu.memory_space<vmem>>, vector<8x1xf32>
      %cst_17 = arith.constant 1.000000e+00 : f32
      %23 = vector.broadcast %cst_17 : f32 to vector<8x1xf32>
      %24 = arith.maximumf %22, %23 : vector<8x1xf32>
      %c0_18 = arith.constant 0 : index
      %c0_19 = arith.constant 0 : index
      %25 = vector.load %arg8[%c0_18, %c0_19] : memref<8x128xf32, #tpu.memory_space<vmem>>, vector<8x128xf32>
      %26 = vector.broadcast %24 : vector<8x1xf32> to vector<8x128xf32>
      %27 = arith.divf %25, %26 : vector<8x128xf32>
      %c0_20 = arith.constant 0 : index
      %c0_21 = arith.constant 0 : index
      %28 = vector.load %arg9[%c0_20, %c0_21] : memref<8x128xf32, #tpu.memory_space<vmem>>, vector<8x128xf32>
      %29 = vector.broadcast %24 : vector<8x1xf32> to vector<8x128xf32>
      %30 = arith.divf %28, %29 : vector<8x128xf32>
      %31 = arith.mulf %27, %27 : vector<8x128xf32>
      %32 = arith.subf %30, %31 : vector<8x128xf32>
      %cst_22 = arith.constant 0.000000e+00 : f32
      %33 = vector.broadcast %cst_22 : f32 to vector<8x128xf32>
      %34 = arith.maximumf %32, %33 : vector<8x128xf32>
      %35 = math.sqrt %34 : vector<8x128xf32>
      %cst_23 = arith.constant 9.99999974E-6 : f32
      %36 = vector.broadcast %cst_23 : f32 to vector<8x128xf32>
      %37 = arith.addf %35, %36 : vector<8x128xf32>
      %38 = tpu.reciprocal %37 : vector<8x128xf32> -> vector<8x128xf32>
      %c0_24 = arith.constant 0 : index
      %c0_25 = arith.constant 0 : index
      %39 = vector.load %arg4[%c0_24, %c0_25] : memref<1x128xf32, #tpu.memory_space<vmem>>, vector<1x128xf32>
      %c0_26 = arith.constant 0 : index
      %c0_27 = arith.constant 0 : index
      %40 = vector.load %arg5[%c0_26, %c0_27] : memref<1x128xf32, #tpu.memory_space<vmem>>, vector<1x128xf32>
      %cst_28 = arith.constant 1.000000e+00 : f32
      %41 = vector.broadcast %cst_28 : f32 to vector<8x1xf32>
      %42 = arith.cmpf ogt, %22, %41 : vector<8x1xf32>
      %43 = vector.broadcast %39 : vector<1x128xf32> to vector<8x128xf32>
      %44 = arith.mulf %43, %38 : vector<8x128xf32>
      %45 = vector.shape_cast %42 : vector<8x1xi1> to vector<8x1xi1>
      %46 = vector.broadcast %45 : vector<8x1xi1> to vector<8x128xi1>
      %47 = vector.shape_cast %39 : vector<1x128xf32> to vector<1x128xf32>
      %48 = vector.broadcast %47 : vector<1x128xf32> to vector<8x128xf32>
      %49 = arith.select %46, %44, %48 : vector<8x128xi1>, vector<8x128xf32>
      %50 = arith.mulf %27, %49 : vector<8x128xf32>
      %51 = vector.broadcast %40 : vector<1x128xf32> to vector<8x128xf32>
      %52 = arith.subf %51, %50 : vector<8x128xf32>
      %53 = vector.shape_cast %42 : vector<8x1xi1> to vector<8x1xi1>
      %54 = vector.broadcast %53 : vector<8x1xi1> to vector<8x128xi1>
      %55 = vector.shape_cast %40 : vector<1x128xf32> to vector<1x128xf32>
      %56 = vector.broadcast %55 : vector<1x128xf32> to vector<8x128xf32>
      %57 = arith.select %54, %52, %56 : vector<8x128xi1>, vector<8x128xf32>
      %c0_29 = arith.constant 0 : index
      %c0_30 = arith.constant 0 : index
      %58 = vector.load %arg6[%c0_29, %c0_30] : memref<8x128xf32, #tpu.memory_space<vmem>>, vector<8x128xf32>
      tpu.vector_store %arg6[%c0_29, %c0_30], %49 {strides = array<i32>} : memref<8x128xf32, #tpu.memory_space<vmem>>, vector<8x128xf32>,
      %c0_31 = arith.constant 0 : index
      %c0_32 = arith.constant 0 : index
      %59 = vector.load %arg7[%c0_31, %c0_32] : memref<8x128xf32, #tpu.memory_space<vmem>>, vector<8x128xf32>
      tpu.vector_store %arg7[%c0_31, %c0_32], %57 {strides = array<i32>} : memref<8x128xf32, #tpu.memory_space<vmem>>, vector<8x128xf32>,
    } else {
    }
    return
  }
  func.func @transform_0(%arg0: i32) -> (i32, i32) {
    %c0_i32 = arith.constant 0 : i32
    %c0_i32_0 = arith.constant 0 : i32
    return %c0_i32, %arg0 : i32, i32
  }
  func.func @transform_1(%arg0: i32) -> (i32, i32) {
    %c0_i32 = arith.constant 0 : i32
    %c0_i32_0 = arith.constant 0 : i32
    return %arg0, %c0_i32 : i32, i32
  }
  func.func @transform_2(%arg0: i32) -> (i32, i32) {
    %c0_i32 = arith.constant 0 : i32
    %c0_i32_0 = arith.constant 0 : i32
    %c0_i32_1 = arith.constant 0 : i32
    return %c0_i32, %c0_i32_0 : i32, i32
  }
  func.func @transform_3(%arg0: i32) -> (i32, i32) {
    %c0_i32 = arith.constant 0 : i32
    %c0_i32_0 = arith.constant 0 : i32
    %c0_i32_1 = arith.constant 0 : i32
    return %c0_i32, %c0_i32_0 : i32, i32
  }
  func.func @transform_4(%arg0: i32) -> (i32, i32) {
    %c0_i32 = arith.constant 0 : i32
    %c0_i32_0 = arith.constant 0 : i32
    %c0_i32_1 = arith.constant 0 : i32
    return %c0_i32, %c0_i32_0 : i32, i32
  }
  func.func @transform_5(%arg0: i32) -> (i32, i32) {
    %c0_i32 = arith.constant 0 : i32
    %c0_i32_0 = arith.constant 0 : i32
    %c0_i32_1 = arith.constant 0 : i32
    return %c0_i32, %c0_i32_0 : i32, i32
  }
  func.func @transform_6(%arg0: i32) -> (i32, i32) {
    %c0_i32 = arith.constant 0 : i32
    %c0_i32_0 = arith.constant 0 : i32
    %c0_i32_1 = arith.constant 0 : i32
    return %c0_i32, %c0_i32_0 : i32, i32
  }
}

module attributes {stable_mosaic.version = 11 : i64} {
  func.func @_apply_kernel(%arg0: i32, %arg1: memref<256x1xi32, #tpu.memory_space<vmem>>, %arg2: memref<256x128xf32, #tpu.memory_space<vmem>>, %arg3: memref<8x128xf32, #tpu.memory_space<vmem>>, %arg4: memref<8x128xf32, #tpu.memory_space<vmem>>, %arg5: memref<256x128xf32, #tpu.memory_space<vmem>>) attributes {dimension_semantics = [#tpu.dimension_semantics<parallel>], iteration_bounds = array<i64: 1>, scalar_prefetch = 0 : i64, scratch_operands = 0 : i64, tpu.core_type = #tpu.core_type<tc>, window_params = [{transform_indices = @transform_0, window_bounds = array<i64: 256, 1>}, {transform_indices = @transform_1, window_bounds = array<i64: 256, 128>}, {pipeline_mode = #tpu.pipeline_mode<synchronous>, transform_indices = @transform_2, window_bounds = array<i64: 8, 128>}, {pipeline_mode = #tpu.pipeline_mode<synchronous>, transform_indices = @transform_3, window_bounds = array<i64: 8, 128>}, {transform_indices = @transform_4, window_bounds = array<i64: 256, 128>}]} {
    %c0 = arith.constant 0 : index
    %c0_0 = arith.constant 0 : index
    %0 = vector.load %arg2[%c0, %c0_0] : memref<256x128xf32, #tpu.memory_space<vmem>>, vector<256x128xf32>
    %c0_1 = arith.constant 0 : index
    %c0_2 = arith.constant 0 : index
    %1 = vector.load %arg1[%c0_1, %c0_2] : memref<256x1xi32, #tpu.memory_space<vmem>>, vector<256x1xi32>
    %2 = tpu.iota {dimensions = array<i32: 1>} : vector<256x8xi32>
    %3 = vector.broadcast %1 : vector<256x1xi32> to vector<256x8xi32>
    %4 = arith.cmpi eq, %3, %2 : vector<256x8xi32>
    %5 = arith.extui %4 : vector<256x8xi1> to vector<256x8xi32>
    %6 = arith.sitofp %5 : vector<256x8xi32> to vector<256x8xf32>
    %c0_3 = arith.constant 0 : index
    %c0_4 = arith.constant 0 : index
    %7 = vector.load %arg3[%c0_3, %c0_4] : memref<8x128xf32, #tpu.memory_space<vmem>>, vector<8x128xf32>
    %cst = arith.constant dense<0.000000e+00> : vector<256x128xf32>
    %8 = tpu.matmul %6, %7, %cst {dimension_numbers = #tpu.dot_dimension_numbers<[1], [0], [0], [1], [0, 0, 1, 1], [], []>, precision = #tpu.contract_precision<fp32>} : vector<256x8xf32>, vector<8x128xf32>, vector<256x128xf32> -> vector<256x128xf32>
    %c0_5 = arith.constant 0 : index
    %c0_6 = arith.constant 0 : index
    %9 = vector.load %arg4[%c0_5, %c0_6] : memref<8x128xf32, #tpu.memory_space<vmem>>, vector<8x128xf32>
    %cst_7 = arith.constant dense<0.000000e+00> : vector<256x128xf32>
    %10 = tpu.matmul %6, %9, %cst_7 {dimension_numbers = #tpu.dot_dimension_numbers<[1], [0], [0], [1], [0, 0, 1, 1], [], []>, precision = #tpu.contract_precision<fp32>} : vector<256x8xf32>, vector<8x128xf32>, vector<256x128xf32> -> vector<256x128xf32>
    %11 = arith.mulf %0, %8 : vector<256x128xf32>
    %12 = arith.addf %11, %10 : vector<256x128xf32>
    %c0_8 = arith.constant 0 : index
    %c0_9 = arith.constant 0 : index
    %13 = vector.load %arg5[%c0_8, %c0_9] : memref<256x128xf32, #tpu.memory_space<vmem>>, vector<256x128xf32>
    tpu.vector_store %arg5[%c0_8, %c0_9], %12 {strides = array<i32>} : memref<256x128xf32, #tpu.memory_space<vmem>>, vector<256x128xf32>,
    return
  }
  func.func @transform_0(%arg0: i32) -> (i32, i32) {
    %c0_i32 = arith.constant 0 : i32
    %c0_i32_0 = arith.constant 0 : i32
    return %arg0, %c0_i32 : i32, i32
  }
  func.func @transform_1(%arg0: i32) -> (i32, i32) {
    %c0_i32 = arith.constant 0 : i32
    %c0_i32_0 = arith.constant 0 : i32
    return %arg0, %c0_i32 : i32, i32
  }
  func.func @transform_2(%arg0: i32) -> (i32, i32) {
    %c0_i32 = arith.constant 0 : i32
    %c0_i32_0 = arith.constant 0 : i32
    %c0_i32_1 = arith.constant 0 : i32
    return %c0_i32, %c0_i32_0 : i32, i32
  }
  func.func @transform_3(%arg0: i32) -> (i32, i32) {
    %c0_i32 = arith.constant 0 : i32
    %c0_i32_0 = arith.constant 0 : i32
    %c0_i32_1 = arith.constant 0 : i32
    return %c0_i32, %c0_i32_0 : i32, i32
  }
  func.func @transform_4(%arg0: i32) -> (i32, i32) {
    %c0_i32 = arith.constant 0 : i32
    %c0_i32_0 = arith.constant 0 : i32
    return %arg0, %c0_i32 : i32, i32
  }
}

</mosaic_0001>

<bundles_post_ra>
// kernel: _segment_norm_jit.2
= control target key start
LH: loop header
LB: loop body
LE: loop exit
PB: predicated region body
PF: predicated region fallthrough
CT: control target
= control target key end

     0   :  { %s3797_s1 = inlined_call_operand.vmem [shape: f32[256,128], index: 1, kind: input, shape index: {}]   ;;  %s3798_s0 = inlined_call_operand.vmem [shape: s32[1,256], index: 0, kind: input, shape index: {}]   ;;  %s3799_s2 = inlined_call_operand.vmem [shape: f32[8,1], index: 2, kind: input, shape index: {}]   ;;  %s3800_s3 = inlined_call_operand.vmem [shape: f32[1,128], index: 3, kind: input, shape index: {}]   ;;  %s3801_s4 = inlined_call_operand.vmem [shape: f32[1,128], index: 4, kind: input, shape index: {}]   ;;  %s3802_s5 = inlined_call_operand.vmem [shape: f32[8,128], index: 5, kind: output, shape index: {0}]   ;;  %s3803_s6 = inlined_call_operand.vmem [shape: f32[8,128], index: 6, kind: output, shape index: {1}]  }
   0x1   :  { %v2388_v0 = vld [vmem:[%s3797_s1 + $0xf8] sm:$0xff]  ;;  %v2398_v2 = vld [vmem:[%s3797_s1 + $0xf0] sm:$0xff]  ;;  %v2417_v7 = vld [vmem:[%s3797_s1 + $0xe8] sm:$0xff] }
   0x2   :  { %3960 = vst [vmem:[#allocation4_spill] sm:$0xff] %v2388_v0  ;;  %v2393_v1 = vld [vmem:[%s3797_s1 + $0x78] sm:$0xff]  ;;  %3962 = vst [vmem:[#allocation6_spill] sm:$0xff] %v2398_v2  ;;  %v2401_v3 = vand.u32 4294901760, %v2388_v0  ;;  %v2407_v5 = vand.u32 4294901760, %v2398_v2  ;;  %v2412_v6 = vld [vmem:[%s3797_s1 + $0x70] sm:$0xff] }
   0x3   :  { %3961 = vst [vmem:[#allocation5_spill] sm:$0xff] %v2393_v1  ;;  %v2404_v4 = vand.u32 4294901760, %v2393_v1  ;;  %3963 = vst [vmem:[#allocation7_spill] sm:$0xff] %v2412_v6  ;;  %v2422_v8 = vld [vmem:[%s3797_s1 + $0x68] sm:$0xff]  ;;  %v2425_v9 = vand.u32 4294901760, %v2412_v6  ;;  %v2428_v10 = vand.u32 4294901760, %v2417_v7 }
   0x4   :  { %3964 = vst [vmem:[#allocation8_spill] sm:$0xff] %v2417_v7  ;;  %3965 = vst [vmem:[#allocation9_spill] sm:$0xff] %v2422_v8  ;;  %v2431_v11 = vand.u32 4294901760, %v2422_v8  ;;  %v2436_v12 = vld [vmem:[%s3797_s1 + $0xe0] sm:$0xff]  ;;  %v2446_v14 = vld [vmem:[%s3797_s1 + $0xd8] sm:$0xff]  ;;  %1917 = vmatprep.subr.mxu0 %v2401_v3  ;;  %v2460_v19 = vsub.f32 %v2388_v0, %v2401_v3  ;;  %v2490_v26 = vsub.f32 %v2398_v2, %v2407_v5 }
   0x5   :  { %3966 = vst [vmem:[#allocation10_spill] sm:$0xff] %v2436_v12  ;;  %v2441_v13 = vld [vmem:[%s3797_s1 + $0x60] sm:$0xff]  ;;  %3968 = vst [vmem:[#allocation12_spill] sm:$0xff] %v2446_v14  ;;  %v2450_v16 = vand.u32 4294901760, %v2436_v12  ;;  %v2456_v18 = vand.u32 4294901760, %v2446_v14  ;;  %v2465_v20 = vld [vmem:[%s3797_s1 + $0x58] sm:$0xff]  ;;  %1918 = vmatpush3.msra.mxu0 %v2404_v4  ;;  %v2483_v24 = vsub.f32 %v2393_v1, %v2404_v4  ;;  %v2514_v32 = vsub.f32 %v2412_v6, %v2425_v9 }
   0x6   :  { %3967 = vst [vmem:[#allocation11_spill] sm:$0xff] %v2441_v13  ;;  %v2453_v17 = vand.u32 4294901760, %v2441_v13  ;;  %3969 = vst [vmem:[#allocation13_spill] sm:$0xff] %v2465_v20  ;;  %v2470_v21 = vld [vmem:[%s3797_s1 + $0xd0] sm:$0xff]  ;;  %v2479_v23 = vand.u32 4294901760, %v2465_v20  ;;  %v2495_v27 = vld [vmem:[%s3797_s1 + $0xc8] sm:$0xff]  ;;  %1919 = vmatprep.subr.mxu0 %v2407_v5  ;;  %v2524_v36 = vsub.f32 %v2417_v7, %v2428_v10  ;;  %v2541_v41 = vsub.f32 %v2422_v8, %v2431_v11 }
   0x7   :  { %3970 = vst [vmem:[#allocation14_spill] sm:$0xff] %v2470_v21  ;;  %v2475_v22 = vld [vmem:[%s3797_s1 + $0x50] sm:$0xff]  ;;  %v2486_v25 = vand.u32 4294901760, %v2470_v21  ;;  %3972 = vst [vmem:[#allocation16_spill] sm:$0xff] %v2495_v27  ;;  %v2500_v28 = vld [vmem:[%s3797_s1 + $0x48] sm:$0xff]  ;;  %v3810_v30 = vand.u32 4294901760, %v2460_v19  ;;  %1920 = vmatpush3.msra.mxu0 %v2425_v9  ;;  %v2556_v46 = vsub.f32 %v2436_v12, %v2450_v16 }
   0x8   :  { %3971 = vst [vmem:[#allocation15_spill] sm:$0xff] %v2475_v22  ;;  %3973 = vst [vmem:[#allocation17_spill] sm:$0xff] %v2500_v28  ;;  %v2505_v29 = vld [vmem:[%s3797_s1 + $0xc0] sm:$0xff]  ;;  %v2510_v31 = vand.u32 4294901760, %v2475_v22  ;;  %v2517_v33 = vand.u32 4294901760, %v2495_v27  ;;  %v3809_v34 = vand.u32 4294901760, %v2483_v24  ;;  %1921 = vmatprep.subr.mxu0 %v2428_v10  ;;  %v2592_v60 = vsub.f32 %v2441_v13, %v2453_v17 }
   0x9   :  { %3974 = vst [vmem:[#allocation18_spill] sm:$0xff] %v2505_v29  ;;  %v3808_v35 = vand.u32 4294901760, %v2490_v26  ;;  %v2527_v37 = vand.u32 4294901760, %v2500_v28  ;;  %v2532_v38 = vld [vmem:[%s3797_s1 + $0x40] sm:$0xff]  ;;  %v306_v39 = vsub.f32 %v2460_v19, %v3810_v30  ;;  %v3807_v40 = vand.u32 4294901760, %v2514_v32  ;;  %1922 = vmatpush3.msra.mxu0 %v2431_v11  ;;  %v2561_v47 = vld [vmem:[%s3797_s1 + $0xb8] sm:$0xff] }
   0xa   :  { %3976 = vst [vmem:[#allocation20_spill] sm:$0xff] %v2532_v38  ;;  %v2544_v42 = vand.u32 4294901760, %v2505_v29  ;;  %v194_v43 = vsub.f32 %v2483_v24, %v3809_v34  ;;  %v3806_v45 = vand.u32 4294901760, %v2524_v36  ;;  %3978 = vst [vmem:[#allocation22_spill] sm:$0xff] %v2561_v47  ;;  %1923 = vmatprep.subr.mxu0 %v2450_v16  ;;  %v3805_v50 = vand.u32 4294901760, %v2541_v41  ;;  %v2574_v52 = vld [vmem:[%s3797_s1 + $0x38] sm:$0xff] }
   0xb   :  { %3975 = vst [vmem:[#allocation19_spill] sm:$0xff] %v2527_v37  ;;  %v313_v44 = vsub.f32 %v2490_v26, %v3808_v35  ;;  %v307_v48 = vand.u32 4294901760, %v306_v39  ;;  %v201_v49 = vsub.f32 %v2514_v32, %v3807_v40  ;;  %v2569_v51 = vand.u32 4294901760, %v2532_v38  ;;  %3980 = vst [vmem:[#allocation24_spill] sm:$0xff] %v2574_v52  ;;  %1924 = vmatpush3.msra.mxu0 %v2453_v17  ;;  %v2584_v57 = vld [vmem:[%s3797_s1 + $0xb0] sm:$0xff]  ;;  %v2656_v30 = vld [vmem:[%s3797_s1 + $0xa0] sm:$0xff] }
   0xc   :  { %3977 = vst [vmem:[#allocation21_spill] sm:$0xff] %v2544_v42  ;;  %v195_v53 = vand.u32 4294901760, %v194_v43  ;;  %v320_v55 = vsub.f32 %v2524_v36, %v3806_v45  ;;  %v3804_v56 = vand.u32 4294901760, %v2556_v46  ;;  %3981 = vst [vmem:[#allocation25_spill] sm:$0xff] %v2584_v57  ;;  %1925 = vmatprep.subr.mxu0 %v2456_v18  ;;  %v208_v59 = vsub.f32 %v2541_v41, %v3805_v50  ;;  %v2600_v62 = vld [vmem:[%s3797_s1 + $0x30] sm:$0xff]  ;;  %v2630_v50 = vld [vmem:[%s3797_s1 + $0x28] sm:$0xff] }
   0xd   :  { %3979 = vst [vmem:[#allocation23_spill] sm:$0xff] %v2569_v51  ;;  %v314_v54 = vand.u32 4294901760, %v313_v44  ;;  %1952 = vmatprep.subr.mxu1 %v307_v48  ;;  %v202_v58 = vand.u32 4294901760, %v201_v49  ;;  %v2595_v61 = vand.u32 4294901760, %v2561_v47  ;;  %3983 = vst [vmem:[#allocation27_spill] sm:$0xff] %v2600_v62  ;;  %1926 = vmatpush3.msra.mxu0 %v2479_v23  ;;  %v2608_v43 = vsub.f32 %v2446_v14, %v2456_v18  ;;  %v2616_v48 = vld [vmem:[%s3797_s1 + $0xa8] sm:$0xff] }
   0xe   :  { %1953 = vmatpush3.msra.mxu1 %v195_v53  ;;  %v321_v63 = vand.u32 4294901760, %v320_v55  ;;  %v327_v39 = vsub.f32 %v2556_v46, %v3804_v56  ;;  %v2611_v44 = vand.u32 4294901760, %v2574_v52  ;;  %3985 = vst [vmem:[#allocation29_spill] sm:$0xff] %v2616_v48  ;;  %1927 = vmatprep.subr.mxu0 %v2486_v25  ;;  %v209_v49 = vand.u32 4294901760, %v208_v59  ;;  %3987 = vst [vmem:[#allocation31_spill] sm:$0xff] %v2630_v50  ;;  %v2709_v13 = vld [vmem:[%s3797_s1 + $0x18] sm:$0xff] }
   0xf   :  { %3982 = vst [vmem:[#allocation26_spill] sm:$0xff] %v2595_v61  ;;  %1954 = vmatprep.subr.mxu1 %v314_v54  ;;  %v3811_v53 = vand.u32 4294901760, %v2592_v60  ;;  %v2622_v55 = vsub.f32 %v2465_v20, %v2479_v23  ;;  %v2625_v56 = vand.u32 4294901760, %v2584_v57  ;;  %1928 = vmatpush3.msra.mxu0 %v2510_v31  ;;  %v3815_v54 = vand.u32 4294901760, %v2608_v43  ;;  %3990 = vst [vmem:[#allocation34_spill] sm:$0xff] %v2656_v30  ;;  %v2752_v8 = vld [vmem:[%s3797_s1 + $0x88] sm:$0xff] }
  0x10   :  { %3984 = vst [vmem:[#allocation28_spill] sm:$0xff] %v2611_v44  ;;  %1955 = vmatpush3.msra.mxu1 %v202_v58  ;;  %v328_v45 = vand.u32 4294901760, %v327_v39  ;;  %v2636_v59 = vsub.f32 %v2470_v21, %v2486_v25  ;;  %v2639_v40 = vand.u32 4294901760, %v2600_v62  ;;  %1929 = vmatprep.subr.mxu0 %v2517_v33  ;;  %v2648_v58 = vsub.f32 %v2475_v22, %v2510_v31 }
  0x11   :  { %3986 = vst [vmem:[#allocation30_spill] sm:$0xff] %v2625_v56  ;;  %1956 = vmatprep.subr.mxu1 %v321_v63  ;;  %v215_v35 = vsub.f32 %v2592_v60, %v3811_v53  ;;  %v2651_v39 = vand.u32 4294901760, %v2616_v48  ;;  %1930 = vmatpush3.msra.mxu0 %v2527_v37  ;;  %v334_v63 = vsub.f32 %v2608_v43, %v3815_v54  ;;  %v2668_v34 = vand.u32 4294901760, %v2630_v50  ;;  %v2682_v53 = vld [vmem:[%s3797_s1 + $0x20] sm:$0xff] }
  0x12   :  { %3988 = vst [vmem:[#allocation32_spill] sm:$0xff] %v2639_v40  ;;  %1957 = vmatpush3.msra.mxu1 %v209_v49  ;;  %v2665_v15 = vsub.f32 %v2495_v27, %v2517_v33  ;;  %1931 = vmatprep.subr.mxu0 %v2544_v42  ;;  %v3992_v21 = vand.u32 4294901760, %v2622_v55  ;;  %v2677_v54 = vsub.f32 %v2500_v28, %v2527_v37  ;;  %3993 = vst [vmem:[#allocation36_spill] sm:$0xff] %v2682_v53  ;;  %v2695_v28 = vld [vmem:[%s3797_s1 + $0x98] sm:$0xff] }
  0x13   :  { %3989 = vst [vmem:[#allocation33_spill] sm:$0xff] %v2651_v39  ;;  %3991 = vst [vmem:[#allocation35_spill] sm:$0xff] %v2668_v34  ;;  %1958 = vmatprep.subr.mxu1 %v328_v45  ;;  %v216_v22 = vand.u32 4294901760, %v215_v35  ;;  %1932 = vmatpush3.msra.mxu0 %v2569_v51  ;;  %v335_v27 = vand.u32 4294901760, %v334_v63  ;;  %v3994_v35 = vand.u32 4294901760, %v2636_v59  ;;  %v2690_v14 = vand.u32 4294901760, %v2656_v30 }
  0x14   :  { %v222_v49 = vsub.f32 %v2622_v55, %v3992_v21  ;;  %3996 = vst [vmem:[#allocation38_spill] sm:$0xff] %v2695_v28  ;;  %1933 = vmatprep.subr.mxu0 %v2595_v61  ;;  %v3997_v63 = vand.u32 4294901760, %v2648_v58  ;;  %v2704_v21 = vsub.f32 %v2505_v29, %v2544_v42  ;;  %3998 = vst [vmem:[#allocation39_spill] sm:$0xff] %v2709_v13  ;;  %v2725_v29 = vld [vmem:[%s3797_s1 + $0x90] sm:$0xff]  ;;  %v2733_v2 = vand.u32 4294901760, %v2695_v28 }
  0x15   :  { %v341_v45 = vsub.f32 %v2636_v59, %v3994_v35  ;;  %3995 = vst [vmem:[#allocation37_spill] sm:$0xff] %v2690_v14  ;;  %1959 = vmatpush3.msra.mxu1 %v216_v22  ;;  %1934 = vmatpush3.msra.mxu0 %v2611_v44  ;;  %v2720_v35 = vsub.f32 %v2532_v38, %v2569_v51  ;;  %4001 = vst [vmem:[#allocation41_spill] sm:$0xff] %v2725_v29  ;;  %v2738_v38 = vld [vmem:[%s3797_s1 + $0x10] sm:$0xff]  ;;  %v2763_v1 = vand.u32 4294901760, %v2725_v29 }
  0x16   :  { %v223_v20 = vand.u32 4294901760, %v222_v49  ;;  %v229_v12 = vsub.f32 %v2648_v58, %v3997_v63  ;;  %1960 = vmatprep.subr.mxu1 %v335_v27  ;;  %v3999_v49 = vand.u32 4294901760, %v2665_v15  ;;  %v2716_v63 = vand.u32 4294901760, %v2682_v53  ;;  %1935 = vmatprep.subr.mxu0 %v2625_v56  ;;  %4003 = vst [vmem:[#allocation42_spill] sm:$0xff] %v2733_v2  ;;  %4004 = vst [vmem:[#allocation43_spill] sm:$0xff] %v2738_v38 }
  0x17   :  { %v342_v22 = vand.u32 4294901760, %v341_v45  ;;  %v4002_v45 = vand.u32 4294901760, %v2677_v54  ;;  %1936 = vmatpush3.msra.mxu0 %v2639_v40  ;;  %v2744_v6 = vsub.f32 %v2561_v47, %v2595_v61  ;;  %4006 = vst [vmem:[#allocation45_spill] sm:$0xff] %v2752_v8  ;;  %v2760_v47 = vsub.f32 %v2574_v52, %v2611_v44  ;;  %v2780_v52 = vld [vmem:[%s3797_s1 + $0x8] sm:$0xff] }
  0x18   :  { %v348_v7 = vsub.f32 %v2665_v15, %v3999_v49  ;;  %4000 = vst [vmem:[#allocation40_spill] sm:$0xff] %v2716_v63  ;;  %1961 = vmatpush3.msra.mxu1 %v223_v20  ;;  %v230_v27 = vand.u32 4294901760, %v229_v12  ;;  %1937 = vmatprep.subr.mxu0 %v2651_v39  ;;  %v4008_v0 = vand.u32 4294901760, %v2720_v35  ;;  %v2772_v61 = vsub.f32 %v2584_v57, %v2625_v56  ;;  %v2794_v56 = vld [vmem:[%s3797_s1 + $0x80] sm:$0xff] }
  0x19   :  { %v236_v49 = vsub.f32 %v2677_v54, %v4002_v45  ;;  %1962 = vmatprep.subr.mxu1 %v342_v22  ;;  %v2747_v45 = vand.u32 4294901760, %v2709_v13  ;;  %1938 = vmatpush3.msra.mxu0 %v2668_v34  ;;  %4010 = vst [vmem:[#allocation47_spill] sm:$0xff] %v2780_v52  ;;  %v2789_v57 = vand.u32 4294901760, %v2752_v8  ;;  %4012 = vst [vmem:[#allocation49_spill] sm:$0xff] %v2794_v56  ;;  %v4013_v44 = vand.u32 4294901760, %v2744_v6 }
  0x1a   :  { %v349_v20 = vand.u32 4294901760, %v348_v7  ;;  %1963 = vmatpush3.msra.mxu1 %v230_v27  ;;  %v4007_v7 = vand.u32 4294901760, %v2704_v21  ;;  %v243_v27 = vsub.f32 %v2720_v35, %v4008_v0  ;;  %4009 = vst [vmem:[#allocation46_spill] sm:$0xff] %v2772_v61  ;;  %1939 = vmatprep.subr.mxu0 %v2690_v14  ;;  %v2820_v0 = vld [vmem:[%s3797_s1] sm:$0xff] }
  0x1b   :  { %4005 = vst [vmem:[#allocation44_spill] sm:$0xff] %v2747_v45  ;;  %v237_v22 = vand.u32 4294901760, %v236_v49  ;;  %v2786_v49 = vsub.f32 %v2600_v62, %v2639_v40  ;;  %1940 = vmatpush3.msra.mxu0 %v2716_v63  ;;  %v2803_v62 = vsub.f32 %v2616_v48, %v2651_v39  ;;  %v4015_v40 = vand.u32 4294901760, %v2760_v47  ;;  %4016 = vst [vmem:[#allocation51_spill] sm:$0xff] %v2820_v0 }
  0x1c   :  { %v355_v12 = vsub.f32 %v2704_v21, %v4007_v7  ;;  %1964 = vmatprep.subr.mxu1 %v349_v20  ;;  %v2775_v7 = vand.u32 4294901760, %v2738_v38  ;;  %1941 = vmatprep.subr.mxu0 %v2733_v2  ;;  %v2828_v39 = vand.u32 4294901760, %v2794_v56 }
  0x1d   :  { %1965 = vmatpush3.msra.mxu1 %v237_v22  ;;  %4011 = vst [vmem:[#allocation48_spill] sm:$0xff] %v2786_v49  ;;  %v244_v22 = vand.u32 4294901760, %v243_v27  ;;  %4014 = vst [vmem:[#allocation50_spill] sm:$0xff] %v2803_v62  ;;  %v250_v51 = vsub.f32 %v2760_v47, %v4015_v40  ;;  %v2811_v27 = vand.u32 4294901760, %v2780_v52  ;;  %1942 = vmatpush3.msra.mxu0 %v2747_v45  ;;  %v4017_v40 = vand.u32 4294901760, %v2772_v61 }
  0x1e   :  { %v356_v20 = vand.u32 4294901760, %v355_v12  ;;  %v362_v12 = vsub.f32 %v2744_v6, %v4013_v44  ;;  %v2815_v44 = vsub.f32 %v2630_v50, %v2668_v34  ;;  %v3860_v48 = vand.u32 4294901760, %v2803_v62  ;;  %4018 = vst [vmem:[#allocation52_spill] sm:$0xff] %v2828_v39  ;;  %1943 = vmatprep.subr.mxu0 %v2763_v1 }
  0x1f   :  { %v369_v42 = vsub.f32 %v2772_v61, %v4017_v40  ;;  %v251_v50 = vand.u32 4294901760, %v250_v51  ;;  %v4019_v34 = vand.u32 4294901760, %v2786_v49  ;;  %1944 = vmatpush3.msra.mxu0 %v2775_v7  ;;  %v2844_v61 = vand.u32 4294901760, %v2820_v0 }
  0x20   :  { %1966 = vmatprep.subr.mxu1 %v356_v20  ;;  %v363_v20 = vand.u32 4294901760, %v362_v12  ;;  %v2837_v12 = vsub.f32 %v2656_v30, %v2690_v14  ;;  %v376_v51 = vsub.f32 %v2803_v62, %v3860_v48  ;;  %1945 = vmatprep.subr.mxu0 %v2789_v57  ;;  %v4022_v14 = vlaneseq }
  0x21   :  { %1967 = vmatpush3.msra.mxu1 %v244_v22  ;;  %v257_v37 = vsub.f32 %v2786_v49, %v4019_v34  ;;  %v370_v40 = vand.u32 4294901760, %v369_v42  ;;  %4020 = vst [vmem:[#allocation53_spill] sm:$0xff] %v2844_v61  ;;  %v2848_v34 = vsub.f32 %v2682_v53, %v2716_v63  ;;  %1946 = vmatpush3.msra.mxu0 %v2811_v27 }
  0x22   :  { %1968 = vmatprep.subr.mxu1 %v363_v20  ;;  %v4021_v20 = vand.u32 4294901760, %v2815_v44  ;;  %v3868_v30 = vand.u32 4294901760, %v2837_v12  ;;  %v62_v49 = vshrl.u32 %v4022_v14, 7  ;;  %v377_v48 = vand.u32 4294901760, %v376_v51  ;;  %1947 = vmatprep.subr.mxu0 %v2828_v39 }
  0x23   :  { %1969 = vmatpush3.msra.mxu1 %v251_v50  ;;  %v258_v22 = vand.u32 4294901760, %v257_v37  ;;  %v60_v37 = vld [vmem:[%s3798_s0] sm:$0x3]  ;;  %v2863_v50 = vsub.f32 %v2695_v28, %v2733_v2  ;;  %1948 = vmatpush3.msra.mxu0 %v2844_v61  ;;  %v4023_v28 = vand.u32 4294901760, %v2848_v34 }
  0x24   :  { %v264_v42 = vsub.f32 %v2815_v44, %v4021_v20  ;;  %1970 = vmatprep.subr.mxu1 %v370_v40  ;;  %v2867_v20 = vsub.f32 %v2709_v13, %v2747_v45  ;;  %v383_v40 = vsub.f32 %v2837_v12, %v3868_v30  ;;  %v65_v51 = vsub.s32 0, %v62_v49  ;;  %1987 = vmatprep.subr.mxu0 %v2460_v19 }
  0x25   :  { %1971 = vmatpush3.msra.mxu1 %v258_v22  ;;  %v69_v62 = vsub.s32 1, %v62_v49  ;;  %v271_v53 = vsub.f32 %v2848_v34, %v4023_v28  ;;  %v3875_v13 = vand.u32 4294901760, %v2863_v50 }
  0x26   :  { %v265_v14 = vand.u32 4294901760, %v264_v42  ;;  %1972 = vmatprep.subr.mxu1 %v377_v48  ;;  %v3874_v22 = vand.u32 4294901760, %v2867_v20  ;;  %v2881_v42 = vsub.f32 %v2725_v29, %v2763_v1  ;;  %v384_v45 = vand.u32 4294901760, %v383_v40 }
  0x27   :  { %v66_v30 = vrot.slane %v60_v37, %v65_v51  ;;  %v70_v2 = vrot.slane %v60_v37, %v69_v62  ;;  %v2886_v48 = vsub.f32 %v2738_v38, %v2775_v7  ;;  %v272_v63 = vand.u32 4294901760, %v271_v53 }
  0x28   :  { %1973 = vmatpush3.msra.mxu1 %v265_v14  ;;  %v390_v28 = vsub.f32 %v2863_v50, %v3875_v13  ;;  %v278_v29 = vsub.f32 %v2867_v20, %v3874_v22  ;;  %v3878_v14 = vand.u32 4294901760, %v2881_v42  ;;  %v4024_v62 = vmov 0 }
  0x29   :  { %1974 = vmatprep.subr.mxu1 %v384_v45  ;;  %vm2895_vm0 = vcmp.eq.s32.totalorder %v66_v30, %v62_v49  ;;  %vm2899_vm1 = vcmp.eq.s32.totalorder %v70_v2, %v62_v49  ;;  %v4027_v37 = vmov 0  ;;  %v2906_v40 = vsub.f32 %v2752_v8, %v2789_v57 }
  0x2a   :  { %v4025_v62 = vsel %vm2895_vm0, 4294967295, %v4024_v62  ;;  %v4028_v37 = vsel %vm2899_vm1, 4294967295, %v4027_v37  ;;  %1975 = vmatpush3.msra.mxu1 %v272_v63  ;;  %v2347_v51 = vmov 0.0   ;;  %v391_v45 = vand.u32 4294901760, %v390_v28 }
  0x2b   :  { %4026 = vst [vmem:[#allocation54_spill] sm:$0xff] %v4025_v62  ;;  %4029 = vst [vmem:[#allocation55_spill] sm:$0xff] %v4028_v37  ;;  %v1901_v22 = vsel %vm2895_vm0, 1.0, %v2347_v51  ;;  %v1902_v30 = vsel %vm2899_vm1, 1.0, %v2347_v51  ;;  %v279_v13 = vand.u32 4294901760, %v278_v29  ;;  %v3879_v2 = vmov 1.0  }
  0x2c   :  { %1903 = vmatprep.mubr.msk.f32.mxu1 %vm2899_vm1, %v3879_v2  ;;  %v2915_v49 = vsub.f32 %v1902_v30, %v1902_v30  ;;  %v2917_v53 = vsub.f32 %v1901_v22, %v1901_v22  ;;  %v397_v63 = vsub.f32 %v2881_v42, %v3878_v14  ;;  %v4032_v8 = vand.u32 4294901760, %v2886_v48  ;;  %1976 = vmatprep.subr.mxu1 %v391_v45  ;;  %v4051_v62 = vld [vmem:[#allocation40_spill] sm:$0xff] }
  0x2d   :  { %v3888_v29 = vand.u32 4294901760, %v2906_v40  ;;  %v2928_v28 = vsub.f32 %v2780_v52, %v2811_v27  ;;  %v2932_v51 = vsub.f32 %v2794_v56, %v2828_v39  ;;  %v2936_v22 = vsub.f32 %v2820_v0, %v2844_v61  ;;  %1977 = vmatpush3.msra.mxu1 %v279_v13 }
  0x2e   :  { %4030 = vst [vmem:[#allocation56_spill] sm:$0xff] %v2915_v49  ;;  %4031 = vst [vmem:[#allocation57_spill] sm:$0xff] %v2917_v53  ;;  %v285_v38 = vsub.f32 %v2886_v48, %v4032_v8  ;;  %v2939_v30 = vand.u32 4294901760, %v2915_v49  ;;  %v2942_v8 = vand.u32 4294901760, %v2917_v53  ;;  %v398_v45 = vand.u32 4294901760, %v397_v63 }
  0x2f   :  { %v404_v2 = vsub.f32 %v2906_v40, %v3888_v29  ;;  %v3895_v56 = vand.u32 4294901760, %v2928_v28  ;;  %v3894_v52 = vand.u32 4294901760, %v2932_v51  ;;  %v3893_v0 = vand.u32 4294901760, %v2936_v22 }
  0x30   :  { %4033 = vst [vmem:[#allocation58_spill] sm:$0xff] %v2939_v30  ;;  %4034 = vst [vmem:[#allocation59_spill] sm:$0xff] %v2942_v8  ;;  %v286_v14 = vand.u32 4294901760, %v285_v38  ;;  %v177_v37 = vsub.f32 %v2915_v49, %v2939_v30  ;;  %v183_v61 = vsub.f32 %v2917_v53, %v2942_v8  ;;  %1978 = vmatprep.subr.mxu1 %v398_v45 }
  0x31   :  { %v405_v13 = vand.u32 4294901760, %v404_v2  ;;  %v292_v38 = vsub.f32 %v2928_v28, %v3895_v56  ;;  %v411_v63 = vsub.f32 %v2932_v51, %v3894_v52  ;;  %v299_v29 = vsub.f32 %v2936_v22, %v3893_v0  ;;  %v4046_v0 = vld [vmem:[#allocation30_spill] sm:$0xff]  ;;  %v4047_v52 = vld [vmem:[#allocation32_spill] sm:$0xff]  ;;  %v4048_v56 = vld [vmem:[#allocation33_spill] sm:$0xff] }
  0x32   :  { %1979 = vmatpush3.msra.mxu1 %v286_v14  ;;  %v2963_v39 = vand.u32 4294901760, %v177_v37  ;;  %v2965_v30 = vand.u32 4294901760, %v183_v61  ;;  %v4037_v37 = vmov 1.0   ;;  %v4038_v61 = vld [vmem:[#allocation19_spill] sm:$0xff] }
  0x33   :  { %1980 = vmatprep.subr.mxu1 %v405_v13  ;;  %v293_v45 = vand.u32 4294901760, %v292_v38  ;;  %v412_v14 = vand.u32 4294901760, %v411_v63  ;;  %v300_v2 = vand.u32 4294901760, %v299_v29  ;;  %v4039_v29 = vld [vmem:[#allocation46_spill] sm:$0xff]  ;;  %v4040_v13 = vld [vmem:[#allocation21_spill] sm:$0xff]  ;;  %v4041_v38 = vld [vmem:[#allocation48_spill] sm:$0xff] }
  0x34   :  { %4035 = vst [vmem:[#allocation60_spill] sm:$0xff] %v2963_v39  ;;  %4036 = vst [vmem:[#allocation61_spill] sm:$0xff] %v2965_v30  ;;  %179 = vmatprep.mubr.f32.mxu0 %v2963_v39  ;;  %v4042_v63 = vld [vmem:[#allocation23_spill] sm:$0xff]  ;;  %v4050_v39 = vld [vmem:[#allocation37_spill] sm:$0xff] }
  0x35   :  { %185 = vmatmul.mubr.f32.vlgmr.msra.gmra.mxu0 %v2965_v30  ;;  %1981 = vmatpush3.msra.mxu1 %v293_v45  ;;  %v4043_v45 = vld [vmem:[#allocation50_spill] sm:$0xff]  ;;  %v4049_v30 = vld [vmem:[#allocation35_spill] sm:$0xff] }
  0x36   :  { %1988 = vmatpush3.msra.mxu0 %v2483_v24  ;;  %1982 = vmatprep.subr.mxu1 %v412_v14  ;;  %v4044_v14 = vld [vmem:[#allocation26_spill] sm:$0xff] }
  0x37   :  { %1989 = vmatprep.subr.mxu0 %v2490_v26  ;;  %1983 = vmatpush3.msra.mxu1 %v300_v2  ;;  %v4045_v2 = vld [vmem:[#allocation28_spill] sm:$0xff] }
  0x38   :  { %1990 = vmatpush3.msra.mxu0 %v2514_v32  ;;  %1904 = vmatmul.mubr.msk.f32.vlgmr.msra.gmra.mxu1 %vm2895_vm0, %v4037_v37  ;;  %v4052_v37 = vld [vmem:[#allocation42_spill] sm:$0xff] }
  0x39   :  { %1991 = vmatprep.subr.mxu0 %v2524_v36  ;;  %2022 = vmatprep.subr.mxu1 %v2401_v3 }
  0x3a   :  { %1992 = vmatpush3.msra.mxu0 %v2541_v41  ;;  %2023 = vmatpush3.msra.mxu1 %v2404_v4 }
  0x3b   :  { %1993 = vmatprep.subr.mxu0 %v2556_v46  ;;  %2024 = vmatprep.subr.mxu1 %v2407_v5 }
  0x3c   :  { %1994 = vmatpush3.msra.mxu0 %v2592_v60  ;;  %2025 = vmatpush3.msra.mxu1 %v2425_v9 }
  0x3d   :  { %1995 = vmatprep.subr.mxu0 %v2608_v43  ;;  %2026 = vmatprep.subr.mxu1 %v2428_v10 }
  0x3e   :  { %1996 = vmatpush3.msra.mxu0 %v2622_v55  ;;  %2027 = vmatpush3.msra.mxu1 %v2431_v11 }
  0x3f   :  { %1997 = vmatprep.subr.mxu0 %v2636_v59  ;;  %2028 = vmatprep.subr.mxu1 %v2450_v16 }
  0x40   :  { %1998 = vmatpush3.msra.mxu0 %v2648_v58  ;;  %2029 = vmatpush3.msra.mxu1 %v2453_v17 }
  0x41   :  { %1999 = vmatprep.subr.mxu0 %v2665_v15  ;;  %2030 = vmatprep.subr.mxu1 %v2456_v18 }
  0x42   :  { %2000 = vmatpush3.msra.mxu0 %v2677_v54  ;;  %2031 = vmatpush3.msra.mxu1 %v2479_v23 }
  0x43   :  { %2001 = vmatprep.subr.mxu0 %v2704_v21  ;;  %2032 = vmatprep.subr.mxu1 %v2486_v25 }
  0x44   :  { %2002 = vmatpush3.msra.mxu0 %v2720_v35  ;;  %2033 = vmatpush3.msra.mxu1 %v2510_v31 }
  0x45   :  { %2003 = vmatprep.subr.mxu0 %v2744_v6  ;;  %2034 = vmatprep.subr.mxu1 %v2517_v33 }
  0x46   :  { %2004 = vmatpush3.msra.mxu0 %v2760_v47  ;;  %2035 = vmatpush3.msra.mxu1 %v4038_v61 }
  0x47   :  { %2005 = vmatprep.subr.mxu0 %v4039_v29  ;;  %2036 = vmatprep.subr.mxu1 %v4040_v13 }
  0x48   :  { %2006 = vmatpush3.msra.mxu0 %v4041_v38  ;;  %2037 = vmatpush3.msra.mxu1 %v4042_v63 }
  0x49   :  { %2007 = vmatprep.subr.mxu0 %v4043_v45  ;;  %2038 = vmatprep.subr.mxu1 %v4044_v14 }
  0x4a   :  { %2008 = vmatpush3.msra.mxu0 %v2815_v44  ;;  %2039 = vmatpush3.msra.mxu1 %v4045_v2 }
  0x4b   :  { %2009 = vmatprep.subr.mxu0 %v2837_v12  ;;  %2040 = vmatprep.subr.mxu1 %v4046_v0 }
  0x4c   :  { %2010 = vmatpush3.msra.mxu0 %v2848_v34  ;;  %2041 = vmatpush3.msra.mxu1 %v4047_v52 }
  0x4d   :  { %2011 = vmatprep.subr.mxu0 %v2863_v50  ;;  %2042 = vmatprep.subr.mxu1 %v4048_v56  ;;  %v4053_v56 = vld [vmem:[#allocation44_spill] sm:$0xff] }
  0x4e   :  { %2012 = vmatpush3.msra.mxu0 %v2867_v20  ;;  %2043 = vmatpush3.msra.mxu1 %v4049_v30 }
  0x4f   :  { %2013 = vmatprep.subr.mxu0 %v2881_v42  ;;  %2044 = vmatprep.subr.mxu1 %v4050_v39  ;;  %v4055_v39 = vand.u32 4294901760, %v2483_v24  ;;  %v4060_v24 = vand.u32 4294901760, %v2541_v41  ;;  %v4067_v41 = vld [vmem:[#allocation5_spill] sm:$0xff] }
  0x50   :  { %2014 = vmatpush3.msra.mxu0 %v2886_v48  ;;  %552 = vmatprep.mubr.f32.mxu0 %v2915_v49  ;;  %v4054_v49 = vand.u32 4294901760, %v2460_v19  ;;  %v4059_v19 = vld [vmem:[#allocation52_spill] sm:$0xff] }
  0x51   :  { %2015 = vmatprep.subr.mxu0 %v2906_v40  ;;  %2045 = vmatpush3.msra.mxu1 %v4051_v62 }
  0x52   :  { %2016 = vmatpush3.msra.mxu0 %v2928_v28  ;;  %2046 = vmatprep.subr.mxu1 %v4052_v37  ;;  %v4056_v37 = vand.u32 4294901760, %v2490_v26  ;;  %v4062_v26 = vand.u32 4294901760, %v2556_v46  ;;  %v4068_v46 = vand.u32 4294901760, %v2622_v55 }
  0x53   :  { %2017 = vmatprep.subr.mxu0 %v2932_v51  ;;  %2047 = vmatpush3.msra.mxu1 %v4053_v56  ;;  %v4057_v56 = vand.u32 4294901760, %v2514_v32  ;;  %v4064_v32 = vand.u32 4294901760, %v2592_v60  ;;  %v4069_v60 = vand.u32 4294901760, %v2636_v59 }
  0x54   :  { %2018 = vmatpush3.msra.mxu0 %v2936_v22  ;;  %2048 = vmatprep.subr.mxu1 %v2763_v1 }
  0x55   :  { %555 = vmatmul.mubr.f32.vlgmr.msra.gmra.mxu0 %v2917_v53  ;;  %2057 = vmatprep.subr.mxu0 %v4054_v49  ;;  %v4058_v53 = vand.u32 4294901760, %v2524_v36  ;;  %v4063_v49 = vld [vmem:[#allocation58_spill] sm:$0xff] }
  0x56   :  { %2058 = vmatpush3.msra.mxu0 %v4055_v39  ;;  %2049 = vmatpush3.msra.mxu1 %v2775_v7  ;;  %v4061_v39 = vld [vmem:[#allocation53_spill] sm:$0xff] }
  0x57   :  { %2059 = vmatprep.subr.mxu0 %v4056_v37  ;;  %2050 = vmatprep.subr.mxu1 %v2789_v57  ;;  %v958_v37 = vmul.f32 %v4067_v41, %v4067_v41  ;;  %v4079_v41 = vand.u32 4294901760, %v2720_v35  ;;  %v4082_v35 = vld [vmem:[#allocation10_spill] sm:$0xff] }
  0x58   :  { %2060 = vmatpush3.msra.mxu0 %v4057_v56  ;;  %2051 = vmatpush3.msra.mxu1 %v2811_v27  ;;  %v4065_v56 = vld [vmem:[#allocation4_spill] sm:$0xff] }
  0x59   :  { %2061 = vmatprep.subr.mxu0 %v4058_v53  ;;  %2052 = vmatprep.subr.mxu1 %v4059_v19  ;;  %v974_v36 = vmul.f32 %v4065_v56, %v4065_v56  ;;  %v4066_v53 = vand.u32 4294901760, %v2608_v43  ;;  %v4071_v43 = vand.u32 4294901760, %v2648_v58  ;;  %v3080_v59 = vand.u32 4294901760, %v958_v37  ;;  %v4075_v58 = vld [vmem:[#allocation9_spill] sm:$0xff] }
  0x5a   :  { %2062 = vmatpush3.msra.mxu0 %v4060_v24  ;;  %2053 = vmatpush3.msra.mxu1 %v4061_v39  ;;  %v4070_v24 = vld [vmem:[#allocation7_spill] sm:$0xff]  ;;  %v4076_v56 = vand.u32 4294901760, %v2704_v21 }
  0x5b   :  { %2063 = vmatprep.subr.mxu0 %v4062_v26  ;;  %659 = vmatprep.mubr.f32.mxu1 %v4063_v49  ;;  %v957_v26 = vmul.f32 %v4070_v24, %v4070_v24  ;;  %v971_v24 = vmul.f32 %v4082_v35, %v4082_v35 }
  0x5c   :  { %2064 = vmatpush3.msra.mxu0 %v4064_v32  ;;  %663 = vmatmul.mubr.f32.vlgmr.msra.gmra.mxu1 %v2942_v8  ;;  %v4072_v32 = vld [vmem:[#allocation6_spill] sm:$0xff]  ;;  %v4136_v8 = vld [vmem:[#allocation36_spill] sm:$0xff] }
  0x5d   :  { %2065 = vmatprep.subr.mxu0 %v4066_v53  ;;  %2092 = vmatprep.subr.mxu1 %v2401_v3  ;;  %v3073_v3 = vand.u32 4294901760, %v974_v36  ;;  %v973_v55 = vmul.f32 %v4072_v32, %v4072_v32  ;;  %v3090_v53 = vand.u32 4294901760, %v957_v26 }
  0x5e   :  { %2066 = vmatpush3.msra.mxu0 %v4068_v46  ;;  %2093 = vmatpush3.msra.mxu1 %v2404_v4  ;;  %v4073_v4 = vand.u32 4294901760, %v2665_v15  ;;  %v4078_v15 = vld [vmem:[#allocation8_spill] sm:$0xff] }
  0x5f   :  { %2067 = vmatprep.subr.mxu0 %v4069_v60  ;;  %2094 = vmatprep.subr.mxu1 %v2407_v5  ;;  %v4074_v5 = vand.u32 4294901760, %v2677_v54  ;;  %4077 = vst [vmem:[#allocation19_spill] sm:$0xff] %v3090_v53  ;;  %v3097_v54 = vand.u32 4294901760, %v973_v55  ;;  %v3102_v21 = vsub.f32 %v974_v36, %v3073_v3  ;;  %v3108_v60 = vsub.f32 %v958_v37, %v3080_v59  ;;  %v4087_v37 = vld [vmem:[#allocation13_spill] sm:$0xff] }
  0x60   :  { %2068 = vmatpush3.msra.mxu0 %v4071_v43  ;;  %2095 = vmatpush3.msra.mxu1 %v2425_v9  ;;  %v956_v9 = vmul.f32 %v4075_v58, %v4075_v58  ;;  %v4085_v36 = vand.u32 4294901760, %v4039_v29  ;;  %v954_v32 = vmul.f32 %v4087_v37, %v4087_v37  ;;  %v4093_v58 = vld [vmem:[#allocation12_spill] sm:$0xff] }
  0x61   :  { %2069 = vmatprep.subr.mxu0 %v4073_v4  ;;  %2096 = vmatprep.subr.mxu1 %v2428_v10  ;;  %v972_v10 = vmul.f32 %v4078_v15, %v4078_v15  ;;  %v3908_v29 = vand.u32 4294901760, %v3102_v21  ;;  %v3134_v4 = vsub.f32 %v973_v55, %v3097_v54  ;;  %v970_v55 = vmul.f32 %v4093_v58, %v4093_v58 }
  0x62   :  { %2070 = vmatpush3.msra.mxu0 %v4074_v5  ;;  %2097 = vmatpush3.msra.mxu1 %v2431_v11  ;;  %v4080_v11 = vld [vmem:[#allocation11_spill] sm:$0xff]  ;;  %v3115_v43 = vand.u32 4294901760, %v956_v9  ;;  %v3906_v5 = vand.u32 4294901760, %v3108_v60  ;;  %v4106_v58 = vand.u32 4294901760, %v2886_v48  ;;  %v4131_v48 = vld [vmem:[#allocation25_spill] sm:$0xff] }
  0x63   :  { %2071 = vmatprep.subr.mxu0 %v4076_v56  ;;  %2098 = vmatprep.subr.mxu1 %v2450_v16  ;;  %v955_v46 = vmul.f32 %v4080_v11, %v4080_v11  ;;  %v4081_v16 = vand.u32 4294901760, %v2744_v6  ;;  %v3121_v6 = vsub.f32 %v957_v26, %v3090_v53  ;;  %v3139_v26 = vand.u32 4294901760, %v971_v24  ;;  %v4096_v56 = vld [vmem:[#allocation14_spill] sm:$0xff]  ;;  %v4098_v11 = vld [vmem:[#allocation15_spill] sm:$0xff] }
  0x64   :  { %2072 = vmatpush3.msra.mxu0 %v4079_v41  ;;  %2099 = vmatpush3.msra.mxu1 %v2453_v17  ;;  %v4083_v17 = vand.u32 4294901760, %v2760_v47  ;;  %4084 = vst [vmem:[#allocation46_spill] sm:$0xff] %v3115_v43  ;;  %v4088_v47 = vand.u32 4294901760, %v4041_v38  ;;  %v4092_v38 = vand.u32 4294901760, %v2815_v44  ;;  %v969_v15 = vmul.f32 %v4096_v56, %v4096_v56 }
  0x65   :  { %2073 = vmatprep.subr.mxu0 %v4081_v16  ;;  %2100 = vmatprep.subr.mxu1 %v2456_v18  ;;  %v3123_v18 = vand.u32 4294901760, %v972_v10  ;;  %4091 = vst [vmem:[#allocation23_spill] sm:$0xff] %v3139_v26  ;;  %v3903_v44 = vand.u32 4294901760, %v3121_v6  ;;  %v3905_v41 = vand.u32 4294901760, %v3134_v4  ;;  %v953_v16 = vmul.f32 %v4098_v11, %v4098_v11 }
  0x66   :  { %2074 = vmatpush3.msra.mxu0 %v4083_v17  ;;  %2101 = vmatpush3.msra.mxu1 %v2479_v23  ;;  %v3130_v23 = vand.u32 4294901760, %v955_v46  ;;  %v3186_v35 = vsub.f32 %v971_v24, %v3139_v26  ;;  %v4101_v17 = vand.u32 4294901760, %v2867_v20  ;;  %v4109_v56 = vand.u32 4294901760, %v2906_v40 }
  0x67   :  { %2075 = vmatprep.subr.mxu0 %v4085_v36  ;;  %2102 = vmatprep.subr.mxu1 %v2486_v25  ;;  %4086 = vst [vmem:[#allocation21_spill] sm:$0xff] %v3123_v18  ;;  %v4090_v25 = vand.u32 4294901760, %v4043_v45  ;;  %v4094_v45 = vand.u32 4294901760, %v2837_v12  ;;  %v4103_v36 = vld [vmem:[#allocation16_spill] sm:$0xff]  ;;  %v3205_v20 = vsub.f32 %v3121_v6, %v3903_v44  ;;  %v4122_v44 = vld [vmem:[#allocation22_spill] sm:$0xff] }
  0x68   :  { %2076 = vmatpush3.msra.mxu0 %v4088_v47  ;;  %2103 = vmatpush3.msra.mxu1 %v2510_v31  ;;  %4089 = vst [vmem:[#allocation48_spill] sm:$0xff] %v3130_v23  ;;  %v3146_v31 = vsub.f32 %v956_v9, %v3115_v43  ;;  %v4097_v9 = vand.u32 4294901760, %v2848_v34  ;;  %v3165_v12 = vsub.f32 %v955_v46, %v3130_v23  ;;  %v4104_v47 = vand.u32 4294901760, %v2881_v42 }
  0x69   :  { %2077 = vmatprep.subr.mxu0 %v4090_v25  ;;  %2104 = vmatprep.subr.mxu1 %v2517_v33  ;;  %v3153_v33 = vand.u32 4294901760, %v954_v32  ;;  %v3181_v34 = vsub.f32 %v3108_v60, %v3906_v5  ;;  %v4105_v25 = vld [vmem:[#allocation20_spill] sm:$0xff]  ;;  %v3214_v42 = vand.u32 4294901760, %v969_v15  ;;  %v4132_v5 = vld [vmem:[#allocation31_spill] sm:$0xff] }
  0x6a   :  { %2078 = vmatpush3.msra.mxu0 %v4092_v38  ;;  %2105 = vmatpush3.msra.mxu1 %v4038_v61  ;;  %v3159_v61 = vsub.f32 %v972_v10, %v3123_v18  ;;  %v4099_v10 = vand.u32 4294901760, %v2863_v50  ;;  %v3191_v50 = vand.u32 4294901760, %v970_v55  ;;  %v3902_v37 = vand.u32 4294901760, %v3146_v31 }
  0x6b   :  { %2079 = vmatprep.subr.mxu0 %v4094_v45  ;;  %2106 = vmatprep.subr.mxu1 %v4040_v13  ;;  %4095 = vst [vmem:[#allocation50_spill] sm:$0xff] %v3153_v33  ;;  %v3170_v13 = vsub.f32 %v3102_v21, %v3908_v29  ;;  %v3200_v24 = vsub.f32 %v954_v32, %v3153_v33  ;;  %4107 = vst [vmem:[#allocation28_spill] sm:$0xff] %v3214_v42  ;;  %v3221_v45 = vand.u32 4294901760, %v953_v16  ;;  %v4128_v29 = vld [vmem:[#allocation44_spill] sm:$0xff] }
  0x6c   :  { %2080 = vmatpush3.msra.mxu0 %v4097_v9  ;;  %2107 = vmatpush3.msra.mxu1 %v4042_v63  ;;  %v4100_v63 = vld [vmem:[#allocation17_spill] sm:$0xff]  ;;  %4102 = vst [vmem:[#allocation26_spill] sm:$0xff] %v3191_v50  ;;  %v951_v38 = vmul.f32 %v4105_v25, %v4105_v25  ;;  %v3219_v32 = vsub.f32 %v3134_v4, %v3905_v41 }
  0x6d   :  { %2081 = vmatprep.subr.mxu0 %v4099_v10  ;;  %2108 = vmatprep.subr.mxu1 %v4044_v14  ;;  %v952_v46 = vmul.f32 %v4100_v63, %v4100_v63  ;;  %v968_v14 = vmul.f32 %v4103_v36, %v4103_v36  ;;  %4108 = vst [vmem:[#allocation30_spill] sm:$0xff] %v3221_v45  ;;  %v4110_v9 = vld [vmem:[#allocation33_spill] sm:$0xff]  ;;  %v3909_v10 = vand.u32 4294901760, %v3165_v12  ;;  %v4112_v63 = vand.u32 4294901760, %v2928_v28  ;;  %v4114_v36 = vld [vmem:[#allocation18_spill] sm:$0xff] }
  0x6e   :  { %2082 = vmatpush3.msra.mxu0 %v4101_v17  ;;  %2109 = vmatpush3.msra.mxu1 %v4045_v2  ;;  %v3904_v2 = vand.u32 4294901760, %v3159_v61  ;;  %v3239_v40 = vsub.f32 %v3146_v31, %v3902_v37  ;;  %v3244_v25 = vsub.f32 %v970_v55, %v3191_v50  ;;  %v4116_v28 = vld [vmem:[#allocation37_spill] sm:$0xff]  ;;  %v4119_v55 = vand.u32 4294901760, %v2936_v22 }
  0x6f   :  { %2083 = vmatprep.subr.mxu0 %v4104_v47  ;;  %2110 = vmatprep.subr.mxu1 %v4046_v0  ;;  %v3227_v11 = vand.u32 4294901760, %v952_v46  ;;  %v3234_v17 = vand.u32 4294901760, %v968_v14  ;;  %v967_v47 = vmul.f32 %v4114_v36, %v4114_v36  ;;  %v4120_v37 = vmov 1.0  }
  0x70   :  { %2084 = vmatpush3.msra.mxu0 %v4106_v58  ;;  %2111 = vmatpush3.msra.mxu1 %v4047_v52  ;;  %v3907_v52 = vand.u32 4294901760, %v3186_v35  ;;  %v4115_v58 = vand.u32 4294901760, %v2932_v51  ;;  %v3271_v41 = vsub.f32 %v969_v15, %v3214_v42  ;;  %v3910_v15 = vand.u32 4294901760, %v3200_v24 }
  0x71   :  { %2085 = vmatprep.subr.mxu0 %v4109_v56  ;;  %2112 = vmatprep.subr.mxu1 %v4110_v9  ;;  %4111 = vst [vmem:[#allocation32_spill] sm:$0xff] %v3227_v11  ;;  %4113 = vst [vmem:[#allocation35_spill] sm:$0xff] %v3234_v17  ;;  %v3253_v56 = vsub.f32 %v3159_v61, %v3904_v2  ;;  %v3255_v9 = vand.u32 4294901760, %v951_v38  ;;  %v966_v2 = vmul.f32 %v4122_v44, %v4122_v44 }
  0x72   :  { %2086 = vmatpush3.msra.mxu0 %v4112_v63  ;;  %2113 = vmatpush3.msra.mxu1 %v4049_v30  ;;  %v4118_v63 = vld [vmem:[#allocation24_spill] sm:$0xff]  ;;  %v3288_v44 = vsub.f32 %v3165_v12, %v3909_v10 }
  0x73   :  { %2087 = vmatprep.subr.mxu0 %v4115_v58  ;;  %2114 = vmatprep.subr.mxu1 %v4116_v28  ;;  %4117 = vst [vmem:[#allocation40_spill] sm:$0xff] %v3255_v9  ;;  %v950_v36 = vmul.f32 %v4118_v63, %v4118_v63  ;;  %v3266_v28 = vsub.f32 %v953_v16, %v3221_v45  ;;  %v4130_v58 = vld [vmem:[#allocation27_spill] sm:$0xff] }
  0x74   :  { %2088 = vmatpush3.msra.mxu0 %v4119_v55  ;;  %1905 = vmatprep.mubr.msk.f32.mxu0 %vm2899_vm1, %v4120_v37  ;;  %v3278_v63 = vsub.f32 %v952_v46, %v3227_v11  ;;  %v3283_v16 = vsub.f32 %v3186_v35, %v3907_v52  ;;  %v3294_v46 = vand.u32 4294901760, %v967_v47  ;;  %v3298_v52 = vsub.f32 %v968_v14, %v3234_v17 }
  0x75   :  { %2115 = vmatpush3.msra.mxu1 %v4051_v62  ;;  %1906 = vmatmul.mubr.msk.f32.vlgmr.msra.gmra.mxu0 %vm2895_vm0, %v4120_v37  ;;  %v4125_v62 = vld [vmem:[#allocation42_spill] sm:$0xff]  ;;  %v3304_v30 = vsub.f32 %v951_v38, %v3255_v9  ;;  %v949_v55 = vmul.f32 %v4130_v58, %v4130_v58  ;;  %v3312_v14 = vand.u32 4294901760, %v966_v2  ;;  %v947_v38 = vmul.f32 %v4136_v8, %v4136_v8 }
  0x76   :  { %4124 = vst [vmem:[#allocation52_spill] sm:$0xff] %v3278_v63  ;;  %2116 = vmatprep.subr.mxu1 %v4125_v62  ;;  %2127 = vmatprep.subr.mxu0 %v3073_v3  ;;  %4126 = vst [vmem:[#allocation53_spill] sm:$0xff] %v3294_v46  ;;  %v3306_v62 = vand.u32 4294901760, %v950_v36  ;;  %v3339_v0 = vsub.f32 %v967_v47, %v3294_v46 }
  0x77   :  { %4127 = vst [vmem:[#allocation4_spill] sm:$0xff] %v3298_v52  ;;  %2117 = vmatpush3.msra.mxu1 %v4128_v29  ;;  %2128 = vmatpush3.msra.mxu0 %v3080_v59  ;;  %v965_v29 = vmul.f32 %v4131_v48, %v4131_v48  ;;  %v948_v48 = vmul.f32 %v4132_v5, %v4132_v5  ;;  %v3346_v5 = vand.u32 4294901760, %v949_v55 }
  0x78   :  { %4129 = vst [vmem:[#allocation5_spill] sm:$0xff] %v3306_v62  ;;  %2118 = vmatprep.subr.mxu1 %v2763_v1  ;;  %2129 = vmatprep.subr.mxu0 %v3097_v54  ;;  %v3325_v1 = vsub.f32 %v3200_v24, %v3910_v15  ;;  %v4135_v15 = vld [vmem:[#allocation29_spill] sm:$0xff] }
  0x79   :  { %2119 = vmatpush3.msra.mxu1 %v2775_v7  ;;  %2130 = vmatpush3.msra.mxu0 %v3090_v53  ;;  %v4133_v7 = vand.u32 4294901760, %v3244_v25  ;;  %4134 = vst [vmem:[#allocation7_spill] sm:$0xff] %v3346_v5  ;;  %v3354_v47 = vand.u32 4294901760, %v965_v29  ;;  %v3403_v53 = vand.u32 4294901760, %v947_v38 }
  0x7a   :  { %2120 = vmatprep.subr.mxu1 %v2789_v57  ;;  %2131 = vmatprep.subr.mxu0 %v3123_v18  ;;  %v3344_v57 = vsub.f32 %v950_v36, %v3306_v62  ;;  %v4138_v36 = vand.u32 4294901760, %v3266_v28  ;;  %v3399_v18 = vsub.f32 %v949_v55, %v3346_v5 }
  0x7b   :  { %v3334_v10 = vsub.f32 %v3244_v25, %v4133_v7  ;;  %2121 = vmatpush3.msra.mxu1 %v2811_v27  ;;  %2132 = vmatpush3.msra.mxu0 %v3115_v43  ;;  %v964_v7 = vmul.f32 %v4135_v15, %v4135_v15  ;;  %v4137_v27 = vand.u32 4294901760, %v3271_v41  ;;  %v3377_v43 = vsub.f32 %v966_v2, %v3312_v14 }
  0x7c   :  { %2122 = vmatprep.subr.mxu1 %v4059_v19  ;;  %2133 = vmatprep.subr.mxu0 %v3139_v26  ;;  %v3364_v49 = vsub.f32 %v3266_v28, %v4138_v36  ;;  %v3372_v19 = vand.u32 4294901760, %v948_v48  ;;  %v4140_v26 = vld [vmem:[#allocation34_spill] sm:$0xff]  ;;  %v4141_v36 = vand.u32 4294901760, %v3298_v52  ;;  %v4142_v15 = vand.u32 4294901760, %v3278_v63 }
  0x7d   :  { %v3359_v58 = vsub.f32 %v3271_v41, %v4137_v27  ;;  %2123 = vmatpush3.msra.mxu1 %v4061_v39  ;;  %1907 = vmatprep.mubr.msk.f32.mxu1 %vm2899_vm1, %v4120_v37  ;;  %v963_v27 = vmul.f32 %v4140_v26, %v4140_v26  ;;  %v1232_v39 = vand.u32 4294901760, %v3334_v10  ;;  %v3401_v10 = vand.u32 4294901760, %v964_v7 }
  0x7e   :  { %4139 = vst [vmem:[#allocation6_spill] sm:$0xff] %v3372_v19  ;;  %2134 = vmatpush3.msra.mxu0 %v3130_v23  ;;  %1908 = vmatmul.mubr.msk.f32.vlgmr.msra.gmra.mxu1 %vm2895_vm0, %v4120_v37  ;;  %v3387_v8 = vsub.f32 %v3298_v52, %v4141_v36  ;;  %v3392_v26 = vsub.f32 %v3278_v63, %v4142_v15  ;;  %v4143_v23 = vand.u32 4294901760, %v3170_v13  ;;  %v4145_v36 = vld [vmem:[#allocation38_spill] sm:$0xff]  ;;  %v4146_v15 = vand.u32 4294901760, %v3181_v34 }
  0x7f   :  { %2135 = vmatprep.subr.mxu0 %v3191_v50  ;;  %4144 = vst [vmem:[#allocation9_spill] sm:$0xff] %v3401_v10  ;;  %v962_v52 = vmul.f32 %v4145_v36, %v4145_v36  ;;  %v1239_v2 = vand.u32 4294901760, %v3359_v58  ;;  %v1127_v13 = vand.u32 4294901760, %v3364_v49  ;;  %v4148_v50 = vld [vmem:[#allocation39_spill] sm:$0xff]  ;;  %v4149_v36 = vand.u32 4294901760, %v3219_v32  ;;  %1909 = vmatprep.mubr.msk.f32.mxu1 %vm2899_vm1, %v4120_v37 }
  0x80   :  { %2162 = vmatprep.subr.mxu1 %v4143_v23  ;;  %2136 = vmatpush3.msra.mxu0 %v3153_v33  ;;  %v4147_v23 = vand.u32 4294901760, %v3304_v30  ;;  %v946_v63 = vmul.f32 %v4148_v50, %v4148_v50  ;;  %v3423_v34 = vsub.f32 %v948_v48, %v3372_v19  ;;  %v3429_v58 = vsub.f32 %v965_v29, %v3354_v47  ;;  %v4198_v22 = vld [vmem:[#allocation7_spill] sm:$0xff] }
  0x81   :  { %2163 = vmatpush3.msra.mxu1 %v4146_v15  ;;  %2137 = vmatprep.subr.mxu0 %v3214_v42  ;;  %v3425_v15 = vand.u32 4294901760, %v963_v27  ;;  %v1246_v50 = vand.u32 4294901760, %v3387_v8  ;;  %v1134_v32 = vand.u32 4294901760, %v3392_v26  ;;  %v4153_v42 = vld [vmem:[#allocation41_spill] sm:$0xff]  ;;  %v4154_v29 = vand.u32 4294901760, %v3253_v56  ;;  %v4156_v8 = vld [vmem:[#allocation43_spill] sm:$0xff] }
  0x82   :  { %v3415_v55 = vsub.f32 %v3304_v30, %v4147_v23  ;;  %2164 = vmatprep.subr.mxu1 %v4149_v36  ;;  %2138 = vmatpush3.msra.mxu0 %v3221_v45  ;;  %v4151_v23 = vand.u32 4294901760, %v3205_v20  ;;  %v4152_v36 = vand.u32 4294901760, %v3339_v0  ;;  %v961_v33 = vmul.f32 %v4153_v42, %v4153_v42 }
  0x83   :  { %4150 = vst [vmem:[#allocation8_spill] sm:$0xff] %v3425_v15  ;;  %2139 = vmatprep.subr.mxu0 %v3234_v17  ;;  %v3445_v49 = vsub.f32 %v947_v38, %v3403_v53  ;;  %v3447_v20 = vand.u32 4294901760, %v962_v52  ;;  %v945_v26 = vmul.f32 %v4156_v8, %v4156_v8  ;;  %v4157_v42 = vand.u32 4294901760, %v3239_v40  ;;  %v4164_v40 = vld [vmem:[#allocation51_spill] sm:$0xff] }
  0x84   :  { %2165 = vmatpush3.msra.mxu1 %v4151_v23  ;;  %v1252_v48 = vsub.f32 %v3339_v0, %v4152_v36  ;;  %v3452_v23 = vsub.f32 %v964_v7, %v3401_v10  ;;  %2140 = vmatpush3.msra.mxu0 %v3227_v11  ;;  %v1141_v36 = vand.u32 4294901760, %v3415_v55  ;;  %v3458_v56 = vand.u32 4294901760, %v946_v63 }
  0x85   :  { %2166 = vmatprep.subr.mxu1 %v4154_v29  ;;  %4155 = vst [vmem:[#allocation11_spill] sm:$0xff] %v3447_v20  ;;  %v4158_v29 = vld [vmem:[#allocation45_spill] sm:$0xff]  ;;  %2141 = vmatprep.subr.mxu0 %v3294_v46  ;;  %v4159_v8 = vand.u32 4294901760, %v3283_v16  ;;  %v4160_v7 = vand.u32 4294901760, %v3377_v43  ;;  %v3473_v45 = vsub.f32 %v963_v27, %v3425_v15  ;;  %v3478_v16 = vand.u32 4294901760, %v961_v33 }
  0x86   :  { %2167 = vmatpush3.msra.mxu1 %v4157_v42  ;;  %v960_v17 = vmul.f32 %v4158_v29, %v4158_v29  ;;  %v4161_v42 = vld [vmem:[#allocation47_spill] sm:$0xff]  ;;  %2142 = vmatpush3.msra.mxu0 %v3255_v9  ;;  %v4162_v29 = vand.u32 4294901760, %v3288_v44  ;;  %v1253_v38 = vand.u32 4294901760, %v1252_v48  ;;  %v4163_v46 = vld [vmem:[#allocation49_spill] sm:$0xff]  ;;  %v943_v9 = vmul.f32 %v4164_v40, %v4164_v40 }
  0x87   :  { %2168 = vmatprep.subr.mxu1 %v4159_v8  ;;  %v1259_v11 = vsub.f32 %v3377_v43, %v4160_v7  ;;  %v944_v55 = vmul.f32 %v4161_v42, %v4161_v42  ;;  %v959_v7 = vmul.f32 %v4163_v46, %v4163_v46  ;;  %2143 = vmatprep.subr.mxu0 %v3312_v14  ;;  %v3484_v42 = vand.u32 4294901760, %v945_v26  ;;  %v4199_v51 = vld [vmem:[#allocation9_spill] sm:$0xff] }
  0x88   :  { %2169 = vmatpush3.msra.mxu1 %v4162_v29  ;;  %v3490_v44 = vsub.f32 %v962_v52, %v3447_v20  ;;  %2144 = vmatpush3.msra.mxu0 %v3306_v62  ;;  %v4165_v48 = vand.u32 4294901760, %v3325_v1  ;;  %v3496_v46 = vsub.f32 %v946_v63, %v3458_v56  ;;  %v3501_v8 = vand.u32 4294901760, %v960_v17 }
  0x89   :  { %2170 = vmatprep.subr.mxu1 %v1232_v39  ;;  %v4166_v39 = vand.u32 4294901760, %v3344_v57  ;;  %2145 = vmatprep.subr.mxu0 %v3354_v47  ;;  %v1260_v52 = vand.u32 4294901760, %v1259_v11  ;;  %v4167_v40 = vand.u32 4294901760, %v3429_v58  ;;  %v3515_v27 = vand.u32 4294901760, %v959_v7 }
  0x8a   :  { %2171 = vmatpush3.msra.mxu1 %v4165_v48  ;;  %v3508_v48 = vand.u32 4294901760, %v944_v55  ;;  %2146 = vmatpush3.msra.mxu0 %v3346_v5  ;;  %v3519_v11 = vsub.f32 %v961_v33, %v3478_v16  ;;  %v4170_v63 = vand.u32 4294901760, %v3452_v23  ;;  %v3528_v5 = vand.u32 4294901760, %v943_v9 }
  0x8b   :  { %v1147_v29 = vsub.f32 %v3344_v57, %v4166_v39  ;;  %2172 = vmatprep.subr.mxu1 %v1239_v2  ;;  %v1266_v1 = vsub.f32 %v3429_v58, %v4167_v40  ;;  %v4168_v39 = vand.u32 4294901760, %v3399_v18  ;;  %2147 = vmatprep.subr.mxu0 %v3401_v10  ;;  %v3523_v40 = vsub.f32 %v945_v26, %v3484_v42 }
  0x8c   :  { %2173 = vmatpush3.msra.mxu1 %v1127_v13  ;;  %4169 = vst [vmem:[#allocation10_spill] sm:$0xff] %v3519_v11  ;;  %v1273_v13 = vsub.f32 %v3452_v23, %v4170_v63  ;;  %2148 = vmatpush3.msra.mxu0 %v3372_v19  ;;  %v4171_v33 = vand.u32 4294901760, %v3423_v34  ;;  %v3540_v63 = vsub.f32 %v944_v55, %v3508_v48 }
  0x8d   :  { %v1154_v62 = vsub.f32 %v3399_v18, %v4168_v39  ;;  %2174 = vmatprep.subr.mxu1 %v1246_v50  ;;  %v1148_v2 = vand.u32 4294901760, %v1147_v29  ;;  %v3536_v50 = vsub.f32 %v960_v17, %v3501_v8  ;;  %2149 = vmatprep.subr.mxu0 %v3425_v15  ;;  %v1267_v26 = vand.u32 4294901760, %v1266_v1 }
  0x8e   :  { %2175 = vmatpush3.msra.mxu1 %v1134_v32  ;;  %v1161_v10 = vsub.f32 %v3423_v34, %v4171_v33  ;;  %v4172_v39 = vand.u32 4294901760, %v3473_v45  ;;  %2150 = vmatpush3.msra.mxu0 %v3403_v53  ;;  %v4173_v17 = vand.u32 4294901760, %v3445_v49  ;;  %v3552_v1 = vsub.f32 %v959_v7, %v3515_v27 }
  0x8f   :  { %2176 = vmatprep.subr.mxu1 %v1253_v38  ;;  %v1155_v29 = vand.u32 4294901760, %v1154_v62  ;;  %2151 = vmatprep.subr.mxu0 %v3447_v20  ;;  %v1274_v55 = vand.u32 4294901760, %v1273_v13  ;;  %v4175_v32 = vand.u32 4294901760, %v3490_v44  ;;  %v3950_v7 = vand.u32 4294901760, %v3536_v50 }
  0x90   :  { %v1280_v19 = vsub.f32 %v3473_v45, %v4172_v39  ;;  %2177 = vmatpush3.msra.mxu1 %v1141_v36  ;;  %v1168_v33 = vsub.f32 %v3445_v49, %v4173_v17  ;;  %v3556_v39 = vsub.f32 %v943_v9, %v3528_v5  ;;  %2152 = vmatpush3.msra.mxu0 %v3458_v56  ;;  %v1162_v17 = vand.u32 4294901760, %v1161_v10 }
  0x91   :  { %2178 = vmatprep.subr.mxu1 %v1260_v52  ;;  %v1287_v62 = vsub.f32 %v3490_v44, %v4175_v32  ;;  %2153 = vmatprep.subr.mxu0 %v3478_v16  ;;  %v4176_v13 = vand.u32 4294901760, %v3496_v46  ;;  %v4177_v36 = vand.u32 4294901760, %v3519_v11 }
  0x92   :  { %4174 = vst [vmem:[#allocation13_spill] sm:$0xff] %v3556_v39  ;;  %2179 = vmatpush3.msra.mxu1 %v1148_v2  ;;  %v1281_v52 = vand.u32 4294901760, %v1280_v19  ;;  %2154 = vmatpush3.msra.mxu0 %v3484_v42  ;;  %v1169_v32 = vand.u32 4294901760, %v1168_v33  ;;  %v3952_v2 = vand.u32 4294901760, %v3552_v1  ;;  %v3951_v38 = vand.u32 4294901760, %v3556_v39 }
  0x93   :  { %2180 = vmatprep.subr.mxu1 %v1267_v26  ;;  %v1175_v9 = vsub.f32 %v3496_v46, %v4176_v13  ;;  %v1294_v10 = vsub.f32 %v3519_v11, %v4177_v36  ;;  %2155 = vmatprep.subr.mxu0 %v3501_v8  ;;  %v1288_v19 = vand.u32 4294901760, %v1287_v62  ;;  %v4178_v26 = vand.u32 4294901760, %v3523_v40 }
  0x94   :  { %2181 = vmatpush3.msra.mxu1 %v1155_v29  ;;  %2156 = vmatpush3.msra.mxu0 %v3508_v48  ;;  %v1301_v29 = vsub.f32 %v3536_v50, %v3950_v7 }
  0x95   :  { %2182 = vmatprep.subr.mxu1 %v1274_v55  ;;  %v1182_v13 = vsub.f32 %v3523_v40, %v4178_v26  ;;  %2157 = vmatprep.subr.mxu0 %v3515_v27  ;;  %v1176_v33 = vand.u32 4294901760, %v1175_v9  ;;  %v4179_v55 = vand.u32 4294901760, %v3540_v63  ;;  %v1295_v36 = vand.u32 4294901760, %v1294_v10  ;;  %v4180_v26 = vld [vmem:[#allocation60_spill] sm:$0xff]  ;;  %v4181_v9 = vld [vmem:[#allocation61_spill] sm:$0xff] }
  0x96   :  { %2183 = vmatpush3.msra.mxu1 %v1162_v17  ;;  %2158 = vmatpush3.msra.mxu0 %v3528_v5  ;;  %v1308_v17 = vsub.f32 %v3552_v1, %v3952_v2  ;;  %v4197_v2 = vld [vmem:[#allocation5_spill] sm:$0xff] }
  0x97   :  { %2184 = vmatprep.subr.mxu1 %v1281_v52  ;;  %v1189_v62 = vsub.f32 %v3540_v63, %v4179_v55  ;;  %1076 = vmatprep.mubr.f32.mxu0 %v4180_v26  ;;  %v1183_v7 = vand.u32 4294901760, %v1182_v13  ;;  %v1196_v52 = vsub.f32 %v3556_v39, %v3951_v38  ;;  %v1302_v55 = vand.u32 4294901760, %v1301_v29  ;;  %v4183_v13 = vld [vmem:[#allocation4_spill] sm:$0xff]  ;;  %v4184_v29 = vld [vmem:[#allocation21_spill] sm:$0xff]  ;;  %v4189_v26 = vld [vmem:[#allocation26_spill] sm:$0xff] }
  0x98   :  { %2185 = vmatpush3.msra.mxu1 %v1169_v32  ;;  %2197 = vmatprep.subr.mxu0 %v3102_v21  ;;  %v1309_v10 = vand.u32 4294901760, %v1308_v17  ;;  %v4188_v17 = vld [vmem:[#allocation48_spill] sm:$0xff] }
  0x99   :  { %2186 = vmatprep.subr.mxu1 %v1288_v19  ;;  %1082 = vmatmul.mubr.f32.vlgmr.msra.gmra.mxu0 %v4181_v9  ;;  %v1190_v32 = vand.u32 4294901760, %v1189_v62  ;;  %v1197_v19 = vand.u32 4294901760, %v1196_v52  ;;  %v4186_v62 = vld [vmem:[#allocation46_spill] sm:$0xff]  ;;  %v4191_v9 = vld [vmem:[#allocation28_spill] sm:$0xff] }
  0x9a   :  { %2187 = vmatpush3.msra.mxu1 %v1176_v33  ;;  %2198 = vmatpush3.msra.mxu0 %v3108_v60  ;;  %v4185_v33 = vld [vmem:[#allocation52_spill] sm:$0xff]  ;;  %v4190_v52 = vld [vmem:[#allocation50_spill] sm:$0xff] }
  0x9b   :  { %2188 = vmatprep.subr.mxu1 %v1295_v36  ;;  %2199 = vmatprep.subr.mxu0 %v3134_v4  ;;  %v4187_v36 = vld [vmem:[#allocation23_spill] sm:$0xff]  ;;  %v4196_v38 = vld [vmem:[#allocation40_spill] sm:$0xff] }
  0x9c   :  { %2189 = vmatpush3.msra.mxu1 %v1183_v7  ;;  %2200 = vmatpush3.msra.mxu0 %v3121_v6  ;;  %v4182_v7 = vld [vmem:[#allocation19_spill] sm:$0xff] }
  0x9d   :  { %2190 = vmatprep.subr.mxu1 %v1302_v55  ;;  %2201 = vmatprep.subr.mxu0 %v3159_v61  ;;  %v4192_v55 = vld [vmem:[#allocation30_spill] sm:$0xff] }
  0x9e   :  { %2191 = vmatpush3.msra.mxu1 %v1190_v32  ;;  %2202 = vmatpush3.msra.mxu0 %v3146_v31  ;;  %v4193_v32 = vld [vmem:[#allocation35_spill] sm:$0xff] }
  0x9f   :  { %2192 = vmatprep.subr.mxu1 %v1309_v10  ;;  %2203 = vmatprep.subr.mxu0 %v3186_v35  ;;  %v4194_v10 = vld [vmem:[#allocation32_spill] sm:$0xff] }
  0xa0   :  { %2193 = vmatpush3.msra.mxu1 %v1197_v19  ;;  %2204 = vmatpush3.msra.mxu0 %v3165_v12  ;;  %v4195_v19 = vld [vmem:[#allocation53_spill] sm:$0xff] }
  0xa1   :  { %1910 = vmatmul.mubr.msk.f32.vlgmr.msra.gmra.mxu1 %vm2895_vm0, %v4120_v37  ;;  %2205 = vmatprep.subr.mxu0 %v3244_v25  ;;  %v4200_v37 = vld [vmem:[#allocation6_spill] sm:$0xff] }
  0xa2   :  { %2232 = vmatprep.subr.mxu1 %v3073_v3  ;;  %2206 = vmatpush3.msra.mxu0 %v3200_v24 }
  0xa3   :  { %2233 = vmatpush3.msra.mxu1 %v3080_v59  ;;  %2207 = vmatprep.subr.mxu0 %v3271_v41 }
  0xa4   :  { %2234 = vmatprep.subr.mxu1 %v3097_v54  ;;  %2208 = vmatpush3.msra.mxu0 %v3266_v28 }
  0xa5   :  { %2235 = vmatpush3.msra.mxu1 %v4182_v7  ;;  %2209 = vmatprep.subr.mxu0 %v4183_v13 }
  0xa6   :  { %2236 = vmatprep.subr.mxu1 %v4184_v29  ;;  %2210 = vmatpush3.msra.mxu0 %v4185_v33 }
  0xa7   :  { %2237 = vmatpush3.msra.mxu1 %v4186_v62  ;;  %2211 = vmatprep.subr.mxu0 %v3339_v0 }
  0xa8   :  { %2238 = vmatprep.subr.mxu1 %v4187_v36  ;;  %2212 = vmatpush3.msra.mxu0 %v3304_v30 }
  0xa9   :  { %2239 = vmatpush3.msra.mxu1 %v4188_v17  ;;  %2213 = vmatprep.subr.mxu0 %v3377_v43 }
  0xaa   :  { %2240 = vmatprep.subr.mxu1 %v4189_v26  ;;  %2214 = vmatpush3.msra.mxu0 %v3344_v57 }
  0xab   :  { %2241 = vmatpush3.msra.mxu1 %v4190_v52  ;;  %2215 = vmatprep.subr.mxu0 %v3429_v58 }
  0xac   :  { %2242 = vmatprep.subr.mxu1 %v4191_v9  ;;  %2216 = vmatpush3.msra.mxu0 %v3399_v18 }
  0xad   :  { %2243 = vmatpush3.msra.mxu1 %v4192_v55  ;;  %2217 = vmatprep.subr.mxu0 %v3452_v23 }
  0xae   :  { %2244 = vmatprep.subr.mxu1 %v4193_v32  ;;  %2218 = vmatpush3.msra.mxu0 %v3423_v34 }
  0xaf   :  { %2245 = vmatpush3.msra.mxu1 %v4194_v10  ;;  %2219 = vmatprep.subr.mxu0 %v3473_v45 }
  0xb0   :  { %2246 = vmatprep.subr.mxu1 %v4195_v19  ;;  %2220 = vmatpush3.msra.mxu0 %v3445_v49 }
  0xb1   :  { %2247 = vmatpush3.msra.mxu1 %v4196_v38  ;;  %2221 = vmatprep.subr.mxu0 %v3490_v44 }
  0xb2   :  { %2248 = vmatprep.subr.mxu1 %v3312_v14  ;;  %2222 = vmatpush3.msra.mxu0 %v3496_v46 }
  0xb3   :  { %2249 = vmatpush3.msra.mxu1 %v4197_v2  ;;  %2223 = vmatprep.subr.mxu0 %v3519_v11  ;;  %v4201_v11 = vld [vmem:[#allocation56_spill] sm:$0xff] }
  0xb4   :  { %2250 = vmatprep.subr.mxu1 %v3354_v47  ;;  %2224 = vmatpush3.msra.mxu0 %v3523_v40 }
  0xb5   :  { %2251 = vmatpush3.msra.mxu1 %v4198_v22  ;;  %2225 = vmatprep.subr.mxu0 %v3536_v50  ;;  %v3661_v22 = vld [vmem:[%s3799_s2] sm:$0xff] }
  0xb6   :  { %2252 = vmatprep.subr.mxu1 %v4199_v51  ;;  %2226 = vmatpush3.msra.mxu0 %v3540_v63  ;;  %v4202_v51 = vld [vmem:[#allocation57_spill] sm:$0xff]  ;;  %vm1868_vm2 = vcmp.gt.f32.partialorder %v3661_v22, 1.0 }
  0xb7   :  { %2253 = vmatpush3.msra.mxu1 %v4200_v37  ;;  %2227 = vmatprep.subr.mxu0 %v3552_v1  ;;  %v4203_v37 = vand.u32 4294901760, %v3102_v21  ;;  %v4207_v21 = vand.u32 4294901760, %v3159_v61  ;;  %v4212_v61 = vld [vmem:[#allocation59_spill] sm:$0xff] }
  0xb8   :  { %2254 = vmatprep.subr.mxu1 %v3425_v15  ;;  %2228 = vmatpush3.msra.mxu0 %v3556_v39  ;;  %v4204_v39 = vand.u32 4294901760, %v3108_v60  ;;  %v4205_v15 = vand.u32 4294901760, %v3134_v4  ;;  %v4208_v60 = vand.u32 4294901760, %v3146_v31  ;;  %v4209_v4 = vand.u32 4294901760, %v3186_v35 }
  0xb9   :  { %1449 = vmatprep.mubr.f32.mxu0 %v4201_v11  ;;  %2255 = vmatpush3.msra.mxu1 %v3403_v53  ;;  %v1843_v11 = vmax.f32 %v3661_v22, 1.0  ;;  %v4214_v31 = vand.u32 4294901760, %v3200_v24  ;;  %v4215_v35 = vand.u32 4294901760, %v3271_v41  ;;  %v4221_v41 = vand.u32 4294901760, %v3377_v43 }
  0xba   :  { %1452 = vmatmul.mubr.f32.vlgmr.msra.gmra.mxu0 %v4202_v51  ;;  %2256 = vmatprep.subr.mxu1 %v3447_v20  ;;  %v4206_v51 = vand.u32 4294901760, %v3121_v6  ;;  %v2349_v20 = vmov 0   ;;  %v4210_v6 = vld [vmem:[#allocation58_spill] sm:$0xff]  ;;  %v4222_v24 = vand.u32 4294901760, %v3344_v57  ;;  %v4225_v43 = vand.u32 4294901760, %v3452_v23 }
  0xbb   :  { %2267 = vmatprep.subr.mxu0 %v4203_v37  ;;  %2257 = vmatpush3.msra.mxu1 %v3458_v56  ;;  %v4211_v37 = vand.u32 4294901760, %v3165_v12  ;;  %v4216_v12 = vand.u32 4294901760, %v3266_v28  ;;  %v4226_v28 = vand.u32 4294901760, %v3423_v34  ;;  %v4227_v57 = vand.u32 4294901760, %v3473_v45  ;;  %v4231_v23 = vld [vmem:[#allocation10_spill] sm:$0xff] }
  0xbc   :  { %2268 = vmatpush3.msra.mxu0 %v4204_v39  ;;  %2258 = vmatprep.subr.mxu1 %v3478_v16  ;;  %v4230_v34 = vand.u32 4294901760, %v3496_v46  ;;  %v4232_v45 = vand.u32 4294901760, %v4231_v23  ;;  %v4234_v39 = vld [vmem:[#allocation7_spill] sm:$0xff]  ;;  %v4237_v46 = vand.u32 4294901760, %v3540_v63  ;;  %v4243_v22 = vmov 1.0  }
  0xbd   :  { %2269 = vmatprep.subr.mxu0 %v4205_v15  ;;  %2259 = vmatpush3.msra.mxu1 %v3484_v42  ;;  %v4213_v15 = vand.u32 4294901760, %v3244_v25  ;;  %v4217_v25 = vand.u32 4294901760, %v4183_v13  ;;  %v4246_v63 = vld [vmem:[#allocation11_spill] sm:$0xff] }
  0xbe   :  { %2270 = vmatpush3.msra.mxu0 %v4206_v51  ;;  %2340 = vset.pattern.permute.xlu0 %v2349_v20 }
  0xbf   :  { %2260 = vmatprep.subr.mxu1 %v3501_v8  ;;  %2271 = vmatprep.subr.mxu0 %v4207_v21 }
  0xc0   :  { %1847 = vperm.xlu0 %2340, %v1843_v11   ;;  %2261 = vmatpush3.msra.mxu1 %v3508_v48 }
  0xc1   :  { %2272 = vmatpush3.msra.mxu0 %v4208_v60  ;;  %2262 = vmatprep.subr.mxu1 %v3515_v27 }
  0xc2   :  { %2273 = vmatprep.subr.mxu0 %v4209_v4  ;;  %2263 = vmatpush3.msra.mxu1 %v3528_v5 }
  0xc3   :  { %1556 = vmatprep.mubr.f32.mxu1 %v4210_v6  ;;  %2274 = vmatpush3.msra.mxu0 %v4211_v37 }
  0xc4   :  { %1560 = vmatmul.mubr.f32.vlgmr.msra.gmra.mxu1 %v4212_v61  ;;  %2275 = vmatprep.subr.mxu0 %v4213_v15 }
  0xc5   :  { %2302 = vmatprep.subr.mxu1 %v3073_v3  ;;  %2276 = vmatpush3.msra.mxu0 %v4214_v31  ;;  %v4218_v3 = vand.u32 4294901760, %v4185_v33 }
  0xc6   :  { %2303 = vmatpush3.msra.mxu1 %v3080_v59  ;;  %2277 = vmatprep.subr.mxu0 %v4215_v35  ;;  %v4219_v59 = vand.u32 4294901760, %v3339_v0  ;;  %v4223_v0 = vand.u32 4294901760, %v3429_v58  ;;  %v4229_v58 = vand.u32 4294901760, %v3490_v44  ;;  %v4235_v44 = vand.u32 4294901760, %v3536_v50 }
  0xc7   :  { %2304 = vmatprep.subr.mxu1 %v3097_v54  ;;  %2278 = vmatpush3.msra.mxu0 %v4216_v12  ;;  %v4220_v54 = vand.u32 4294901760, %v3304_v30  ;;  %v4224_v30 = vand.u32 4294901760, %v3399_v18  ;;  %v4228_v18 = vand.u32 4294901760, %v3445_v49  ;;  %v4233_v49 = vand.u32 4294901760, %v3523_v40 }
  0xc8   :  { %2305 = vmatpush3.msra.mxu1 %v4182_v7  ;;  %2279 = vmatprep.subr.mxu0 %v4217_v25  ;;  %v1876_v40 = vsel %vm1868_vm2, 1, %v2349_v20  ;;  %v4241_v7 = vld [vmem:[#allocation13_spill] sm:$0xff] }
  0xc9   :  { %2306 = vmatprep.subr.mxu1 %v4184_v29  ;;  %2280 = vmatpush3.msra.mxu0 %v4218_v3  ;;  %v4242_v13 = vand.u32 4294901760, %v4241_v7 }
  0xca   :  { %2307 = vmatpush3.msra.mxu1 %v4186_v62  ;;  %2281 = vmatprep.subr.mxu0 %v4219_v59 }
  0xcb   :  { %2308 = vmatprep.subr.mxu1 %v4187_v36  ;;  %2282 = vmatpush3.msra.mxu0 %v4220_v54 }
  0xcc   :  { %2309 = vmatpush3.msra.mxu1 %v4188_v17  ;;  %2283 = vmatprep.subr.mxu0 %v4221_v41 }
  0xcd   :  { %2310 = vmatprep.subr.mxu1 %v4189_v26  ;;  %2284 = vmatpush3.msra.mxu0 %v4222_v24 }
  0xce   :  { %2311 = vmatpush3.msra.mxu1 %v4190_v52  ;;  %2285 = vmatprep.subr.mxu0 %v4223_v0 }
  0xcf   :  { %2312 = vmatprep.subr.mxu1 %v4191_v9  ;;  %2286 = vmatpush3.msra.mxu0 %v4224_v30 }
  0xd0   :  { %2313 = vmatpush3.msra.mxu1 %v4192_v55  ;;  %2287 = vmatprep.subr.mxu0 %v4225_v43 }
  0xd1   :  { %2314 = vmatprep.subr.mxu1 %v4193_v32  ;;  %2288 = vmatpush3.msra.mxu0 %v4226_v28 }
  0xd2   :  { %2315 = vmatpush3.msra.mxu1 %v4194_v10  ;;  %2289 = vmatprep.subr.mxu0 %v4227_v57 }
  0xd3   :  { %2316 = vmatprep.subr.mxu1 %v4195_v19  ;;  %2290 = vmatpush3.msra.mxu0 %v4228_v18 }
  0xd4   :  { %2317 = vmatpush3.msra.mxu1 %v4196_v38  ;;  %2291 = vmatprep.subr.mxu0 %v4229_v58  ;;  %v4238_v38 = vld [vmem:[#allocation6_spill] sm:$0xff] }
  0xd5   :  { %2318 = vmatprep.subr.mxu1 %v3312_v14  ;;  %2292 = vmatpush3.msra.mxu0 %v4230_v34  ;;  %v4236_v14 = vld [vmem:[#allocation9_spill] sm:$0xff] }
  0xd6   :  { %2319 = vmatpush3.msra.mxu1 %v4197_v2  ;;  %2293 = vmatprep.subr.mxu0 %v4232_v45  ;;  %v4239_v2 = vand.u32 4294901760, %v3552_v1 }
  0xd7   :  { %2320 = vmatprep.subr.mxu1 %v3354_v47  ;;  %2294 = vmatpush3.msra.mxu0 %v4233_v49  ;;  %v4240_v47 = vld [vmem:[#allocation8_spill] sm:$0xff] }
  0xd8   :  { %2321 = vmatpush3.msra.mxu1 %v4234_v39  ;;  %2295 = vmatprep.subr.mxu0 %v4235_v44 }
  0xd9   :  { %2322 = vmatprep.subr.mxu1 %v4236_v14  ;;  %2296 = vmatpush3.msra.mxu0 %v4237_v46 }
  0xda   :  { %2323 = vmatpush3.msra.mxu1 %v4238_v38  ;;  %2297 = vmatprep.subr.mxu0 %v4239_v2 }
  0xdb   :  { %2324 = vmatprep.subr.mxu1 %v4240_v47  ;;  %2298 = vmatpush3.msra.mxu0 %v4242_v13  ;;  %v1915_v13 = vld [vmem:[%s3800_s3] ss:$0 sm:$0xff] }
  0xdc   :  { %1911 = vmatprep.mubr.msk.f32.mxu0 %vm2899_vm1, %v4243_v22  ;;  %2325 = vmatpush3.msra.mxu1 %v3403_v53 }
  0xdd   :  { %1912 = vmatmul.mubr.msk.f32.vlgmr.msra.gmra.mxu0 %vm2895_vm0, %v4243_v22  ;;  %2326 = vmatprep.subr.mxu1 %v4246_v63  ;;  %v1916_v63 = vld [vmem:[%s3801_s4] ss:$0 sm:$0xff] }
  0xde   :  { %1913 = vmatprep.mubr.msk.f32.mxu1 %vm2899_vm1, %v4243_v22  ;;  %2327 = vmatpush3.msra.mxu1 %v3458_v56 }
  0xdf   :  { %1878 = vperm.xlu0 %2340, %v1876_v40   ;;  %2328 = vmatprep.subr.mxu1 %v3478_v16 }
  0xe0   :  { %2329 = vmatpush3.msra.mxu1 %v3484_v42 }
  0xe1   :  { %2330 = vmatprep.subr.mxu1 %v3501_v8 }
  0xe2   :  { %2331 = vmatpush3.msra.mxu1 %v3508_v48 }
  0xe3   :  { %2332 = vmatprep.subr.mxu1 %v3515_v27 }
  0xe4   :  { %2333 = vmatpush3.msra.mxu1 %v3528_v5 }
  0xe5   :  { %1914 = vmatmul.mubr.msk.f32.vlgmr.msra.gmra.mxu1 %vm2895_vm0, %v4243_v22 }
  0xf5   :  { %v1949_v53 = vpop.f32.mrf.mxu0 }
  0xf7   :  { %v1950_v20 = vpop.f32.mrf.mxu0 }
  0xf8   :  { %v1984_v56 = vpop.f32.mrf.mxu1  ;;  %v1951_v10 = vadd.f32 %v1950_v20, %v1949_v53 }
  0xfa   :  { %v1985_v33 = vpop.f32.mrf.mxu1 }
  0xfb   :  { %v1986_v55 = vadd.f32 %v1985_v33, %v1984_v56 }
  0xfd   :  { %v419_v21 = vadd.f32 %v1986_v55, %v1951_v10 }
 0x115   :  { %v2019_v1 = vpop.f32.mrf.mxu0 }
 0x117   :  { %v2020_v16 = vpop.f32.mrf.mxu0 }
 0x118   :  { %v2021_v19 = vadd.f32 %v2020_v16, %v2019_v1 }
 0x11a   :  { %v557_v6 = vadd.f32 %v2021_v19, %v419_v21 }
 0x11c   :  { %v2054_v62 = vpop.f32.mrf.mxu1 }
 0x11e   :  { %v2055_v36 = vpop.f32.mrf.mxu1 }
 0x11f   :  { %v2056_v60 = vadd.f32 %v2055_v36, %v2054_v62 }
 0x121   :  { %v665_v31 = vadd.f32 %v2056_v60, %v557_v6 }
 0x135   :  { %v2089_v42 = vpop.f32.mrf.mxu0 }
 0x137   :  { %v2090_v8 = vpop.f32.mrf.mxu0 }
 0x138   :  { %v2091_v37 = vadd.f32 %v2090_v8, %v2089_v42 }
 0x13a   :  { %v833_v59 = vadd.f32 %v2091_v37, %v665_v31 }
 0x13b   :  { %v1848_v27 = vpop.permute.xlu0 %1847 }
 0x13c   :  { %2341 = vrcp.f32 %v1848_v27 }
 0x13e   :  { %v2124_v17 = vpop.f32.mrf.mxu1 }
 0x140   :  { %v2125_v26 = vpop.f32.mrf.mxu1 }
 0x141   :  { %v2126_v35 = vadd.f32 %v2125_v26, %v2124_v17 }
 0x143   :  { %v937_v24 = vadd.f32 %v2126_v35, %v833_v59 }
 0x149   :  { %v2342_v43 = vpop.eup %2341 }
 0x14a   :  { %v1851_v58 = vmul.f32 %v2342_v43, %v937_v24 }
 0x14c   :  { %v1854_v49 = vmul.f32 %v1851_v58, %v1851_v58 }
 0x159   :  { %v2159_v48 = vpop.f32.mrf.mxu0 }
 0x15a   :  { %v1879_v22 = vpop.permute.xlu0 %1878 }
 0x15b   :  { %v2160_v52 = vpop.f32.mrf.mxu0  ;;  %vm1880_vm5 = vcmp.eq.s32.totalorder %v1879_v22, 1 }
 0x15c   :  { %v2161_v12 = vadd.f32 %v2160_v52, %v2159_v48 }
 0x161   :  { %v2194_v5 = vpop.f32.mrf.mxu1 }
 0x163   :  { %v2195_v32 = vpop.f32.mrf.mxu1 }
 0x164   :  { %v2196_v61 = vadd.f32 %v2195_v32, %v2194_v5 }
 0x166   :  { %v1316_v54 = vadd.f32 %v2196_v61, %v2161_v12 }
 0x17a   :  { %v2229_v9 = vpop.f32.mrf.mxu0 }
 0x17c   :  { %v2230_v11 = vpop.f32.mrf.mxu0 }
 0x17d   :  { %v2231_v25 = vadd.f32 %v2230_v11, %v2229_v9 }
 0x17f   :  { %v1454_v0 = vadd.f32 %v2231_v25, %v1316_v54 }
 0x184   :  { %v2264_v51 = vpop.f32.mrf.mxu1 }
 0x186   :  { %v2265_v15 = vpop.f32.mrf.mxu1 }
 0x187   :  { %v2266_v41 = vadd.f32 %v2265_v15, %v2264_v51 }
 0x189   :  { %v1562_v57 = vadd.f32 %v2266_v41, %v1454_v0 }
 0x19d   :  { %v2299_v4 = vpop.f32.mrf.mxu0 }
 0x19f   :  { %v2300_v3 = vpop.f32.mrf.mxu0 }
 0x1a0   :  { %v2301_v30 = vadd.f32 %v2300_v3, %v2299_v4 }
 0x1a2   :  { %v1730_v34 = vadd.f32 %v2301_v30, %v1562_v57 }
 0x1a5   :  { %v2334_v28 = vpop.f32.mrf.mxu1 }
 0x1a7   :  { %v2335_v18 = vpop.f32.mrf.mxu1 }
 0x1a8   :  { %v2336_v23 = vadd.f32 %v2335_v18, %v2334_v28 }
 0x1aa   :  { %v1834_v45 = vadd.f32 %v2336_v23, %v1730_v34 }
 0x1ac   :  { %v1853_v39 = vmul.f32 %v2342_v43, %v1834_v45 }
 0x1ae   :  { %v1855_v44 = vsub.f32 %v1853_v39, %v1854_v49 }
 0x1b0   :  { %v1856_v14 = vmax.f32 %v1855_v44, 0.0 }
 0x1b2   :  { %2343 = vrsqrt.f32 %v1856_v14  ;;  %vm1859_vm3 = vcmp.eq.f32.partialorder %v1856_v14, inf  ;;  %v1862_v2 = vand.u32 2147483648, %v1856_v14  ;;  %vm1861_vm4 = vcmp.eq.f32.partialorder %v1856_v14, 0.0 }
 0x1bf   :  { %v2344_v46 = vpop.eup %2343 }
 0x1c0   :  { %v1858_v38 = vmul.f32 %v2344_v46, %v1856_v14 }
 0x1c2   :  { %v1860_v47 = vsel %vm1859_vm3, %v1856_v14, %v1858_v38 }
 0x1c3   :  { %v1863_v40 = vsel %vm1861_vm4, %v1862_v2, %v1860_v47 }
 0x1c4   :  { %v1864_v7 = vadd.f32 1e-05, %v1863_v40 }
 0x1c6   :  { %2345 = vrcp.f32 %v1864_v7 }
 0x1d3   :  { %v2346_v29 = vpop.eup %2345 }
 0x1d4   :  { %v1875_v50 = vmul.f32 %v2346_v29, %v1915_v13 }
 0x1d6   :  { %v1881_v53 = vsel %vm1880_vm5, %v1875_v50, %v1915_v13 }
 0x1d7   :  { %v1882_v20 = vmul.f32 %v1881_v53, %v1851_v58  ;;  %1891 = vst [vmem:[%s3802_s5] sm:$0xff] %v1881_v53 }
 0x1d9   :  { %v1889_v56 = vsub.f32 %v1916_v63, %v1882_v20 }
 0x1db   :  { %v1890_v1 = vsel %vm1880_vm5, %v1889_v56, %v1916_v63 }
 0x1dc   :  { %1892 = vst [vmem:[%s3803_s6] sm:$0xff] %v1890_v1 }

// kernel: _segment_norm_jit.3
= control target key start
LH: loop header
LB: loop body
LE: loop exit
PB: predicated region body
PF: predicated region fallthrough
CT: control target
= control target key end

     0   :  { %v5256_v0 = vmov 0   ;;  %v81_v39 = vlaneseq  ;;  %vm276_vm0 = vcmask 64512   ;;  %v7251_v43 = vmov 0.0   ;;  %s7246_s0 = inlined_call_operand.vmem [shape: s32[256,1], index: 0, kind: input, shape index: {}]   ;;  %s7247_s2 = inlined_call_operand.vmem [shape: f32[8,128], index: 2, kind: input, shape index: {}]   ;;  %s7248_s3 = inlined_call_operand.vmem [shape: f32[8,128], index: 3, kind: input, shape index: {}]   ;;  %s7249_s1 = inlined_call_operand.vmem [shape: f32[256,128], index: 1, kind: input, shape index: {}]   ;;  %s7250_s4 = inlined_call_operand.vmem [shape: f32[256,128], index: 4, kind: output, shape index: {}]  }
   0x1   :  { %5255 = vset.pattern.permute.xlu1 %v5256_v0  ;;  %5254 = vset.pattern.permute.xlu0 %v5256_v0  ;;  %v51_v1 = vld [vmem:[%s7246_s0 + $0x10] sm:$0xff]  ;;  %v49_v2 = vld [vmem:[%s7246_s0] sm:$0xff]  ;;  %v52_v3 = vld [vmem:[%s7246_s0 + $0x18] sm:$0xff] }
   0x2   :  { %90 = vperm.xlu1 %5255, %v51_v1   ;;  %84 = vperm.xlu0 %5254, %v49_v2   ;;  %v50_v4 = vld [vmem:[%s7246_s0 + $0x8] sm:$0xff]  ;;  %v53_v6 = vld [vmem:[%s7246_s0 + $0x20] sm:$0xff]  ;;  %v56_v7 = vld [vmem:[%s7246_s0 + $0x38] sm:$0xff]  ;;  %v5396_v40 = vand.u32 127, %v81_v39 }
   0x3   :  { %v54_v5 = vld [vmem:[%s7246_s0 + $0x28] sm:$0xff]  ;;  %v55_v8 = vld [vmem:[%s7246_s0 + $0x30] sm:$0xff]  ;;  %v275_v9 = vld [vmem:[%s7247_s2] sm:$0xff] }
   0x4   :  { %v5310_v10 = vand.u32 4294901760, %v275_v9  ;;  %v58_v12 = vld [vmem:[%s7246_s0 + $0x48] sm:$0xff]  ;;  %v57_v13 = vld [vmem:[%s7246_s0 + $0x40] sm:$0xff]  ;;  %v60_v16 = vld [vmem:[%s7246_s0 + $0x58] sm:$0xff] }
   0x5   :  { %v59_v17 = vld [vmem:[%s7246_s0 + $0x50] sm:$0xff]  ;;  %v62_v19 = vld [vmem:[%s7246_s0 + $0x68] sm:$0xff]  ;;  %v61_v20 = vld [vmem:[%s7246_s0 + $0x60] sm:$0xff] }
   0x6   :  { %93 = vperm.xlu1 %5255, %v52_v3   ;;  %87 = vperm.xlu0 %5254, %v50_v4   ;;  %v5313_v11 = vsub.f32 %v275_v9, %v5310_v10  ;;  %v64_v21 = vld [vmem:[%s7246_s0 + $0x78] sm:$0xff]  ;;  %v63_v22 = vld [vmem:[%s7246_s0 + $0x70] sm:$0xff]  ;;  %v66_v23 = vld [vmem:[%s7246_s0 + $0x88] sm:$0xff] }
   0x7   :  { %4652 = vmatprep.subr.mxu0 %v5310_v10  ;;  %v65_v24 = vld [vmem:[%s7246_s0 + $0x80] sm:$0xff]  ;;  %v68_v25 = vld [vmem:[%s7246_s0 + $0x98] sm:$0xff]  ;;  %v67_v26 = vld [vmem:[%s7246_s0 + $0x90] sm:$0xff] }
   0x8   :  { %v5323_v14 = vand.u32 4294901760, %v5313_v11  ;;  %4653 = vmatpush3.msra.mxu0 %v5310_v10  ;;  %v70_v27 = vld [vmem:[%s7246_s0 + $0xa8] sm:$0xff]  ;;  %v69_v28 = vld [vmem:[%s7246_s0 + $0xa0] sm:$0xff]  ;;  %v72_v29 = vld [vmem:[%s7246_s0 + $0xb8] sm:$0xff] }
   0x9   :  { %4752 = vmatprep.subr.mxu0 %v5313_v11  ;;  %v71_v30 = vld [vmem:[%s7246_s0 + $0xb0] sm:$0xff]  ;;  %v74_v31 = vld [vmem:[%s7246_s0 + $0xc8] sm:$0xff]  ;;  %v73_v32 = vld [vmem:[%s7246_s0 + $0xc0] sm:$0xff] }
   0xa   :  { %99 = vperm.xlu1 %5255, %v54_v5   ;;  %96 = vperm.xlu0 %5254, %v53_v6   ;;  %v793_v15 = vsub.f32 %v5313_v11, %v5323_v14  ;;  %v76_v33 = vld [vmem:[%s7246_s0 + $0xd8] sm:$0xff]  ;;  %v75_v34 = vld [vmem:[%s7246_s0 + $0xd0] sm:$0xff]  ;;  %v78_v35 = vld [vmem:[%s7246_s0 + $0xe8] sm:$0xff] }
   0xb   :  { %v77_v36 = vld [vmem:[%s7246_s0 + $0xe0] sm:$0xff]  ;;  %v80_v37 = vld [vmem:[%s7246_s0 + $0xf8] sm:$0xff]  ;;  %v79_v38 = vld [vmem:[%s7246_s0 + $0xf0] sm:$0xff] }
   0xc   :  { %v794_v18 = vand.u32 4294901760, %v793_v15 }
   0xe   :  { %105 = vperm.xlu1 %5255, %v56_v7   ;;  %102 = vperm.xlu0 %5254, %v55_v8  }
   0xf   :  { %4702 = vmatprep.subr.mxu1 %v794_v18 }
  0x10   :  { %4703 = vmatpush3.msra.mxu1 %v794_v18 }
  0x11   :  { %4802 = vmatprep.subr.mxu1 %v5310_v10 }
  0x12   :  { %111 = vperm.xlu1 %5255, %v58_v12   ;;  %108 = vperm.xlu0 %5254, %v57_v13  }
  0x16   :  { %117 = vperm.xlu1 %5255, %v60_v16   ;;  %114 = vperm.xlu0 %5254, %v59_v17  }
  0x1a   :  { %123 = vperm.xlu1 %5255, %v62_v19   ;;  %120 = vperm.xlu0 %5254, %v61_v20  }
  0x1e   :  { %129 = vperm.xlu1 %5255, %v64_v21   ;;  %126 = vperm.xlu0 %5254, %v63_v22  }
  0x22   :  { %135 = vperm.xlu1 %5255, %v66_v23   ;;  %132 = vperm.xlu0 %5254, %v65_v24  }
  0x26   :  { %141 = vperm.xlu1 %5255, %v68_v25   ;;  %138 = vperm.xlu0 %5254, %v67_v26  }
  0x2a   :  { %147 = vperm.xlu1 %5255, %v70_v27   ;;  %144 = vperm.xlu0 %5254, %v69_v28  }
  0x2e   :  { %153 = vperm.xlu1 %5255, %v72_v29   ;;  %150 = vperm.xlu0 %5254, %v71_v30  }
  0x32   :  { %159 = vperm.xlu1 %5255, %v74_v31   ;;  %156 = vperm.xlu0 %5254, %v73_v32  }
  0x36   :  { %165 = vperm.xlu1 %5255, %v76_v33   ;;  %162 = vperm.xlu0 %5254, %v75_v34  }
  0x3a   :  { %171 = vperm.xlu1 %5255, %v78_v35   ;;  %168 = vperm.xlu0 %5254, %v77_v36  }
  0x3e   :  { %177 = vperm.xlu1 %5255, %v80_v37   ;;  %174 = vperm.xlu0 %5254, %v79_v38  }
  0x7d   :  { %v91_v41 = vpop.permute.xlu1 %90  ;;  %v85_v42 = vpop.permute.xlu0 %84 }
  0x7e   :  { %vm181_vm1 = vcmp.eq.s32.totalorder %v91_v41, %v5396_v40  ;;  %vm179_vm2 = vcmp.eq.s32.totalorder %v85_v42, %v5396_v40 }
  0x7f   :  { %v5401_v44 = vsel %vm181_vm1, 1.0, %v7251_v43  ;;  %v5404_v45 = vsel %vm179_vm2, 1.0, %v7251_v43 }
  0x80   :  { %7437 = vst [vmem:[#allocation2_spill] sm:$0xff] %v5401_v44  ;;  %7438 = vst [vmem:[#allocation3_spill] sm:$0xff] %v5404_v45  ;;  %4704 = vmatprep.mubr.msk.f32.mxu1 %vm276_vm0, %v5404_v45  ;;  %v278_v46 = vsel %vm276_vm0, %v5404_v45, 0  ;;  %v284_v47 = vsel %vm276_vm0, %v5401_v44, 0 }
  0x81   :  { %v94_v48 = vpop.permute.xlu1 %93  ;;  %v88_v49 = vpop.permute.xlu0 %87  ;;  %v5412_v50 = vsub.f32 %v278_v46, %v278_v46  ;;  %v5414_v51 = vsub.f32 %v284_v47, %v284_v47 }
  0x82   :  { %vm182_vm3 = vcmp.eq.s32.totalorder %v94_v48, %v5396_v40  ;;  %vm180_vm4 = vcmp.eq.s32.totalorder %v88_v49, %v5396_v40 }
  0x83   :  { %v5419_v52 = vsel %vm182_vm3, 1.0, %v7251_v43  ;;  %v5422_v53 = vsel %vm180_vm4, 1.0, %v7251_v43  ;;  %v5425_v54 = vand.u32 4294901760, %v5412_v50  ;;  %v5432_v56 = vand.u32 4294901760, %v5414_v51 }
  0x84   :  { %7439 = vst [vmem:[#allocation4_spill] sm:$0xff] %v5419_v52  ;;  %7440 = vst [vmem:[#allocation5_spill] sm:$0xff] %v5422_v53  ;;  %4705 = vmatmul.mubr.msk.f32.vlgmr.msra.gmra.mxu1 %vm276_vm0, %v5422_v53  ;;  %v281_v55 = vsel %vm276_vm0, %v5422_v53, 0  ;;  %v287_v57 = vsel %vm276_vm0, %v5419_v52, 0 }
  0x85   :  { %v100_v58 = vpop.permute.xlu1 %99  ;;  %4707 = vmatprep.mubr.msk.f32.mxu1 %vm276_vm0, %v5401_v44  ;;  %v97_v59 = vpop.permute.xlu0 %96  ;;  %v442_v60 = vsub.f32 %v5412_v50, %v5425_v54  ;;  %v5440_v61 = vsub.f32 %v281_v55, %v281_v55  ;;  %4803 = vmatpush3.msra.mxu1 %v5310_v10  ;;  %v5445_v62 = vsub.f32 %v287_v57, %v287_v57 }
  0x86   :  { %vm184_vm5 = vcmp.eq.s32.totalorder %v100_v58, %v5396_v40  ;;  %vm183_vm6 = vcmp.eq.s32.totalorder %v97_v59, %v5396_v40  ;;  %4902 = vmatprep.subr.mxu1 %v5310_v10  ;;  %v462_v3 = vsub.f32 %v5414_v51, %v5432_v56 }
  0x87   :  { %v5449_v63 = vsel %vm184_vm5, 1.0, %v7251_v43  ;;  %v5452_v0 = vsel %vm183_vm6, 1.0, %v7251_v43  ;;  %v5454_v1 = vand.u32 4294901760, %v442_v60  ;;  %v5457_v2 = vand.u32 4294901760, %v5440_v61 }
  0x88   :  { %7441 = vst [vmem:[#allocation6_spill] sm:$0xff] %v5449_v63  ;;  %7442 = vst [vmem:[#allocation7_spill] sm:$0xff] %v5452_v0  ;;  %4708 = vmatmul.mubr.msk.f32.gmra.mxu1 %vm276_vm0, %v5419_v52  ;;  %v5464_v4 = vand.u32 4294901760, %v5445_v62  ;;  %v290_v5 = vsel %vm276_vm0, %v5452_v0, 0  ;;  %v293_v6 = vsel %vm276_vm0, %v5449_v63, 0  ;;  %v5496_v20 = vand.u32 4294901760, %v462_v3 }
  0x89   :  { %7443 = vst [vmem:[#allocation8_spill] sm:$0xff] %v5454_v1  ;;  %v106_v7 = vpop.permute.xlu1 %105  ;;  %4654 = vmatprep.mubr.f32.mxu0 %v5454_v1  ;;  %4710 = vmatprep.mubr.msk.f32.mxu1 %vm276_vm0, %v5452_v0  ;;  %v103_v8 = vpop.permute.xlu0 %102  ;;  %v452_v9 = vsub.f32 %v5440_v61, %v5457_v2  ;;  %v5475_v12 = vsub.f32 %v290_v5, %v290_v5  ;;  %v2152_v52 = vld [vmem:[%s7248_s3] sm:$0xff] }
  0x8a   :  { %v5477_v13 = vsub.f32 %v293_v6, %v293_v6  ;;  %vm186_vm7 = vcmp.eq.s32.totalorder %v106_v7, %v5396_v40  ;;  %vm185_vm8 = vcmp.eq.s32.totalorder %v103_v8, %v5396_v40  ;;  %v472_v15 = vsub.f32 %v5445_v62, %v5464_v4  ;;  %7447 = vst [vmem:[#allocation12_spill] sm:$0xff] %v5496_v20 }
  0x8b   :  { %v5484_v16 = vsel %vm186_vm7, 1.0, %v7251_v43  ;;  %v5487_v17 = vsel %vm185_vm8, 1.0, %v7251_v43  ;;  %v5489_v18 = vand.u32 4294901760, %v452_v9  ;;  %v5492_v19 = vand.u32 4294901760, %v5475_v12 }
  0x8c   :  { %7444 = vst [vmem:[#allocation9_spill] sm:$0xff] %v5484_v16  ;;  %7445 = vst [vmem:[#allocation10_spill] sm:$0xff] %v5487_v17  ;;  %4711 = vmatmul.mubr.msk.f32.gmra.mxu1 %vm276_vm0, %v5449_v63  ;;  %v5499_v21 = vand.u32 4294901760, %v5477_v13  ;;  %v296_v22 = vsel %vm276_vm0, %v5487_v17, 0  ;;  %v299_v23 = vsel %vm276_vm0, %v5484_v16, 0  ;;  %v5518_v29 = vand.u32 4294901760, %v472_v15 }
  0x8d   :  { %7446 = vst [vmem:[#allocation11_spill] sm:$0xff] %v5489_v18  ;;  %v112_v24 = vpop.permute.xlu1 %111  ;;  %4655 = vmatmul.mubr.f32.vlgmr.msra.gmra.mxu0 %v5489_v18  ;;  %4713 = vmatprep.mubr.msk.f32.mxu1 %vm276_vm0, %v5487_v17  ;;  %v109_v25 = vpop.permute.xlu0 %108  ;;  %v482_v26 = vsub.f32 %v5475_v12, %v5492_v19  ;;  %v5510_v27 = vsub.f32 %v296_v22, %v296_v22 }
  0x8e   :  { %v5512_v28 = vsub.f32 %v299_v23, %v299_v23  ;;  %vm188_vm9 = vcmp.eq.s32.totalorder %v112_v24, %v5396_v40  ;;  %4753 = vmatpush3.msra.mxu0 %v5313_v11  ;;  %vm187_vm10 = vcmp.eq.s32.totalorder %v109_v25, %v5396_v40  ;;  %4657 = vmatprep.mubr.f32.mxu0 %v5496_v20 }
  0x8f   :  { %7448 = vst [vmem:[#allocation13_spill] sm:$0xff] %v5510_v27  ;;  %7450 = vst [vmem:[#allocation15_spill] sm:$0xff] %v5518_v29  ;;  %v492_v30 = vsub.f32 %v5477_v13, %v5499_v21  ;;  %v5523_v31 = vsel %vm188_vm9, 1.0, %v7251_v43  ;;  %v5526_v32 = vsel %vm187_vm10, 1.0, %v7251_v43  ;;  %v5528_v33 = vand.u32 4294901760, %v482_v26  ;;  %4852 = vmatprep.subr.mxu0 %v5323_v14 }
  0x90   :  { %7449 = vst [vmem:[#allocation14_spill] sm:$0xff] %v5512_v28  ;;  %7451 = vst [vmem:[#allocation16_spill] sm:$0xff] %v5523_v31  ;;  %v5531_v34 = vand.u32 4294901760, %v5510_v27  ;;  %4714 = vmatmul.mubr.msk.f32.gmra.mxu1 %vm276_vm0, %v5484_v16  ;;  %v5537_v11 = vand.u32 4294901760, %v5512_v28  ;;  %v302_v35 = vsel %vm276_vm0, %v5526_v32, 0  ;;  %v305_v36 = vsel %vm276_vm0, %v5523_v31, 0 }
  0x91   :  { %7452 = vst [vmem:[#allocation17_spill] sm:$0xff] %v5526_v32  ;;  %7453 = vst [vmem:[#allocation18_spill] sm:$0xff] %v5528_v33  ;;  %v118_v37 = vpop.permute.xlu1 %117  ;;  %4658 = vmatmul.mubr.f32.gmra.mxu0 %v5518_v29  ;;  %4716 = vmatprep.mubr.msk.f32.mxu1 %vm276_vm0, %v5526_v32  ;;  %v115_v38 = vpop.permute.xlu0 %114  ;;  %v5548_v41 = vsub.f32 %v302_v35, %v302_v35  ;;  %v5550_v42 = vsub.f32 %v305_v36, %v305_v36  ;;  %v5555_v46 = vand.u32 4294901760, %v492_v30 }
  0x92   :  { %v502_v39 = vsub.f32 %v5510_v27, %v5531_v34  ;;  %vm190_vm11 = vcmp.eq.s32.totalorder %v118_v37, %v5396_v40  ;;  %vm189_vm12 = vcmp.eq.s32.totalorder %v115_v38, %v5396_v40  ;;  %4660 = vmatprep.mubr.f32.mxu0 %v5528_v33  ;;  %v512_v47 = vsub.f32 %v5512_v28, %v5537_v11 }
  0x93   :  { %7454 = vst [vmem:[#allocation19_spill] sm:$0xff] %v5548_v41  ;;  %7455 = vst [vmem:[#allocation20_spill] sm:$0xff] %v5550_v42  ;;  %v5560_v48 = vsel %vm190_vm11, 1.0, %v7251_v43  ;;  %v5563_v49 = vsel %vm189_vm12, 1.0, %v7251_v43  ;;  %v5568_v57 = vand.u32 4294901760, %v5548_v41  ;;  %v5573_v58 = vand.u32 4294901760, %v5550_v42 }
  0x94   :  { %7456 = vst [vmem:[#allocation21_spill] sm:$0xff] %v5555_v46  ;;  %7457 = vst [vmem:[#allocation22_spill] sm:$0xff] %v5560_v48  ;;  %v5565_v55 = vand.u32 4294901760, %v502_v39  ;;  %4717 = vmatmul.mubr.msk.f32.gmra.mxu1 %vm276_vm0, %v5523_v31  ;;  %v308_v59 = vsel %vm276_vm0, %v5563_v49, 0  ;;  %v311_v60 = vsel %vm276_vm0, %v5560_v48, 0  ;;  %v5591_v9 = vand.u32 4294901760, %v512_v47 }
  0x95   :  { %7458 = vst [vmem:[#allocation23_spill] sm:$0xff] %v5563_v49  ;;  %v124_v3 = vpop.permute.xlu1 %123  ;;  %4661 = vmatmul.mubr.f32.gmra.mxu0 %v5555_v46  ;;  %4719 = vmatprep.mubr.msk.f32.mxu1 %vm276_vm0, %v5563_v49  ;;  %v121_v5 = vpop.permute.xlu0 %120  ;;  %v522_v6 = vsub.f32 %v5548_v41, %v5568_v57  ;;  %v5584_v7 = vsub.f32 %v308_v59, %v308_v59  ;;  %v7478_v46 = vmov 0.0  }
  0x96   :  { %7459 = vst [vmem:[#allocation24_spill] sm:$0xff] %v5565_v55  ;;  %v5586_v8 = vsub.f32 %v311_v60, %v311_v60  ;;  %vm192_vm13 = vcmp.eq.s32.totalorder %v124_v3, %v5396_v40  ;;  %vm191_vm14 = vcmp.eq.s32.totalorder %v121_v5, %v5396_v40  ;;  %4663 = vmatprep.mubr.f32.mxu0 %v5565_v55  ;;  %7462 = vst [vmem:[#allocation27_spill] sm:$0xff] %v5591_v9 }
  0x97   :  { %7460 = vst [vmem:[#allocation25_spill] sm:$0xff] %v5584_v7  ;;  %v532_v15 = vsub.f32 %v5550_v42, %v5573_v58  ;;  %v5596_v22 = vsel %vm192_vm13, 1.0, %v7251_v43  ;;  %v5599_v23 = vsel %vm191_vm14, 1.0, %v7251_v43  ;;  %v5601_v24 = vand.u32 4294901760, %v522_v6 }
  0x98   :  { %7461 = vst [vmem:[#allocation26_spill] sm:$0xff] %v5586_v8  ;;  %7463 = vst [vmem:[#allocation28_spill] sm:$0xff] %v5596_v22  ;;  %v5604_v25 = vand.u32 4294901760, %v5584_v7  ;;  %4720 = vmatmul.mubr.msk.f32.gmra.mxu1 %vm276_vm0, %v5560_v48  ;;  %v5609_v26 = vand.u32 4294901760, %v5586_v8  ;;  %v314_v30 = vsel %vm276_vm0, %v5599_v23, 0  ;;  %v317_v35 = vsel %vm276_vm0, %v5596_v22, 0 }
  0x99   :  { %7464 = vst [vmem:[#allocation29_spill] sm:$0xff] %v5599_v23  ;;  %7465 = vst [vmem:[#allocation30_spill] sm:$0xff] %v5601_v24  ;;  %v130_v36 = vpop.permute.xlu1 %129  ;;  %4664 = vmatmul.mubr.f32.gmra.mxu0 %v5591_v9  ;;  %4722 = vmatprep.mubr.msk.f32.mxu1 %vm276_vm0, %v5599_v23  ;;  %v127_v37 = vpop.permute.xlu0 %126  ;;  %v5620_v39 = vsub.f32 %v314_v30, %v314_v30  ;;  %v5622_v47 = vsub.f32 %v317_v35, %v317_v35  ;;  %v5627_v59 = vand.u32 4294901760, %v532_v15 }
  0x9a   :  { %7466 = vst [vmem:[#allocation31_spill] sm:$0xff] %v5609_v26  ;;  %v542_v38 = vsub.f32 %v5584_v7, %v5604_v25  ;;  %vm194_vm15 = vcmp.eq.s32.totalorder %v130_v36, %v5396_v40  ;;  %vm193_vm1 = vcmp.eq.s32.totalorder %v127_v37, %v5396_v40  ;;  %4666 = vmatprep.mubr.f32.mxu0 %v5601_v24 }
  0x9b   :  { %7467 = vst [vmem:[#allocation32_spill] sm:$0xff] %v5620_v39  ;;  %7468 = vst [vmem:[#allocation33_spill] sm:$0xff] %v5622_v47  ;;  %v552_v60 = vsub.f32 %v5586_v8, %v5609_v26  ;;  %v5632_v3 = vsel %vm194_vm15, 1.0, %v7251_v43  ;;  %v5635_v5 = vsel %vm193_vm1, 1.0, %v7251_v43  ;;  %v5640_v30 = vand.u32 4294901760, %v5620_v39 }
  0x9c   :  { %7469 = vst [vmem:[#allocation34_spill] sm:$0xff] %v5627_v59  ;;  %7470 = vst [vmem:[#allocation35_spill] sm:$0xff] %v5632_v3  ;;  %v5637_v6 = vand.u32 4294901760, %v542_v38  ;;  %4723 = vmatmul.mubr.msk.f32.gmra.mxu1 %vm276_vm0, %v5596_v22  ;;  %v5645_v15 = vand.u32 4294901760, %v5622_v47  ;;  %v320_v35 = vsel %vm276_vm0, %v5635_v5, 0  ;;  %v323_v36 = vsel %vm276_vm0, %v5632_v3, 0 }
  0x9d   :  { %7471 = vst [vmem:[#allocation36_spill] sm:$0xff] %v5635_v5  ;;  %7473 = vst [vmem:[#allocation38_spill] sm:$0xff] %v5640_v30  ;;  %v136_v37 = vpop.permute.xlu1 %135  ;;  %4667 = vmatmul.mubr.f32.gmra.mxu0 %v5627_v59  ;;  %4725 = vmatprep.mubr.msk.f32.mxu1 %vm276_vm0, %v5635_v5  ;;  %v133_v38 = vpop.permute.xlu0 %132  ;;  %v562_v43 = vsub.f32 %v5620_v39, %v5640_v30  ;;  %v5656_v24 = vsub.f32 %v320_v35, %v320_v35  ;;  %v5663_v55 = vand.u32 4294901760, %v552_v60 }
  0x9e   :  { %7472 = vst [vmem:[#allocation37_spill] sm:$0xff] %v5637_v6  ;;  %7474 = vst [vmem:[#allocation39_spill] sm:$0xff] %v5645_v15  ;;  %v5658_v9 = vsub.f32 %v323_v36, %v323_v36  ;;  %vm196_vm2 = vcmp.eq.s32.totalorder %v136_v37, %v5396_v40  ;;  %vm195_vm3 = vcmp.eq.s32.totalorder %v133_v38, %v5396_v40  ;;  %4669 = vmatprep.mubr.f32.mxu0 %v5637_v6 }
  0x9f   :  { %7475 = vst [vmem:[#allocation40_spill] sm:$0xff] %v5656_v24  ;;  %7477 = vst [vmem:[#allocation42_spill] sm:$0xff] %v5663_v55  ;;  %v572_v59 = vsub.f32 %v5622_v47, %v5645_v15  ;;  %v5668_v33 = vsel %vm196_vm2, 1.0, %v7478_v46  ;;  %v5671_v29 = vsel %vm195_vm3, 1.0, %v7478_v46  ;;  %v5673_v35 = vand.u32 4294901760, %v562_v43 }
  0xa0   :  { %7476 = vst [vmem:[#allocation41_spill] sm:$0xff] %v5658_v9  ;;  %7479 = vst [vmem:[#allocation43_spill] sm:$0xff] %v5668_v33  ;;  %v5676_v36 = vand.u32 4294901760, %v5656_v24  ;;  %4726 = vmatmul.mubr.msk.f32.gmra.mxu1 %vm276_vm0, %v5632_v3  ;;  %v5681_v60 = vand.u32 4294901760, %v5658_v9  ;;  %v326_v37 = vsel %vm276_vm0, %v5671_v29, 0  ;;  %v329_v38 = vsel %vm276_vm0, %v5668_v33, 0 }
  0xa1   :  { %7480 = vst [vmem:[#allocation44_spill] sm:$0xff] %v5671_v29  ;;  %7481 = vst [vmem:[#allocation45_spill] sm:$0xff] %v5673_v35  ;;  %v142_v6 = vpop.permute.xlu1 %141  ;;  %4670 = vmatmul.mubr.f32.gmra.mxu0 %v5663_v55  ;;  %4728 = vmatprep.mubr.msk.f32.mxu1 %vm276_vm0, %v5671_v29  ;;  %v139_v43 = vpop.permute.xlu0 %138  ;;  %v5692_v18 = vsub.f32 %v326_v37, %v326_v37  ;;  %v5694_v1 = vsub.f32 %v329_v38, %v329_v38  ;;  %v5699_v3 = vand.u32 4294901760, %v572_v59 }
  0xa2   :  { %7482 = vst [vmem:[#allocation46_spill] sm:$0xff] %v5676_v36  ;;  %7483 = vst [vmem:[#allocation47_spill] sm:$0xff] %v5681_v60  ;;  %v582_v20 = vsub.f32 %v5656_v24, %v5676_v36  ;;  %vm198_vm4 = vcmp.eq.s32.totalorder %v142_v6, %v5396_v40  ;;  %vm197_vm5 = vcmp.eq.s32.totalorder %v139_v43, %v5396_v40  ;;  %4672 = vmatprep.mubr.f32.mxu0 %v5673_v35 }
  0xa3   :  { %7484 = vst [vmem:[#allocation48_spill] sm:$0xff] %v5692_v18  ;;  %7485 = vst [vmem:[#allocation49_spill] sm:$0xff] %v5694_v1  ;;  %v592_v55 = vsub.f32 %v5658_v9, %v5681_v60  ;;  %v5704_v29 = vsel %vm198_vm4, 1.0, %v7478_v46  ;;  %v5707_v5 = vsel %vm197_vm5, 1.0, %v7478_v46  ;;  %v5712_v38 = vand.u32 4294901760, %v5692_v18 }
  0xa4   :  { %7486 = vst [vmem:[#allocation50_spill] sm:$0xff] %v5699_v3  ;;  %7487 = vst [vmem:[#allocation51_spill] sm:$0xff] %v5704_v29  ;;  %v5709_v37 = vand.u32 4294901760, %v582_v20  ;;  %4729 = vmatmul.mubr.msk.f32.gmra.mxu1 %vm276_vm0, %v5668_v33  ;;  %v5717_v59 = vand.u32 4294901760, %v5694_v1  ;;  %v332_v6 = vsel %vm276_vm0, %v5707_v5, 0  ;;  %v335_v43 = vsel %vm276_vm0, %v5704_v29, 0 }
  0xa5   :  { %7488 = vst [vmem:[#allocation52_spill] sm:$0xff] %v5707_v5  ;;  %7490 = vst [vmem:[#allocation54_spill] sm:$0xff] %v5712_v38  ;;  %v148_v35 = vpop.permute.xlu1 %147  ;;  %4673 = vmatmul.mubr.f32.gmra.mxu0 %v5699_v3  ;;  %4731 = vmatprep.mubr.msk.f32.mxu1 %vm276_vm0, %v5707_v5  ;;  %v145_v20 = vpop.permute.xlu0 %144  ;;  %v602_v22 = vsub.f32 %v5692_v18, %v5712_v38  ;;  %v5728_v33 = vsub.f32 %v332_v6, %v332_v6  ;;  %v5735_v48 = vand.u32 4294901760, %v592_v55 }
  0xa6   :  { %7489 = vst [vmem:[#allocation53_spill] sm:$0xff] %v5709_v37  ;;  %7491 = vst [vmem:[#allocation55_spill] sm:$0xff] %v5717_v59  ;;  %v5730_v23 = vsub.f32 %v335_v43, %v335_v43  ;;  %vm200_vm6 = vcmp.eq.s32.totalorder %v148_v35, %v5396_v40  ;;  %vm199_vm7 = vcmp.eq.s32.totalorder %v145_v20, %v5396_v40  ;;  %4675 = vmatprep.mubr.f32.mxu0 %v5709_v37 }
  0xa7   :  { %7492 = vst [vmem:[#allocation56_spill] sm:$0xff] %v5728_v33  ;;  %7494 = vst [vmem:[#allocation58_spill] sm:$0xff] %v5735_v48  ;;  %v612_v3 = vsub.f32 %v5694_v1, %v5717_v59  ;;  %v5740_v5 = vsel %vm200_vm6, 1.0, %v7478_v46  ;;  %v5743_v49 = vsel %vm199_vm7, 1.0, %v7478_v46  ;;  %v5745_v6 = vand.u32 4294901760, %v602_v22 }
  0xa8   :  { %7493 = vst [vmem:[#allocation57_spill] sm:$0xff] %v5730_v23  ;;  %7495 = vst [vmem:[#allocation59_spill] sm:$0xff] %v5740_v5  ;;  %v5748_v43 = vand.u32 4294901760, %v5728_v33  ;;  %4732 = vmatmul.mubr.msk.f32.gmra.mxu1 %vm276_vm0, %v5704_v29  ;;  %v5753_v55 = vand.u32 4294901760, %v5730_v23  ;;  %v338_v35 = vsel %vm276_vm0, %v5743_v49, 0  ;;  %v341_v20 = vsel %vm276_vm0, %v5740_v5, 0 }
  0xa9   :  { %7496 = vst [vmem:[#allocation60_spill] sm:$0xff] %v5743_v49  ;;  %7497 = vst [vmem:[#allocation61_spill] sm:$0xff] %v5745_v6  ;;  %v154_v37 = vpop.permute.xlu1 %153  ;;  %4676 = vmatmul.mubr.f32.gmra.mxu0 %v5735_v48  ;;  %4734 = vmatprep.mubr.msk.f32.mxu1 %vm276_vm0, %v5743_v49  ;;  %v151_v22 = vpop.permute.xlu0 %150  ;;  %v5764_v29 = vsub.f32 %v338_v35, %v338_v35  ;;  %v5766_v32 = vsub.f32 %v341_v20, %v341_v20  ;;  %v5771_v16 = vand.u32 4294901760, %v612_v3 }
  0xaa   :  { %7498 = vst [vmem:[#allocation62_spill] sm:$0xff] %v5748_v43  ;;  %7499 = vst [vmem:[#allocation63_spill] sm:$0xff] %v5753_v55  ;;  %v622_v31 = vsub.f32 %v5728_v33, %v5748_v43  ;;  %vm202_vm8 = vcmp.eq.s32.totalorder %v154_v37, %v5396_v40  ;;  %vm201_vm9 = vcmp.eq.s32.totalorder %v151_v22, %v5396_v40  ;;  %4678 = vmatprep.mubr.f32.mxu0 %v5745_v6 }
  0xab   :  { %7500 = vst [vmem:[#allocation64_spill] sm:$0xff] %v5764_v29  ;;  %7501 = vst [vmem:[#allocation65_spill] sm:$0xff] %v5766_v32  ;;  %v632_v48 = vsub.f32 %v5730_v23, %v5753_v55  ;;  %v5776_v49 = vsel %vm202_vm8, 1.0, %v7478_v46  ;;  %v5779_v17 = vsel %vm201_vm9, 1.0, %v7478_v46  ;;  %v5784_v20 = vand.u32 4294901760, %v5764_v29 }
  0xac   :  { %7502 = vst [vmem:[#allocation66_spill] sm:$0xff] %v5771_v16  ;;  %7503 = vst [vmem:[#allocation67_spill] sm:$0xff] %v5776_v49  ;;  %v5781_v35 = vand.u32 4294901760, %v622_v31  ;;  %4735 = vmatmul.mubr.msk.f32.gmra.mxu1 %vm276_vm0, %v5740_v5  ;;  %v5789_v3 = vand.u32 4294901760, %v5766_v32  ;;  %v344_v37 = vsel %vm276_vm0, %v5779_v17, 0  ;;  %v347_v22 = vsel %vm276_vm0, %v5776_v49, 0 }
  0xad   :  { %7504 = vst [vmem:[#allocation68_spill] sm:$0xff] %v5779_v17  ;;  %7506 = vst [vmem:[#allocation70_spill] sm:$0xff] %v5784_v20  ;;  %v160_v6 = vpop.permute.xlu1 %159  ;;  %4679 = vmatmul.mubr.f32.gmra.mxu0 %v5771_v16  ;;  %4737 = vmatprep.mubr.msk.f32.mxu1 %vm276_vm0, %v5779_v17  ;;  %v157_v31 = vpop.permute.xlu0 %156  ;;  %v642_v63 = vsub.f32 %v5764_v29, %v5784_v20  ;;  %v5800_v5 = vsub.f32 %v344_v37, %v344_v37  ;;  %v5810_v16 = vand.u32 4294901760, %v632_v48 }
  0xae   :  { %7505 = vst [vmem:[#allocation69_spill] sm:$0xff] %v5781_v35  ;;  %7507 = vst [vmem:[#allocation71_spill] sm:$0xff] %v5789_v3  ;;  %v5802_v0 = vsub.f32 %v347_v22, %v347_v22  ;;  %vm204_vm10 = vcmp.eq.s32.totalorder %v160_v6, %v5396_v40  ;;  %vm203_vm11 = vcmp.eq.s32.totalorder %v157_v31, %v5396_v40  ;;  %4681 = vmatprep.mubr.f32.mxu0 %v5781_v35 }
  0xaf   :  { %7508 = vst [vmem:[#allocation72_spill] sm:$0xff] %v5800_v5  ;;  %7510 = vst [vmem:[#allocation74_spill] sm:$0xff] %v5810_v16  ;;  %v652_v17 = vsub.f32 %v5766_v32, %v5789_v3  ;;  %v5815_v37 = vsel %vm204_vm10, 1.0, %v7478_v46  ;;  %v5818_v22 = vsel %vm203_vm11, 1.0, %v7478_v46  ;;  %v5820_v44 = vand.u32 4294901760, %v642_v63 }
  0xb0   :  { %7509 = vst [vmem:[#allocation73_spill] sm:$0xff] %v5802_v0  ;;  %7511 = vst [vmem:[#allocation75_spill] sm:$0xff] %v5815_v37  ;;  %v5823_v53 = vand.u32 4294901760, %v5800_v5  ;;  %4738 = vmatmul.mubr.msk.f32.gmra.mxu1 %vm276_vm0, %v5776_v49  ;;  %v5828_v48 = vand.u32 4294901760, %v5802_v0  ;;  %v350_v6 = vsel %vm276_vm0, %v5818_v22, 0  ;;  %v353_v31 = vsel %vm276_vm0, %v5815_v37, 0 }
  0xb1   :  { %7512 = vst [vmem:[#allocation76_spill] sm:$0xff] %v5818_v22  ;;  %7513 = vst [vmem:[#allocation77_spill] sm:$0xff] %v5820_v44  ;;  %v5834_v35 = vand.u32 4294901760, %v2152_v52  ;;  %v166_v45 = vpop.permute.xlu1 %165  ;;  %4682 = vmatmul.mubr.f32.gmra.mxu0 %v5810_v16  ;;  %4740 = vmatprep.mubr.msk.f32.mxu1 %vm276_vm0, %v5818_v22  ;;  %v163_v63 = vpop.permute.xlu0 %162  ;;  %v5841_v32 = vsub.f32 %v350_v6, %v350_v6  ;;  %v5843_v29 = vsub.f32 %v353_v31, %v353_v31 }
  0xb2   :  { %7514 = vst [vmem:[#allocation78_spill] sm:$0xff] %v5823_v53  ;;  %7515 = vst [vmem:[#allocation79_spill] sm:$0xff] %v5828_v48  ;;  %v662_v49 = vsub.f32 %v5800_v5, %v5823_v53  ;;  %vm206_vm12 = vcmp.eq.s32.totalorder %v166_v45, %v5396_v40  ;;  %vm205_vm13 = vcmp.eq.s32.totalorder %v163_v63, %v5396_v40  ;;  %4684 = vmatprep.mubr.f32.mxu0 %v5820_v44 }
  0xb3   :  { %7516 = vst [vmem:[#allocation80_spill] sm:$0xff] %v5841_v32  ;;  %7517 = vst [vmem:[#allocation81_spill] sm:$0xff] %v5843_v29  ;;  %v5848_v23 = vand.u32 4294901760, %v652_v17  ;;  %v672_v16 = vsub.f32 %v5802_v0, %v5828_v48  ;;  %v5853_v22 = vsel %vm206_vm12, 1.0, %v7478_v46  ;;  %v5856_v5 = vsel %vm205_vm13, 1.0, %v7478_v46 }
  0xb4   :  { %7519 = vst [vmem:[#allocation83_spill] sm:$0xff] %v5853_v22  ;;  %7520 = vst [vmem:[#allocation84_spill] sm:$0xff] %v5856_v5  ;;  %v5858_v6 = vand.u32 4294901760, %v662_v49  ;;  %v5861_v31 = vand.u32 4294901760, %v5841_v32  ;;  %4741 = vmatmul.mubr.msk.f32.gmra.mxu1 %vm276_vm0, %v5815_v37  ;;  %v5866_v45 = vand.u32 4294901760, %v5843_v29  ;;  %v356_v17 = vsel %vm276_vm0, %v5856_v5, 0 }
  0xb5   :  { %7518 = vst [vmem:[#allocation82_spill] sm:$0xff] %v5848_v23  ;;  %v359_v63 = vsel %vm276_vm0, %v5853_v22, 0  ;;  %v5873_v44 = vsub.f32 %v2152_v52, %v5834_v35  ;;  %v172_v49 = vpop.permute.xlu1 %171  ;;  %4685 = vmatmul.mubr.f32.gmra.mxu0 %v5848_v23  ;;  %4743 = vmatprep.mubr.msk.f32.mxu1 %vm276_vm0, %v5856_v5  ;;  %v169_v0 = vpop.permute.xlu0 %168  ;;  %v5880_v48 = vsub.f32 %v356_v17, %v356_v17  ;;  %v5887_v52 = vand.u32 4294901760, %v672_v16 }
  0xb6   :  { %7521 = vst [vmem:[#allocation85_spill] sm:$0xff] %v5858_v6  ;;  %7522 = vst [vmem:[#allocation86_spill] sm:$0xff] %v5861_v31  ;;  %v682_v37 = vsub.f32 %v5841_v32, %v5861_v31  ;;  %v5882_v33 = vsub.f32 %v359_v63, %v359_v63  ;;  %vm208_vm14 = vcmp.eq.s32.totalorder %v172_v49, %v5396_v40  ;;  %4687 = vmatprep.mubr.f32.mxu0 %v5858_v6 }
  0xb7   :  { %7523 = vst [vmem:[#allocation87_spill] sm:$0xff] %v5866_v45  ;;  %7524 = vst [vmem:[#allocation88_spill] sm:$0xff] %v5880_v48  ;;  %vm207_vm15 = vcmp.eq.s32.totalorder %v169_v0, %v5396_v40  ;;  %v692_v23 = vsub.f32 %v5843_v29, %v5866_v45  ;;  %v5892_v5 = vsel %vm208_vm14, 1.0, %v7478_v46  ;;  %v5900_v63 = vand.u32 4294901760, %v5880_v48 }
  0xb8   :  { %7525 = vst [vmem:[#allocation89_spill] sm:$0xff] %v5882_v33  ;;  %7526 = vst [vmem:[#allocation90_spill] sm:$0xff] %v5887_v52  ;;  %v5895_v32 = vsel %vm207_vm15, 1.0, %v7478_v46  ;;  %v5897_v17 = vand.u32 4294901760, %v682_v37  ;;  %4744 = vmatmul.mubr.msk.f32.gmra.mxu1 %vm276_vm0, %v5853_v22  ;;  %v5905_v0 = vand.u32 4294901760, %v5882_v33  ;;  %v365_v49 = vsel %vm276_vm0, %v5892_v5, 0 }
  0xb9   :  { %7527 = vst [vmem:[#allocation91_spill] sm:$0xff] %v5892_v5  ;;  %7528 = vst [vmem:[#allocation92_spill] sm:$0xff] %v5895_v32  ;;  %v362_v16 = vsel %vm276_vm0, %v5895_v32, 0  ;;  %v178_v6 = vpop.permute.xlu1 %177  ;;  %4688 = vmatmul.mubr.f32.gmra.mxu0 %v5887_v52  ;;  %4746 = vmatprep.mubr.msk.f32.mxu1 %vm276_vm0, %v5895_v32  ;;  %v175_v37 = vpop.permute.xlu0 %174  ;;  %v702_v29 = vsub.f32 %v5880_v48, %v5900_v63  ;;  %v5918_v45 = vsub.f32 %v365_v49, %v365_v49 }
  0xba   :  { %7529 = vst [vmem:[#allocation93_spill] sm:$0xff] %v5897_v17  ;;  %7530 = vst [vmem:[#allocation94_spill] sm:$0xff] %v5900_v63  ;;  %v5916_v22 = vsub.f32 %v362_v16, %v362_v16  ;;  %v5921_v31 = vand.u32 4294901760, %v5873_v44  ;;  %vm210_vm1 = vcmp.eq.s32.totalorder %v178_v6, %v5396_v40  ;;  %vm209_vm2 = vcmp.eq.s32.totalorder %v175_v37, %v5396_v40 }
  0xbb   :  { %7531 = vst [vmem:[#allocation95_spill] sm:$0xff] %v5905_v0  ;;  %7533 = vst [vmem:[#allocation97_spill] sm:$0xff] %v5918_v45  ;;  %4690 = vmatprep.mubr.f32.mxu0 %v5897_v17  ;;  %v5926_v52 = vand.u32 4294901760, %v692_v23  ;;  %v712_v32 = vsub.f32 %v5882_v33, %v5905_v0  ;;  %v5931_v48 = vsel %vm210_vm1, 1.0, %v7478_v46  ;;  %v5934_v16 = vsel %vm209_vm2, 1.0, %v7478_v46 }
  0xbc   :  { %7532 = vst [vmem:[#allocation96_spill] sm:$0xff] %v5916_v22  ;;  %7534 = vst [vmem:[#allocation98_spill] sm:$0xff] %v5921_v31  ;;  %v5936_v49 = vand.u32 4294901760, %v702_v29  ;;  %v5939_v63 = vand.u32 4294901760, %v5916_v22  ;;  %4747 = vmatmul.mubr.msk.f32.gmra.mxu1 %vm276_vm0, %v5892_v5  ;;  %v5944_v40 = vand.u32 4294901760, %v5918_v45  ;;  %v368_v23 = vsel %vm276_vm0, %v5934_v16, 0 }
  0xbd   :  { %7535 = vst [vmem:[#allocation99_spill] sm:$0xff] %v5926_v52  ;;  %7536 = vst [vmem:[#allocation100_spill] sm:$0xff] %v5934_v16  ;;  %v371_v6 = vsel %vm276_vm0, %v5931_v48, 0  ;;  %4691 = vmatmul.mubr.f32.gmra.mxu0 %v5926_v52  ;;  %4749 = vmatprep.mubr.msk.f32.mxu1 %vm276_vm0, %v5934_v16  ;;  %v5955_v46 = vsub.f32 %v368_v23, %v368_v23  ;;  %v5960_v17 = vand.u32 4294901760, %v712_v32 }
  0xbe   :  { %7537 = vst [vmem:[#allocation101_spill] sm:$0xff] %v5936_v49  ;;  %7538 = vst [vmem:[#allocation102_spill] sm:$0xff] %v5939_v63  ;;  %v722_v29 = vsub.f32 %v5916_v22, %v5939_v63  ;;  %v5957_v37 = vsub.f32 %v371_v6, %v371_v6  ;;  %4693 = vmatprep.mubr.f32.mxu0 %v5936_v49  ;;  %v2573_v5 = vsub.f32 %v5873_v44, %v5921_v31 }
  0xbf   :  { %7539 = vst [vmem:[#allocation103_spill] sm:$0xff] %v5944_v40  ;;  %7540 = vst [vmem:[#allocation104_spill] sm:$0xff] %v5955_v46  ;;  %v732_v52 = vsub.f32 %v5918_v45, %v5944_v40  ;;  %v5969_v16 = vand.u32 4294901760, %v5955_v46 }
  0xc0   :  { %7541 = vst [vmem:[#allocation105_spill] sm:$0xff] %v5957_v37  ;;  %v5964_v33 = vand.u32 4294901760, %v722_v29  ;;  %v5972_v23 = vand.u32 4294901760, %v5957_v37  ;;  %4750 = vmatmul.mubr.msk.f32.gmra.mxu1 %vm276_vm0, %v5931_v48  ;;  %v5987_v31 = vand.u32 4294901760, %v2573_v5  ;;  %v7547_v5 = vld [vmem:[#allocation57_spill] sm:$0xff] }
  0xc1   :  { %7543 = vst [vmem:[#allocation107_spill] sm:$0xff] %v5969_v16  ;;  %4694 = vmatmul.mubr.f32.gmra.mxu0 %v5960_v17  ;;  %4804 = vmatprep.mubr.f32.mxu1 %v5425_v54  ;;  %v742_v32 = vsub.f32 %v5955_v46, %v5969_v16  ;;  %v5981_v6 = vand.u32 4294901760, %v732_v52  ;;  %v7548_v52 = vld [vmem:[#allocation86_spill] sm:$0xff] }
  0xc2   :  { %7542 = vst [vmem:[#allocation106_spill] sm:$0xff] %v5964_v33  ;;  %7544 = vst [vmem:[#allocation108_spill] sm:$0xff] %v5972_v23  ;;  %4696 = vmatprep.mubr.f32.mxu0 %v5964_v33  ;;  %v752_v49 = vsub.f32 %v5957_v37, %v5972_v23 }
  0xc3   :  { %v5983_v29 = vand.u32 4294901760, %v742_v32  ;;  %v7550_v32 = vld [vmem:[#allocation87_spill] sm:$0xff] }
  0xc4   :  { %4805 = vmatmul.mubr.f32.vlgmr.msra.gmra.mxu1 %v5457_v2  ;;  %v5994_v33 = vand.u32 4294901760, %v752_v49  ;;  %v7549_v49 = vld [vmem:[#allocation64_spill] sm:$0xff] }
  0xc5   :  { %4697 = vmatmul.mubr.f32.gmra.mxu0 %v5981_v6  ;;  %4807 = vmatprep.mubr.f32.mxu1 %v5432_v56 }
  0xc6   :  { %4699 = vmatprep.mubr.f32.mxu0 %v5983_v29  ;;  %4903 = vmatpush3.msra.mxu1 %v5310_v10  ;;  %v7545_v10 = vld [vmem:[#allocation56_spill] sm:$0xff] }
  0xc7   :  { %5002 = vmatprep.subr.mxu1 %v5987_v31 }
  0xc8   :  { %4808 = vmatmul.mubr.f32.gmra.mxu1 %v5464_v4 }
  0xc9   :  { %4700 = vmatmul.mubr.f32.gmra.mxu0 %v5994_v33  ;;  %4810 = vmatprep.mubr.f32.mxu1 %v5492_v19 }
  0xca   :  { %4754 = vmatprep.mubr.f32.mxu0 %v5412_v50 }
  0xcc   :  { %4811 = vmatmul.mubr.f32.gmra.mxu1 %v5499_v21 }
  0xcd   :  { %4755 = vmatmul.mubr.f32.vlgmr.msra.gmra.mxu0 %v5440_v61  ;;  %4813 = vmatprep.mubr.f32.mxu1 %v5531_v34 }
  0xce   :  { %4853 = vmatpush3.msra.mxu0 %v5323_v14  ;;  %4757 = vmatprep.mubr.f32.mxu0 %v5414_v51  ;;  %v7546_v14 = vld [vmem:[#allocation79_spill] sm:$0xff] }
  0xcf   :  { %4952 = vmatprep.subr.mxu0 %v5834_v35 }
  0xd0   :  { %4814 = vmatmul.mubr.f32.gmra.mxu1 %v5537_v11 }
  0xd1   :  { %4758 = vmatmul.mubr.f32.gmra.mxu0 %v5445_v62  ;;  %4816 = vmatprep.mubr.f32.mxu1 %v5568_v57 }
  0xd2   :  { %4760 = vmatprep.mubr.f32.mxu0 %v5475_v12 }
  0xd4   :  { %4817 = vmatmul.mubr.f32.gmra.mxu1 %v5573_v58 }
  0xd5   :  { %4761 = vmatmul.mubr.f32.gmra.mxu0 %v5477_v13  ;;  %4819 = vmatprep.mubr.f32.mxu1 %v5604_v25 }
  0xd6   :  { %4763 = vmatprep.mubr.f32.mxu0 %v5510_v27 }
  0xd8   :  { %4820 = vmatmul.mubr.f32.gmra.mxu1 %v5609_v26  ;;  %v7593_v26 = vld [vmem:[#allocation98_spill] sm:$0xff] }
  0xd9   :  { %4764 = vmatmul.mubr.f32.gmra.mxu0 %v5512_v28  ;;  %4822 = vmatprep.mubr.f32.mxu1 %v5640_v30  ;;  %v7592_v28 = vld [vmem:[#allocation12_spill] sm:$0xff] }
  0xda   :  { %4766 = vmatprep.mubr.f32.mxu0 %v5548_v41  ;;  %v7591_v41 = vld [vmem:[#allocation11_spill] sm:$0xff] }
  0xdc   :  { %4823 = vmatmul.mubr.f32.gmra.mxu1 %v5645_v15 }
  0xdd   :  { %4767 = vmatmul.mubr.f32.gmra.mxu0 %v5550_v42  ;;  %4825 = vmatprep.mubr.f32.mxu1 %v5676_v36 }
  0xde   :  { %4769 = vmatprep.mubr.f32.mxu0 %v5584_v7 }
  0xe0   :  { %4826 = vmatmul.mubr.f32.gmra.mxu1 %v5681_v60  ;;  %v7589_v60 = vld [vmem:[#allocation100_spill] sm:$0xff] }
  0xe1   :  { %4770 = vmatmul.mubr.f32.gmra.mxu0 %v5586_v8  ;;  %4828 = vmatprep.mubr.f32.mxu1 %v5712_v38  ;;  %v7587_v38 = vld [vmem:[#allocation92_spill] sm:$0xff]  ;;  %v7588_v8 = vld [vmem:[#allocation91_spill] sm:$0xff] }
  0xe2   :  { %4772 = vmatprep.mubr.f32.mxu0 %v5620_v39  ;;  %v7586_v39 = vld [vmem:[#allocation83_spill] sm:$0xff] }
  0xe4   :  { %4829 = vmatmul.mubr.f32.gmra.mxu1 %v5717_v59  ;;  %v7585_v59 = vld [vmem:[#allocation84_spill] sm:$0xff] }
  0xe5   :  { %4773 = vmatmul.mubr.f32.gmra.mxu0 %v5622_v47  ;;  %4831 = vmatprep.mubr.f32.mxu1 %v5748_v43  ;;  %v7583_v43 = vld [vmem:[#allocation76_spill] sm:$0xff]  ;;  %v7584_v47 = vld [vmem:[#allocation75_spill] sm:$0xff] }
  0xe6   :  { %4775 = vmatprep.mubr.f32.mxu0 %v5656_v24  ;;  %v7582_v24 = vld [vmem:[#allocation67_spill] sm:$0xff] }
  0xe8   :  { %4832 = vmatmul.mubr.f32.gmra.mxu1 %v5753_v55  ;;  %v7581_v55 = vld [vmem:[#allocation68_spill] sm:$0xff] }
  0xe9   :  { %4776 = vmatmul.mubr.f32.gmra.mxu0 %v5658_v9  ;;  %4834 = vmatprep.mubr.f32.mxu1 %v5784_v20  ;;  %v7551_v20 = vld [vmem:[#allocation65_spill] sm:$0xff]  ;;  %v7580_v9 = vld [vmem:[#allocation59_spill] sm:$0xff] }
  0xea   :  { %4778 = vmatprep.mubr.f32.mxu0 %v5692_v18  ;;  %v7552_v18 = vld [vmem:[#allocation94_spill] sm:$0xff] }
  0xec   :  { %4835 = vmatmul.mubr.f32.gmra.mxu1 %v5789_v3  ;;  %v7553_v3 = vld [vmem:[#allocation72_spill] sm:$0xff] }
  0xed   :  { %4779 = vmatmul.mubr.f32.gmra.mxu0 %v5694_v1  ;;  %4837 = vmatprep.mubr.f32.mxu1 %v5823_v53  ;;  %v7554_v53 = vld [vmem:[#allocation73_spill] sm:$0xff]  ;;  %v7579_v1 = vld [vmem:[#allocation60_spill] sm:$0xff] }
  0xee   :  { %4781 = vmatprep.mubr.f32.mxu0 %v7545_v10  ;;  %v7578_v10 = vld [vmem:[#allocation51_spill] sm:$0xff] }
  0xf0   :  { %4838 = vmatmul.mubr.f32.gmra.mxu1 %v7546_v14  ;;  %v7555_v14 = vld [vmem:[#allocation80_spill] sm:$0xff] }
  0xf1   :  { %4782 = vmatmul.mubr.f32.gmra.mxu0 %v7547_v5  ;;  %4840 = vmatprep.mubr.f32.mxu1 %v7548_v52  ;;  %v7556_v52 = vld [vmem:[#allocation81_spill] sm:$0xff]  ;;  %v7577_v5 = vld [vmem:[#allocation52_spill] sm:$0xff] }
  0xf2   :  { %4784 = vmatprep.mubr.f32.mxu0 %v7549_v49  ;;  %v7576_v49 = vld [vmem:[#allocation43_spill] sm:$0xff] }
  0xf4   :  { %4841 = vmatmul.mubr.f32.gmra.mxu1 %v7550_v32  ;;  %v7557_v32 = vld [vmem:[#allocation88_spill] sm:$0xff] }
  0xf5   :  { %4785 = vmatmul.mubr.f32.gmra.mxu0 %v7551_v20  ;;  %4843 = vmatprep.mubr.f32.mxu1 %v7552_v18  ;;  %v7558_v18 = vld [vmem:[#allocation89_spill] sm:$0xff]  ;;  %v7575_v20 = vld [vmem:[#allocation44_spill] sm:$0xff] }
  0xf6   :  { %4787 = vmatprep.mubr.f32.mxu0 %v7553_v3  ;;  %v7559_v3 = vld [vmem:[#allocation3_spill] sm:$0xff] }
  0xf8   :  { %4844 = vmatmul.mubr.f32.gmra.mxu1 %v5905_v0  ;;  %v7574_v0 = vld [vmem:[#allocation35_spill] sm:$0xff] }
  0xf9   :  { %4788 = vmatmul.mubr.f32.gmra.mxu0 %v7554_v53  ;;  %4846 = vmatprep.mubr.f32.mxu1 %v5939_v63  ;;  %v7560_v63 = vld [vmem:[#allocation5_spill] sm:$0xff]  ;;  %v7573_v53 = vld [vmem:[#allocation36_spill] sm:$0xff] }
  0xfa   :  { %4790 = vmatprep.mubr.f32.mxu0 %v7555_v14  ;;  %v7572_v14 = vld [vmem:[#allocation28_spill] sm:$0xff] }
  0xfc   :  { %4847 = vmatmul.mubr.f32.gmra.mxu1 %v5944_v40  ;;  %v7561_v40 = vld [vmem:[#allocation2_spill] sm:$0xff] }
  0xfd   :  { %4791 = vmatmul.mubr.f32.gmra.mxu0 %v7556_v52  ;;  %4849 = vmatprep.mubr.f32.mxu1 %v5969_v16  ;;  %v7570_v16 = vld [vmem:[#allocation22_spill] sm:$0xff]  ;;  %v7571_v52 = vld [vmem:[#allocation29_spill] sm:$0xff] }
  0xfe   :  { %4793 = vmatprep.mubr.f32.mxu0 %v7557_v32  ;;  %v7569_v32 = vld [vmem:[#allocation23_spill] sm:$0xff] }
 0x100   :  { %4850 = vmatmul.mubr.f32.gmra.mxu1 %v5972_v23  ;;  %v7568_v23 = vld [vmem:[#allocation16_spill] sm:$0xff] }
 0x101   :  { %4794 = vmatmul.mubr.f32.gmra.mxu0 %v7558_v18  ;;  %4904 = vmatprep.mubr.msk.f32.mxu1 %vm276_vm0, %v7559_v3  ;;  %v7562_v18 = vld [vmem:[#allocation4_spill] sm:$0xff] }
 0x102   :  { %4796 = vmatprep.mubr.f32.mxu0 %v5916_v22  ;;  %v7563_v22 = vld [vmem:[#allocation7_spill] sm:$0xff] }
 0x104   :  { %4905 = vmatmul.mubr.msk.f32.vlgmr.msra.gmra.mxu1 %vm276_vm0, %v7560_v63 }
 0x105   :  { %4797 = vmatmul.mubr.f32.gmra.mxu0 %v5918_v45  ;;  %4907 = vmatprep.mubr.msk.f32.mxu1 %vm276_vm0, %v7561_v40  ;;  %v7564_v45 = vld [vmem:[#allocation6_spill] sm:$0xff] }
 0x106   :  { %4799 = vmatprep.mubr.f32.mxu0 %v5955_v46  ;;  %5003 = vmatpush3.msra.mxu1 %v5987_v31  ;;  %v7565_v31 = vld [vmem:[#allocation10_spill] sm:$0xff]  ;;  %v7567_v46 = vld [vmem:[#allocation17_spill] sm:$0xff] }
 0x107   :  { %5102 = vmatprep.subr.mxu1 %v5834_v35 }
 0x108   :  { %4908 = vmatmul.mubr.msk.f32.gmra.mxu1 %vm276_vm0, %v7562_v18 }
 0x109   :  { %4800 = vmatmul.mubr.f32.gmra.mxu0 %v5957_v37  ;;  %4910 = vmatprep.mubr.msk.f32.mxu1 %vm276_vm0, %v7563_v22  ;;  %v7566_v37 = vld [vmem:[#allocation9_spill] sm:$0xff] }
 0x10a   :  { %4854 = vmatprep.mubr.msk.f32.mxu0 %vm276_vm0, %v7559_v3 }
 0x10c   :  { %4911 = vmatmul.mubr.msk.f32.gmra.mxu1 %vm276_vm0, %v7564_v45 }
 0x10d   :  { %4855 = vmatmul.mubr.msk.f32.vlgmr.msra.gmra.mxu0 %vm276_vm0, %v7560_v63  ;;  %4913 = vmatprep.mubr.msk.f32.mxu1 %vm276_vm0, %v7565_v31 }
 0x10e   :  { %4953 = vmatpush3.msra.mxu0 %v5834_v35  ;;  %4857 = vmatprep.mubr.msk.f32.mxu0 %vm276_vm0, %v7561_v40 }
 0x10f   :  { %5052 = vmatprep.subr.mxu0 %v5873_v44 }
 0x110   :  { %4914 = vmatmul.mubr.msk.f32.gmra.mxu1 %vm276_vm0, %v7566_v37 }
 0x111   :  { %4858 = vmatmul.mubr.msk.f32.gmra.mxu0 %vm276_vm0, %v7562_v18  ;;  %4916 = vmatprep.mubr.msk.f32.mxu1 %vm276_vm0, %v7567_v46 }
 0x112   :  { %4860 = vmatprep.mubr.msk.f32.mxu0 %vm276_vm0, %v7563_v22 }
 0x114   :  { %4917 = vmatmul.mubr.msk.f32.gmra.mxu1 %vm276_vm0, %v7568_v23 }
 0x115   :  { %4861 = vmatmul.mubr.msk.f32.gmra.mxu0 %vm276_vm0, %v7564_v45  ;;  %4919 = vmatprep.mubr.msk.f32.mxu1 %vm276_vm0, %v7569_v32 }
 0x116   :  { %4863 = vmatprep.mubr.msk.f32.mxu0 %vm276_vm0, %v7565_v31 }
 0x118   :  { %4920 = vmatmul.mubr.msk.f32.gmra.mxu1 %vm276_vm0, %v7570_v16 }
 0x119   :  { %4864 = vmatmul.mubr.msk.f32.gmra.mxu0 %vm276_vm0, %v7566_v37  ;;  %4922 = vmatprep.mubr.msk.f32.mxu1 %vm276_vm0, %v7571_v52 }
 0x11a   :  { %4866 = vmatprep.mubr.msk.f32.mxu0 %vm276_vm0, %v7567_v46 }
 0x11c   :  { %4923 = vmatmul.mubr.msk.f32.gmra.mxu1 %vm276_vm0, %v7572_v14 }
 0x11d   :  { %4867 = vmatmul.mubr.msk.f32.gmra.mxu0 %vm276_vm0, %v7568_v23  ;;  %4925 = vmatprep.mubr.msk.f32.mxu1 %vm276_vm0, %v7573_v53 }
 0x11e   :  { %4869 = vmatprep.mubr.msk.f32.mxu0 %vm276_vm0, %v7569_v32 }
 0x120   :  { %4926 = vmatmul.mubr.msk.f32.gmra.mxu1 %vm276_vm0, %v7574_v0 }
 0x121   :  { %4870 = vmatmul.mubr.msk.f32.gmra.mxu0 %vm276_vm0, %v7570_v16  ;;  %4928 = vmatprep.mubr.msk.f32.mxu1 %vm276_vm0, %v7575_v20 }
 0x122   :  { %4872 = vmatprep.mubr.msk.f32.mxu0 %vm276_vm0, %v7571_v52 }
 0x124   :  { %4929 = vmatmul.mubr.msk.f32.gmra.mxu1 %vm276_vm0, %v7576_v49 }
 0x125   :  { %4873 = vmatmul.mubr.msk.f32.gmra.mxu0 %vm276_vm0, %v7572_v14  ;;  %4931 = vmatprep.mubr.msk.f32.mxu1 %vm276_vm0, %v7577_v5 }
 0x126   :  { %4875 = vmatprep.mubr.msk.f32.mxu0 %vm276_vm0, %v7573_v53 }
 0x128   :  { %4932 = vmatmul.mubr.msk.f32.gmra.mxu1 %vm276_vm0, %v7578_v10 }
 0x129   :  { %4876 = vmatmul.mubr.msk.f32.gmra.mxu0 %vm276_vm0, %v7574_v0  ;;  %4934 = vmatprep.mubr.msk.f32.mxu1 %vm276_vm0, %v7579_v1 }
 0x12a   :  { %4878 = vmatprep.mubr.msk.f32.mxu0 %vm276_vm0, %v7575_v20 }
 0x12c   :  { %4935 = vmatmul.mubr.msk.f32.gmra.mxu1 %vm276_vm0, %v7580_v9 }
 0x12d   :  { %4879 = vmatmul.mubr.msk.f32.gmra.mxu0 %vm276_vm0, %v7576_v49  ;;  %4937 = vmatprep.mubr.msk.f32.mxu1 %vm276_vm0, %v7581_v55 }
 0x12e   :  { %4881 = vmatprep.mubr.msk.f32.mxu0 %vm276_vm0, %v7577_v5 }
 0x130   :  { %4938 = vmatmul.mubr.msk.f32.gmra.mxu1 %vm276_vm0, %v7582_v24 }
 0x131   :  { %4882 = vmatmul.mubr.msk.f32.gmra.mxu0 %vm276_vm0, %v7578_v10  ;;  %4940 = vmatprep.mubr.msk.f32.mxu1 %vm276_vm0, %v7583_v43 }
 0x132   :  { %4884 = vmatprep.mubr.msk.f32.mxu0 %vm276_vm0, %v7579_v1 }
 0x134   :  { %4941 = vmatmul.mubr.msk.f32.gmra.mxu1 %vm276_vm0, %v7584_v47 }
 0x135   :  { %4885 = vmatmul.mubr.msk.f32.gmra.mxu0 %vm276_vm0, %v7580_v9  ;;  %4943 = vmatprep.mubr.msk.f32.mxu1 %vm276_vm0, %v7585_v59 }
 0x136   :  { %4887 = vmatprep.mubr.msk.f32.mxu0 %vm276_vm0, %v7581_v55 }
 0x138   :  { %4944 = vmatmul.mubr.msk.f32.gmra.mxu1 %vm276_vm0, %v7586_v39 }
 0x139   :  { %4888 = vmatmul.mubr.msk.f32.gmra.mxu0 %vm276_vm0, %v7582_v24  ;;  %4946 = vmatprep.mubr.msk.f32.mxu1 %vm276_vm0, %v7587_v38 }
 0x13a   :  { %4890 = vmatprep.mubr.msk.f32.mxu0 %vm276_vm0, %v7583_v43 }
 0x13c   :  { %4947 = vmatmul.mubr.msk.f32.gmra.mxu1 %vm276_vm0, %v7588_v8 }
 0x13d   :  { %4891 = vmatmul.mubr.msk.f32.gmra.mxu0 %vm276_vm0, %v7584_v47  ;;  %4949 = vmatprep.mubr.msk.f32.mxu1 %vm276_vm0, %v7589_v60 }
 0x13e   :  { %4893 = vmatprep.mubr.msk.f32.mxu0 %vm276_vm0, %v7585_v59 }
 0x140   :  { %4950 = vmatmul.mubr.msk.f32.gmra.mxu1 %vm276_vm0, %v5931_v48 }
 0x141   :  { %4894 = vmatmul.mubr.msk.f32.gmra.mxu0 %vm276_vm0, %v7586_v39  ;;  %5004 = vmatprep.mubr.msk.f32.mxu1 %vm276_vm0, %v7559_v3 }
 0x142   :  { %4896 = vmatprep.mubr.msk.f32.mxu0 %vm276_vm0, %v7587_v38 }
 0x144   :  { %v4706_v7 = vpop.f32.mrf.mxu1  ;;  %5005 = vmatmul.mubr.msk.f32.vlgmr.msra.gmra.mxu1 %vm276_vm0, %v7560_v63 }
 0x145   :  { %4897 = vmatmul.mubr.msk.f32.gmra.mxu0 %vm276_vm0, %v7588_v8  ;;  %5007 = vmatprep.mubr.msk.f32.mxu1 %vm276_vm0, %v7561_v40  ;;  %v7590_v40 = vld [vmem:[#allocation8_spill] sm:$0xff] }
 0x146   :  { %v831_v36 = vpop.f32.mrf.mxu1  ;;  %4899 = vmatprep.mubr.msk.f32.mxu0 %vm276_vm0, %v7589_v60  ;;  %5103 = vmatpush3.msra.mxu1 %v5834_v35 }
 0x147   :  { %5202 = vmatprep.subr.mxu1 %v5834_v35 }
 0x148   :  { %v4709_v3 = vpop.f32.mrf.mxu1  ;;  %5008 = vmatmul.mubr.msk.f32.gmra.mxu1 %vm276_vm0, %v7562_v18 }
 0x149   :  { %4900 = vmatmul.mubr.msk.f32.gmra.mxu0 %vm276_vm0, %v5931_v48  ;;  %5010 = vmatprep.mubr.msk.f32.mxu1 %vm276_vm0, %v7563_v22 }
 0x14a   :  { %v843_v63 = vpop.f32.mrf.mxu1  ;;  %4954 = vmatprep.mubr.f32.mxu0 %v7590_v40 }
 0x14c   :  { %v4712_v42 = vpop.f32.mrf.mxu1  ;;  %5011 = vmatmul.mubr.msk.f32.gmra.mxu1 %vm276_vm0, %v7564_v45  ;;  %v7594_v45 = vld [vmem:[#allocation15_spill] sm:$0xff] }
 0x14d   :  { %v4656_v15 = vpop.f32.mrf.mxu0  ;;  %4955 = vmatmul.mubr.f32.vlgmr.msra.gmra.mxu0 %v7591_v41  ;;  %5013 = vmatprep.mubr.msk.f32.mxu1 %vm276_vm0, %v7565_v31 }
 0x14e   :  { %v6211_v18 = vadd.f32 %v4706_v7, %v4656_v15  ;;  %5053 = vmatpush3.msra.mxu0 %v5873_v44  ;;  %v855_v30 = vpop.f32.mrf.mxu1  ;;  %4957 = vmatprep.mubr.f32.mxu0 %v7592_v28  ;;  %v7595_v15 = vld [vmem:[#allocation18_spill] sm:$0xff] }
 0x14f   :  { %v445_v22 = vpop.f32.mrf.mxu0  ;;  %5152 = vmatprep.subr.mxu0 %v7593_v26 }
 0x150   :  { %v6216_v40 = vadd.f32 %v831_v36, %v445_v22  ;;  %v4715_v27 = vpop.f32.mrf.mxu1  ;;  %5014 = vmatmul.mubr.msk.f32.gmra.mxu1 %vm276_vm0, %v7566_v37  ;;  %v7596_v37 = vld [vmem:[#allocation21_spill] sm:$0xff] }
 0x151   :  { %v4659_v41 = vpop.f32.mrf.mxu0  ;;  %4958 = vmatmul.mubr.f32.gmra.mxu0 %v7594_v45  ;;  %5016 = vmatprep.mubr.msk.f32.mxu1 %vm276_vm0, %v7567_v46 }
 0x152   :  { %v6223_v7 = vadd.f32 %v4709_v3, %v4659_v41  ;;  %v867_v44 = vpop.f32.mrf.mxu1  ;;  %4960 = vmatprep.mubr.f32.mxu0 %v7595_v15  ;;  %v7597_v41 = vld [vmem:[#allocation24_spill] sm:$0xff] }
 0x153   :  { %v465_v28 = vpop.f32.mrf.mxu0 }
 0x154   :  { %v6226_v31 = vadd.f32 %v843_v63, %v465_v28  ;;  %v4718_v36 = vpop.f32.mrf.mxu1  ;;  %5017 = vmatmul.mubr.msk.f32.gmra.mxu1 %vm276_vm0, %v7568_v23  ;;  %v7598_v23 = vld [vmem:[#allocation27_spill] sm:$0xff] }
 0x155   :  { %v4662_v22 = vpop.f32.mrf.mxu0  ;;  %4961 = vmatmul.mubr.f32.gmra.mxu0 %v7596_v37  ;;  %5019 = vmatprep.mubr.msk.f32.mxu1 %vm276_vm0, %v7569_v32 }
 0x156   :  { %v6233_v45 = vadd.f32 %v4712_v42, %v4662_v22  ;;  %v879_v3 = vpop.f32.mrf.mxu1  ;;  %4963 = vmatprep.mubr.f32.mxu0 %v7597_v41  ;;  %v7599_v22 = vld [vmem:[#allocation30_spill] sm:$0xff] }
 0x157   :  { %v485_v46 = vpop.f32.mrf.mxu0 }
 0x158   :  { %v6236_v15 = vadd.f32 %v855_v30, %v485_v46  ;;  %v4721_v63 = vpop.f32.mrf.mxu1  ;;  %5020 = vmatmul.mubr.msk.f32.gmra.mxu1 %vm276_vm0, %v7570_v16  ;;  %v7600_v16 = vld [vmem:[#allocation34_spill] sm:$0xff] }
 0x159   :  { %v4665_v28 = vpop.f32.mrf.mxu0  ;;  %4964 = vmatmul.mubr.f32.gmra.mxu0 %v7598_v23  ;;  %5022 = vmatprep.mubr.msk.f32.mxu1 %vm276_vm0, %v7571_v52 }
 0x15a   :  { %v6243_v37 = vadd.f32 %v4715_v27, %v4665_v28  ;;  %v891_v42 = vpop.f32.mrf.mxu1  ;;  %4966 = vmatprep.mubr.f32.mxu0 %v7599_v22  ;;  %v7601_v28 = vld [vmem:[#allocation37_spill] sm:$0xff] }
 0x15b   :  { %v505_v32 = vpop.f32.mrf.mxu0 }
 0x15c   :  { %v6246_v41 = vadd.f32 %v867_v44, %v505_v32  ;;  %v4724_v30 = vpop.f32.mrf.mxu1  ;;  %5023 = vmatmul.mubr.msk.f32.gmra.mxu1 %vm276_vm0, %v7572_v14  ;;  %v7602_v14 = vld [vmem:[#allocation42_spill] sm:$0xff] }
 0x15d   :  { %v4668_v46 = vpop.f32.mrf.mxu0  ;;  %4967 = vmatmul.mubr.f32.gmra.mxu0 %v7600_v16  ;;  %5025 = vmatprep.mubr.msk.f32.mxu1 %vm276_vm0, %v7573_v53 }
 0x15e   :  { %v6253_v23 = vadd.f32 %v4718_v36, %v4668_v46  ;;  %v903_v27 = vpop.f32.mrf.mxu1  ;;  %4969 = vmatprep.mubr.f32.mxu0 %v7601_v28  ;;  %v7603_v46 = vld [vmem:[#allocation45_spill] sm:$0xff] }
 0x15f   :  { %v525_v52 = vpop.f32.mrf.mxu0 }
 0x160   :  { %v6256_v22 = vadd.f32 %v879_v3, %v525_v52  ;;  %v4727_v32 = vpop.f32.mrf.mxu1  ;;  %5026 = vmatmul.mubr.msk.f32.gmra.mxu1 %vm276_vm0, %v7574_v0  ;;  %v7604_v0 = vld [vmem:[#allocation50_spill] sm:$0xff] }
 0x161   :  { %v4671_v44 = vpop.f32.mrf.mxu0  ;;  %4970 = vmatmul.mubr.f32.gmra.mxu0 %v7602_v14  ;;  %5028 = vmatprep.mubr.msk.f32.mxu1 %vm276_vm0, %v7575_v20 }
 0x162   :  { %v6263_v16 = vadd.f32 %v4721_v63, %v4671_v44  ;;  %v915_v36 = vpop.f32.mrf.mxu1  ;;  %4972 = vmatprep.mubr.f32.mxu0 %v7603_v46  ;;  %v7605_v44 = vld [vmem:[#allocation53_spill] sm:$0xff] }
 0x163   :  { %v545_v53 = vpop.f32.mrf.mxu0 }
 0x164   :  { %v6266_v28 = vadd.f32 %v891_v42, %v545_v53  ;;  %v4730_v52 = vpop.f32.mrf.mxu1  ;;  %5029 = vmatmul.mubr.msk.f32.gmra.mxu1 %vm276_vm0, %v7576_v49  ;;  %v7606_v49 = vld [vmem:[#allocation58_spill] sm:$0xff] }
 0x165   :  { %v4674_v3 = vpop.f32.mrf.mxu0  ;;  %4973 = vmatmul.mubr.f32.gmra.mxu0 %v7604_v0  ;;  %5031 = vmatprep.mubr.msk.f32.mxu1 %vm276_vm0, %v7577_v5 }
 0x166   :  { %v6273_v14 = vadd.f32 %v4724_v30, %v4674_v3  ;;  %v927_v63 = vpop.f32.mrf.mxu1  ;;  %4975 = vmatprep.mubr.f32.mxu0 %v7605_v44  ;;  %v7607_v3 = vld [vmem:[#allocation61_spill] sm:$0xff] }
 0x167   :  { %v565_v20 = vpop.f32.mrf.mxu0 }
 0x168   :  { %v6276_v46 = vadd.f32 %v903_v27, %v565_v20  ;;  %v4733_v53 = vpop.f32.mrf.mxu1  ;;  %5032 = vmatmul.mubr.msk.f32.gmra.mxu1 %vm276_vm0, %v7578_v10  ;;  %v7608_v10 = vld [vmem:[#allocation66_spill] sm:$0xff] }
 0x169   :  { %v4677_v42 = vpop.f32.mrf.mxu0  ;;  %4976 = vmatmul.mubr.f32.gmra.mxu0 %v7606_v49  ;;  %5034 = vmatprep.mubr.msk.f32.mxu1 %vm276_vm0, %v7579_v1 }
 0x16a   :  { %v6283_v0 = vadd.f32 %v4727_v32, %v4677_v42  ;;  %v939_v30 = vpop.f32.mrf.mxu1  ;;  %4978 = vmatprep.mubr.f32.mxu0 %v7607_v3  ;;  %v7609_v42 = vld [vmem:[#allocation69_spill] sm:$0xff] }
 0x16b   :  { %v585_v5 = vpop.f32.mrf.mxu0 }
 0x16c   :  { %v6286_v44 = vadd.f32 %v915_v36, %v585_v5  ;;  %v4736_v20 = vpop.f32.mrf.mxu1  ;;  %5035 = vmatmul.mubr.msk.f32.gmra.mxu1 %vm276_vm0, %v7580_v9  ;;  %v7610_v9 = vld [vmem:[#allocation74_spill] sm:$0xff] }
 0x16d   :  { %v4680_v27 = vpop.f32.mrf.mxu0  ;;  %4979 = vmatmul.mubr.f32.gmra.mxu0 %v7608_v10  ;;  %5037 = vmatprep.mubr.msk.f32.mxu1 %vm276_vm0, %v7581_v55 }
 0x16e   :  { %v6293_v49 = vadd.f32 %v4730_v52, %v4680_v27  ;;  %v951_v32 = vpop.f32.mrf.mxu1  ;;  %4981 = vmatprep.mubr.f32.mxu0 %v7609_v42  ;;  %v7611_v27 = vld [vmem:[#allocation77_spill] sm:$0xff] }
 0x16f   :  { %v605_v1 = vpop.f32.mrf.mxu0 }
 0x170   :  { %v6296_v3 = vadd.f32 %v927_v63, %v605_v1  ;;  %v4739_v5 = vpop.f32.mrf.mxu1  ;;  %5038 = vmatmul.mubr.msk.f32.gmra.mxu1 %vm276_vm0, %v7582_v24  ;;  %v7612_v24 = vld [vmem:[#allocation82_spill] sm:$0xff] }
 0x171   :  { %v4683_v36 = vpop.f32.mrf.mxu0  ;;  %4982 = vmatmul.mubr.f32.gmra.mxu0 %v7610_v9  ;;  %5040 = vmatprep.mubr.msk.f32.mxu1 %vm276_vm0, %v7583_v43 }
 0x172   :  { %v6303_v10 = vadd.f32 %v4733_v53, %v4683_v36  ;;  %v963_v52 = vpop.f32.mrf.mxu1  ;;  %4984 = vmatprep.mubr.f32.mxu0 %v7611_v27  ;;  %v7613_v36 = vld [vmem:[#allocation85_spill] sm:$0xff] }
 0x173   :  { %v625_v55 = vpop.f32.mrf.mxu0 }
 0x174   :  { %v6306_v42 = vadd.f32 %v939_v30, %v625_v55  ;;  %v4742_v1 = vpop.f32.mrf.mxu1  ;;  %5041 = vmatmul.mubr.msk.f32.gmra.mxu1 %vm276_vm0, %v7584_v47  ;;  %v7614_v47 = vld [vmem:[#allocation90_spill] sm:$0xff] }
 0x175   :  { %v4686_v63 = vpop.f32.mrf.mxu0  ;;  %4985 = vmatmul.mubr.f32.gmra.mxu0 %v7612_v24  ;;  %5043 = vmatprep.mubr.msk.f32.mxu1 %vm276_vm0, %v7585_v59 }
 0x176   :  { %v6313_v9 = vadd.f32 %v4736_v20, %v4686_v63  ;;  %v975_v53 = vpop.f32.mrf.mxu1  ;;  %4987 = vmatprep.mubr.f32.mxu0 %v7613_v36  ;;  %v7615_v63 = vld [vmem:[#allocation93_spill] sm:$0xff] }
 0x177   :  { %v645_v43 = vpop.f32.mrf.mxu0 }
 0x178   :  { %v6316_v27 = vadd.f32 %v951_v32, %v645_v43  ;;  %v4745_v55 = vpop.f32.mrf.mxu1  ;;  %5044 = vmatmul.mubr.msk.f32.gmra.mxu1 %vm276_vm0, %v7586_v39  ;;  %v7616_v39 = vld [vmem:[#allocation99_spill] sm:$0xff] }
 0x179   :  { %v4689_v30 = vpop.f32.mrf.mxu0  ;;  %4988 = vmatmul.mubr.f32.gmra.mxu0 %v7614_v47  ;;  %5046 = vmatprep.mubr.msk.f32.mxu1 %vm276_vm0, %v7587_v38 }
 0x17a   :  { %v6323_v24 = vadd.f32 %v4739_v5, %v4689_v30  ;;  %v987_v20 = vpop.f32.mrf.mxu1  ;;  %4990 = vmatprep.mubr.f32.mxu0 %v7615_v63  ;;  %v7617_v30 = vld [vmem:[#allocation101_spill] sm:$0xff] }
 0x17b   :  { %v665_v59 = vpop.f32.mrf.mxu0 }
 0x17c   :  { %v6326_v36 = vadd.f32 %v963_v52, %v665_v59  ;;  %v4748_v43 = vpop.f32.mrf.mxu1  ;;  %5047 = vmatmul.mubr.msk.f32.gmra.mxu1 %vm276_vm0, %v7588_v8 }
 0x17d   :  { %v4692_v32 = vpop.f32.mrf.mxu0  ;;  %4991 = vmatmul.mubr.f32.gmra.mxu0 %v7616_v39  ;;  %5049 = vmatprep.mubr.msk.f32.mxu1 %vm276_vm0, %v7589_v60 }
 0x17e   :  { %v6333_v47 = vadd.f32 %v4742_v1, %v4692_v32  ;;  %v999_v5 = vpop.f32.mrf.mxu1  ;;  %4993 = vmatprep.mubr.f32.mxu0 %v7617_v30  ;;  %v7618_v1 = vld [vmem:[#allocation106_spill] sm:$0xff] }
 0x17f   :  { %v685_v38 = vpop.f32.mrf.mxu0 }
 0x180   :  { %v6336_v63 = vadd.f32 %v975_v53, %v685_v38  ;;  %v4751_v59 = vpop.f32.mrf.mxu1  ;;  %5050 = vmatmul.mubr.msk.f32.gmra.mxu1 %vm276_vm0, %v5931_v48 }
 0x181   :  { %v4695_v52 = vpop.f32.mrf.mxu0  ;;  %4994 = vmatmul.mubr.f32.gmra.mxu0 %v5960_v17  ;;  %5104 = vmatprep.mubr.f32.mxu1 %v5425_v54 }
 0x182   :  { %v6342_v39 = vadd.f32 %v4745_v55, %v4695_v52  ;;  %v1011_v60 = vpop.f32.mrf.mxu1  ;;  %4996 = vmatprep.mubr.f32.mxu0 %v7618_v1 }
 0x183   :  { %v705_v32 = vpop.f32.mrf.mxu0 }
 0x184   :  { %v6345_v8 = vadd.f32 %v987_v20, %v705_v32  ;;  %v4806_v30 = vpop.f32.mrf.mxu1  ;;  %5105 = vmatmul.mubr.f32.vlgmr.msra.gmra.mxu1 %v5457_v2 }
 0x185   :  { %v4698_v38 = vpop.f32.mrf.mxu0  ;;  %4997 = vmatmul.mubr.f32.gmra.mxu0 %v5981_v6  ;;  %5107 = vmatprep.mubr.f32.mxu1 %v5432_v56 }
 0x186   :  { %v6350_v53 = vadd.f32 %v4748_v43, %v4698_v38  ;;  %v1382_v17 = vpop.f32.mrf.mxu1  ;;  %4999 = vmatprep.mubr.f32.mxu0 %v5983_v29  ;;  %5203 = vmatpush3.msra.mxu1 %v5834_v35 }
 0x187   :  { %v725_v54 = vpop.f32.mrf.mxu0 }
 0x188   :  { %v6354_v55 = vadd.f32 %v999_v5, %v725_v54  ;;  %v4809_v20 = vpop.f32.mrf.mxu1  ;;  %5108 = vmatmul.mubr.f32.gmra.mxu1 %v5464_v4  ;;  %v7623_v54 = vld [vmem:[#allocation19_spill] sm:$0xff] }
 0x189   :  { %v4701_v52 = vpop.f32.mrf.mxu0  ;;  %5000 = vmatmul.mubr.f32.gmra.mxu0 %v5994_v33  ;;  %5110 = vmatprep.mubr.f32.mxu1 %v5492_v19 }
 0x18a   :  { %v6359_v2 = vadd.f32 %v4751_v59, %v4701_v52  ;;  %v1398_v56 = vpop.f32.mrf.mxu1  ;;  %5054 = vmatprep.mubr.f32.mxu0 %v5412_v50 }
 0x18b   :  { %v745_v6 = vpop.f32.mrf.mxu0 }
 0x18c   :  { %v6362_v29 = vadd.f32 %v1011_v60, %v745_v6  ;;  %v4812_v35 = vpop.f32.mrf.mxu1  ;;  %5111 = vmatmul.mubr.f32.gmra.mxu1 %v5499_v21  ;;  %v7624_v6 = vld [vmem:[#allocation39_spill] sm:$0xff] }
 0x18d   :  { %v4756_v43 = vpop.f32.mrf.mxu0  ;;  %5055 = vmatmul.mubr.f32.vlgmr.msra.gmra.mxu0 %v5440_v61  ;;  %5113 = vmatprep.mubr.f32.mxu1 %v5531_v34 }
 0x18e   :  { %v1099_v4 = vadd.f32 %v4756_v43, %v6211_v18  ;;  %5153 = vmatpush3.msra.mxu0 %v7593_v26  ;;  %v1414_v19 = vpop.f32.mrf.mxu1  ;;  %5057 = vmatprep.mubr.f32.mxu0 %v5414_v51 }
 0x18f   :  { %v1091_v33 = vpop.f32.mrf.mxu0 }
 0x190   :  { %v1092_v50 = vadd.f32 %v1091_v33, %v6216_v40  ;;  %v4815_v60 = vpop.f32.mrf.mxu1  ;;  %5114 = vmatmul.mubr.f32.gmra.mxu1 %v5537_v11  ;;  %v6372_v5 = vadd.f32 %v4806_v30, %v1099_v4  ;;  %v7620_v30 = vld [vmem:[#allocation31_spill] sm:$0xff]  ;;  %v7625_v4 = vld [vmem:[#allocation20_spill] sm:$0xff]  ;;  %v7626_v33 = vld [vmem:[#allocation46_spill] sm:$0xff] }
 0x191   :  { %v4759_v21 = vpop.f32.mrf.mxu0  ;;  %5058 = vmatmul.mubr.f32.gmra.mxu0 %v5445_v62  ;;  %5116 = vmatprep.mubr.f32.mxu1 %v5568_v57 }
 0x192   :  { %v1113_v61 = vadd.f32 %v4759_v21, %v6223_v7  ;;  %v1430_v18 = vpop.f32.mrf.mxu1  ;;  %5060 = vmatprep.mubr.f32.mxu0 %v5475_v12  ;;  %v6378_v34 = vadd.f32 %v1382_v17, %v1092_v50  ;;  %v7619_v7 = vld [vmem:[#allocation13_spill] sm:$0xff]  ;;  %v7621_v17 = vld [vmem:[#allocation14_spill] sm:$0xff] }
 0x193   :  { %v1105_v51 = vpop.f32.mrf.mxu0  ;;  %v7627_v21 = vld [vmem:[#allocation25_spill] sm:$0xff] }
 0x194   :  { %v1106_v26 = vadd.f32 %v1105_v51, %v6226_v31  ;;  %v4818_v40 = vpop.f32.mrf.mxu1  ;;  %5117 = vmatmul.mubr.f32.gmra.mxu1 %v5573_v58  ;;  %v6382_v11 = vadd.f32 %v4809_v20, %v1113_v61 }
 0x195   :  { %v4762_v59 = vpop.f32.mrf.mxu0  ;;  %5061 = vmatmul.mubr.f32.gmra.mxu0 %v5477_v13  ;;  %5119 = vmatprep.mubr.f32.mxu1 %v5604_v25  ;;  %v7622_v13 = vld [vmem:[#allocation38_spill] sm:$0xff] }
 0x196   :  { %v1127_v62 = vadd.f32 %v4762_v59, %v6233_v45  ;;  %v1446_v57 = vpop.f32.mrf.mxu1  ;;  %5063 = vmatprep.mubr.f32.mxu0 %v7619_v7  ;;  %v6388_v12 = vadd.f32 %v1398_v56, %v1106_v26  ;;  %v7628_v26 = vld [vmem:[#allocation47_spill] sm:$0xff]  ;;  %v7630_v7 = vld [vmem:[#allocation54_spill] sm:$0xff] }
 0x197   :  { %v1119_v1 = vpop.f32.mrf.mxu0 }
 0x198   :  { %v1120_v31 = vadd.f32 %v1119_v1, %v6236_v15  ;;  %v4821_v32 = vpop.f32.mrf.mxu1  ;;  %5120 = vmatmul.mubr.f32.gmra.mxu1 %v7620_v30  ;;  %v6392_v58 = vadd.f32 %v4812_v35, %v1127_v62  ;;  %v7629_v62 = vld [vmem:[#allocation26_spill] sm:$0xff] }
 0x199   :  { %v4765_v38 = vpop.f32.mrf.mxu0  ;;  %5064 = vmatmul.mubr.f32.gmra.mxu0 %v7621_v17  ;;  %5122 = vmatprep.mubr.f32.mxu1 %v7622_v13  ;;  %v7632_v17 = vld [vmem:[#allocation55_spill] sm:$0xff] }
 0x19a   :  { %v1141_v25 = vadd.f32 %v4765_v38, %v6243_v37  ;;  %v1462_v45 = vpop.f32.mrf.mxu1  ;;  %5066 = vmatprep.mubr.f32.mxu0 %v7623_v54  ;;  %v6398_v20 = vadd.f32 %v1414_v19, %v1120_v31  ;;  %v7631_v31 = vld [vmem:[#allocation32_spill] sm:$0xff]  ;;  %v7634_v54 = vld [vmem:[#allocation62_spill] sm:$0xff] }
 0x19b   :  { %v1133_v52 = vpop.f32.mrf.mxu0 }
 0x19c   :  { %v1134_v15 = vadd.f32 %v1133_v52, %v6246_v41  ;;  %v4824_v56 = vpop.f32.mrf.mxu1  ;;  %5123 = vmatmul.mubr.f32.gmra.mxu1 %v7624_v6  ;;  %v6402_v35 = vadd.f32 %v4815_v60, %v1141_v25  ;;  %v7633_v25 = vld [vmem:[#allocation33_spill] sm:$0xff] }
 0x19d   :  { %v4768_v43 = vpop.f32.mrf.mxu0  ;;  %5067 = vmatmul.mubr.f32.gmra.mxu0 %v7625_v4  ;;  %5125 = vmatprep.mubr.f32.mxu1 %v7626_v33  ;;  %v7636_v4 = vld [vmem:[#allocation63_spill] sm:$0xff] }
 0x19e   :  { %v1155_v37 = vadd.f32 %v4768_v43, %v6253_v23  ;;  %v1478_v50 = vpop.f32.mrf.mxu1  ;;  %5069 = vmatprep.mubr.f32.mxu0 %v7627_v21  ;;  %v6408_v19 = vadd.f32 %v1430_v18, %v1134_v15  ;;  %v7635_v15 = vld [vmem:[#allocation40_spill] sm:$0xff]  ;;  %v7638_v21 = vld [vmem:[#allocation70_spill] sm:$0xff] }
 0x19f   :  { %v1147_v61 = vpop.f32.mrf.mxu0 }
 0x1a0   :  { %v1148_v41 = vadd.f32 %v1147_v61, %v6256_v22  ;;  %v4827_v51 = vpop.f32.mrf.mxu1  ;;  %5126 = vmatmul.mubr.f32.gmra.mxu1 %v7628_v26  ;;  %v6412_v60 = vadd.f32 %v4818_v40, %v1155_v37  ;;  %v7637_v37 = vld [vmem:[#allocation41_spill] sm:$0xff] }
 0x1a1   :  { %v4771_v59 = vpop.f32.mrf.mxu0  ;;  %5070 = vmatmul.mubr.f32.gmra.mxu0 %v7629_v62  ;;  %5128 = vmatprep.mubr.f32.mxu1 %v7630_v7  ;;  %v7640_v62 = vld [vmem:[#allocation71_spill] sm:$0xff] }
 0x1a2   :  { %v1169_v23 = vadd.f32 %v4771_v59, %v6263_v16  ;;  %v1494_v1 = vpop.f32.mrf.mxu1  ;;  %5072 = vmatprep.mubr.f32.mxu0 %v7631_v31  ;;  %v6418_v18 = vadd.f32 %v1446_v57, %v1148_v41  ;;  %v7639_v41 = vld [vmem:[#allocation48_spill] sm:$0xff]  ;;  %v7642_v31 = vld [vmem:[#allocation78_spill] sm:$0xff] }
 0x1a3   :  { %v1161_v30 = vpop.f32.mrf.mxu0 }
 0x1a4   :  { %v1162_v22 = vadd.f32 %v1161_v30, %v6266_v28  ;;  %v4830_v38 = vpop.f32.mrf.mxu1  ;;  %5129 = vmatmul.mubr.f32.gmra.mxu1 %v7632_v17  ;;  %v6422_v40 = vadd.f32 %v4821_v32, %v1169_v23  ;;  %v7641_v23 = vld [vmem:[#allocation49_spill] sm:$0xff] }
 0x1a5   :  { %v4774_v13 = vpop.f32.mrf.mxu0  ;;  %5073 = vmatmul.mubr.f32.gmra.mxu0 %v7633_v25  ;;  %5131 = vmatprep.mubr.f32.mxu1 %v7634_v54  ;;  %v7644_v25 = vld [vmem:[#allocation79_spill] sm:$0xff] }
 0x1a6   :  { %v1183_v16 = vadd.f32 %v4774_v13, %v6273_v14  ;;  %v1510_v52 = vpop.f32.mrf.mxu1  ;;  %5075 = vmatprep.mubr.f32.mxu0 %v7635_v15  ;;  %v6428_v57 = vadd.f32 %v1462_v45, %v1162_v22  ;;  %v7643_v22 = vld [vmem:[#allocation56_spill] sm:$0xff]  ;;  %v7646_v15 = vld [vmem:[#allocation86_spill] sm:$0xff] }
 0x1a7   :  { %v1175_v6 = vpop.f32.mrf.mxu0 }
 0x1a8   :  { %v1176_v28 = vadd.f32 %v1175_v6, %v6276_v46  ;;  %v4833_v43 = vpop.f32.mrf.mxu1  ;;  %5132 = vmatmul.mubr.f32.gmra.mxu1 %v7636_v4  ;;  %v6432_v32 = vadd.f32 %v4824_v56, %v1183_v16  ;;  %v7645_v16 = vld [vmem:[#allocation57_spill] sm:$0xff] }
 0x1a9   :  { %v4777_v33 = vpop.f32.mrf.mxu0  ;;  %5076 = vmatmul.mubr.f32.gmra.mxu0 %v7637_v37  ;;  %5134 = vmatprep.mubr.f32.mxu1 %v7638_v21  ;;  %v7648_v37 = vld [vmem:[#allocation87_spill] sm:$0xff] }
 0x1aa   :  { %v1197_v14 = vadd.f32 %v4777_v33, %v6283_v0  ;;  %v1526_v61 = vpop.f32.mrf.mxu1  ;;  %5078 = vmatprep.mubr.f32.mxu0 %v7639_v41  ;;  %v6438_v45 = vadd.f32 %v1478_v50, %v1176_v28  ;;  %v7647_v28 = vld [vmem:[#allocation64_spill] sm:$0xff]  ;;  %v7650_v41 = vld [vmem:[#allocation94_spill] sm:$0xff] }
 0x1ab   :  { %v1189_v26 = vpop.f32.mrf.mxu0 }
 0x1ac   :  { %v1190_v46 = vadd.f32 %v1189_v26, %v6286_v44  ;;  %v4836_v59 = vpop.f32.mrf.mxu1  ;;  %5135 = vmatmul.mubr.f32.gmra.mxu1 %v7640_v62  ;;  %v6442_v56 = vadd.f32 %v4827_v51, %v1197_v14  ;;  %v7649_v14 = vld [vmem:[#allocation65_spill] sm:$0xff] }
 0x1ad   :  { %v4780_v7 = vpop.f32.mrf.mxu0  ;;  %5079 = vmatmul.mubr.f32.gmra.mxu0 %v7641_v23  ;;  %5137 = vmatprep.mubr.f32.mxu1 %v7642_v31  ;;  %v7652_v23 = vld [vmem:[#allocation95_spill] sm:$0xff] }
 0x1ae   :  { %v1211_v0 = vadd.f32 %v4780_v7, %v6293_v49  ;;  %v1542_v30 = vpop.f32.mrf.mxu1  ;;  %5081 = vmatprep.mubr.f32.mxu0 %v7643_v22  ;;  %v6448_v50 = vadd.f32 %v1494_v1, %v1190_v46  ;;  %v7651_v46 = vld [vmem:[#allocation72_spill] sm:$0xff]  ;;  %v7654_v22 = vld [vmem:[#allocation102_spill] sm:$0xff] }
 0x1af   :  { %v1203_v17 = vpop.f32.mrf.mxu0 }
 0x1b0   :  { %v1204_v44 = vadd.f32 %v1203_v17, %v6296_v3  ;;  %v4839_v13 = vpop.f32.mrf.mxu1  ;;  %5138 = vmatmul.mubr.f32.gmra.mxu1 %v7644_v25  ;;  %v6452_v51 = vadd.f32 %v4830_v38, %v1211_v0  ;;  %v7653_v0 = vld [vmem:[#allocation73_spill] sm:$0xff] }
 0x1b1   :  { %v4783_v54 = vpop.f32.mrf.mxu0  ;;  %5082 = vmatmul.mubr.f32.gmra.mxu0 %v7645_v16  ;;  %5140 = vmatprep.mubr.f32.mxu1 %v7646_v15  ;;  %v7656_v16 = vld [vmem:[#allocation103_spill] sm:$0xff] }
 0x1b2   :  { %v1225_v49 = vadd.f32 %v4783_v54, %v6303_v10  ;;  %v1558_v6 = vpop.f32.mrf.mxu1  ;;  %5084 = vmatprep.mubr.f32.mxu0 %v7647_v28  ;;  %v6458_v1 = vadd.f32 %v1510_v52, %v1204_v44  ;;  %v7655_v44 = vld [vmem:[#allocation80_spill] sm:$0xff]  ;;  %v7658_v28 = vld [vmem:[#allocation107_spill] sm:$0xff] }
 0x1b3   :  { %v1217_v4 = vpop.f32.mrf.mxu0 }
 0x1b4   :  { %v1218_v3 = vadd.f32 %v1217_v4, %v6306_v42  ;;  %v4842_v33 = vpop.f32.mrf.mxu1  ;;  %5141 = vmatmul.mubr.f32.gmra.mxu1 %v7648_v37  ;;  %v6462_v38 = vadd.f32 %v4833_v43, %v1225_v49  ;;  %v7657_v49 = vld [vmem:[#allocation81_spill] sm:$0xff] }
 0x1b5   :  { %v4786_v21 = vpop.f32.mrf.mxu0  ;;  %5085 = vmatmul.mubr.f32.gmra.mxu0 %v7649_v14  ;;  %5143 = vmatprep.mubr.f32.mxu1 %v7650_v41  ;;  %v7660_v14 = vld [vmem:[#allocation108_spill] sm:$0xff] }
 0x1b6   :  { %v1239_v10 = vadd.f32 %v4786_v21, %v6313_v9  ;;  %v1574_v26 = vpop.f32.mrf.mxu1  ;;  %5087 = vmatprep.mubr.f32.mxu0 %v7651_v46  ;;  %v6468_v52 = vadd.f32 %v1526_v61, %v1218_v3  ;;  %v7659_v3 = vld [vmem:[#allocation88_spill] sm:$0xff]  ;;  %v7662_v46 = vld [vmem:[#allocation3_spill] sm:$0xff] }
 0x1b7   :  { %v1231_v62 = vpop.f32.mrf.mxu0 }
 0x1b8   :  { %v1232_v42 = vadd.f32 %v1231_v62, %v6316_v27  ;;  %v4845_v7 = vpop.f32.mrf.mxu1  ;;  %5144 = vmatmul.mubr.f32.gmra.mxu1 %v7652_v23  ;;  %v6472_v43 = vadd.f32 %v4836_v59, %v1239_v10  ;;  %v7661_v10 = vld [vmem:[#allocation89_spill] sm:$0xff] }
 0x1b9   :  { %v4789_v31 = vpop.f32.mrf.mxu0  ;;  %5088 = vmatmul.mubr.f32.gmra.mxu0 %v7653_v0  ;;  %5146 = vmatprep.mubr.f32.mxu1 %v7654_v22  ;;  %v7664_v0 = vld [vmem:[#allocation5_spill] sm:$0xff] }
 0x1ba   :  { %v1253_v9 = vadd.f32 %v4789_v31, %v6323_v24  ;;  %v1590_v17 = vpop.f32.mrf.mxu1  ;;  %5090 = vmatprep.mubr.f32.mxu0 %v7655_v44  ;;  %v6478_v61 = vadd.f32 %v1542_v30, %v1232_v42  ;;  %v7663_v42 = vld [vmem:[#allocation96_spill] sm:$0xff]  ;;  %v7666_v44 = vld [vmem:[#allocation2_spill] sm:$0xff] }
 0x1bb   :  { %v1245_v25 = vpop.f32.mrf.mxu0 }
 0x1bc   :  { %v1246_v27 = vadd.f32 %v1245_v25, %v6326_v36  ;;  %v4848_v54 = vpop.f32.mrf.mxu1  ;;  %5147 = vmatmul.mubr.f32.gmra.mxu1 %v7656_v16  ;;  %v6482_v59 = vadd.f32 %v4839_v13, %v1253_v9  ;;  %v7665_v9 = vld [vmem:[#allocation97_spill] sm:$0xff] }
 0x1bd   :  { %v4792_v15 = vpop.f32.mrf.mxu0  ;;  %5091 = vmatmul.mubr.f32.gmra.mxu0 %v7657_v49  ;;  %5149 = vmatprep.mubr.f32.mxu1 %v7658_v28  ;;  %v7668_v49 = vld [vmem:[#allocation4_spill] sm:$0xff] }
 0x1be   :  { %v1267_v24 = vadd.f32 %v4792_v15, %v6333_v47  ;;  %v1606_v4 = vpop.f32.mrf.mxu1  ;;  %5093 = vmatprep.mubr.f32.mxu0 %v7659_v3  ;;  %v6488_v30 = vadd.f32 %v1558_v6, %v1246_v27  ;;  %v7670_v3 = vld [vmem:[#allocation7_spill] sm:$0xff] }
 0x1bf   :  { %v1259_v37 = vpop.f32.mrf.mxu0 }
 0x1c0   :  { %v1260_v36 = vadd.f32 %v1259_v37, %v6336_v63  ;;  %v4851_v21 = vpop.f32.mrf.mxu1  ;;  %5150 = vmatmul.mubr.f32.gmra.mxu1 %v7660_v14  ;;  %v6492_v13 = vadd.f32 %v4842_v33, %v1267_v24  ;;  %v7669_v24 = vld [vmem:[#allocation105_spill] sm:$0xff] }
 0x1c1   :  { %v4795_v41 = vpop.f32.mrf.mxu0  ;;  %5094 = vmatmul.mubr.f32.gmra.mxu0 %v7661_v10  ;;  %5204 = vmatprep.mubr.msk.f32.mxu1 %vm276_vm0, %v7662_v46 }
 0x1c2   :  { %v1281_v47 = vadd.f32 %v4795_v41, %v6342_v39  ;;  %v1622_v62 = vpop.f32.mrf.mxu1  ;;  %5096 = vmatprep.mubr.f32.mxu0 %v7663_v42  ;;  %v6499_v6 = vadd.f32 %v1574_v26, %v1260_v36  ;;  %v7667_v26 = vld [vmem:[#allocation104_spill] sm:$0xff] }
 0x1c3   :  { %v1273_v23 = vpop.f32.mrf.mxu0 }
 0x1c4   :  { %v1274_v63 = vadd.f32 %v1273_v23, %v6345_v8  ;;  %v4906_v31 = vpop.f32.mrf.mxu1  ;;  %5205 = vmatmul.mubr.msk.f32.vlgmr.msra.gmra.mxu1 %vm276_vm0, %v7664_v0  ;;  %v6504_v33 = vadd.f32 %v4845_v7, %v1281_v47 }
 0x1c5   :  { %v4798_v22 = vpop.f32.mrf.mxu0  ;;  %5097 = vmatmul.mubr.f32.gmra.mxu0 %v7665_v9  ;;  %5207 = vmatprep.mubr.msk.f32.mxu1 %vm276_vm0, %v7666_v44 }
 0x1c6   :  { %v1295_v39 = vadd.f32 %v4798_v22, %v6350_v53  ;;  %v1962_v25 = vpop.f32.mrf.mxu1  ;;  %5099 = vmatprep.mubr.f32.mxu0 %v7667_v26  ;;  %v6511_v27 = vadd.f32 %v1590_v17, %v1274_v63  ;;  %v7673_v63 = vld [vmem:[#allocation9_spill] sm:$0xff]  ;;  %v7675_v26 = vld [vmem:[#allocation16_spill] sm:$0xff] }
 0x1c7   :  { %v1287_v8 = vpop.f32.mrf.mxu0 }
 0x1c8   :  { %v1288_v16 = vadd.f32 %v1287_v8, %v6354_v55  ;;  %v4909_v15 = vpop.f32.mrf.mxu1  ;;  %5208 = vmatmul.mubr.msk.f32.gmra.mxu1 %vm276_vm0, %v7668_v49  ;;  %v6516_v7 = vadd.f32 %v4848_v54, %v1295_v39  ;;  %v7671_v54 = vld [vmem:[#allocation6_spill] sm:$0xff] }
 0x1c9   :  { %v4801_v28 = vpop.f32.mrf.mxu0  ;;  %5100 = vmatmul.mubr.f32.gmra.mxu0 %v7669_v24  ;;  %5210 = vmatprep.mubr.msk.f32.mxu1 %vm276_vm0, %v7670_v3 }
 0x1ca   :  { %v1309_v53 = vadd.f32 %v4801_v28, %v6359_v2  ;;  %v1974_v37 = vpop.f32.mrf.mxu1  ;;  %5154 = vmatprep.mubr.msk.f32.mxu0 %vm276_vm0, %v7662_v46  ;;  %v6524_v17 = vadd.f32 %v1606_v4, %v1288_v16  ;;  %v7672_v2 = vld [vmem:[#allocation10_spill] sm:$0xff] }
 0x1cb   :  { %v1301_v55 = vpop.f32.mrf.mxu0 }
 0x1cc   :  { %v1302_v36 = vadd.f32 %v1301_v55, %v6362_v29  ;;  %v4912_v14 = vpop.f32.mrf.mxu1  ;;  %5211 = vmatmul.mubr.msk.f32.gmra.mxu1 %vm276_vm0, %v7671_v54  ;;  %v6529_v41 = vadd.f32 %v4851_v21, %v1309_v53 }
 0x1cd   :  { %v4856_v10 = vpop.f32.mrf.mxu0  ;;  %5155 = vmatmul.mubr.msk.f32.vlgmr.msra.gmra.mxu0 %vm276_vm0, %v7664_v0  ;;  %5213 = vmatprep.mubr.msk.f32.mxu1 %vm276_vm0, %v7672_v2 }
 0x1ce   :  { %v1711_v46 = vadd.f32 %v4856_v10, %v6372_v5  ;;  %v1986_v4 = vpop.f32.mrf.mxu1  ;;  %5157 = vmatprep.mubr.msk.f32.mxu0 %vm276_vm0, %v7666_v44  ;;  %v6538_v29 = vadd.f32 %v1622_v62, %v1302_v36  ;;  %v7674_v5 = vld [vmem:[#allocation17_spill] sm:$0xff] }
 0x1cf   :  { %v1704_v47 = vpop.f32.mrf.mxu0 }
 0x1d0   :  { %v6540_v42 = vadd.f32 %v4906_v31, %v1711_v46  ;;  %v1705_v21 = vadd.f32 %v1704_v47, %v6378_v34  ;;  %v4915_v23 = vpop.f32.mrf.mxu1  ;;  %5214 = vmatmul.mubr.msk.f32.gmra.mxu1 %vm276_vm0, %v7673_v63 }
 0x1d1   :  { %v4859_v0 = vpop.f32.mrf.mxu0  ;;  %5158 = vmatmul.mubr.msk.f32.gmra.mxu0 %vm276_vm0, %v7668_v49  ;;  %5216 = vmatprep.mubr.msk.f32.mxu1 %vm276_vm0, %v7674_v5 }
 0x1d2   :  { %v6549_v22 = vadd.f32 %v1962_v25, %v1705_v21  ;;  %v1723_v62 = vadd.f32 %v4859_v0, %v6382_v11  ;;  %v1998_v9 = vpop.f32.mrf.mxu1  ;;  %5160 = vmatprep.mubr.msk.f32.mxu0 %vm276_vm0, %v7670_v3  ;;  %v7676_v25 = vld [vmem:[#allocation23_spill] sm:$0xff]  ;;  %v7677_v3 = vld [vmem:[#allocation22_spill] sm:$0xff] }
 0x1d3   :  { %v1716_v34 = vpop.f32.mrf.mxu0 }
 0x1d4   :  { %v6554_v31 = vadd.f32 %v4909_v15, %v1723_v62  ;;  %v1717_v44 = vadd.f32 %v1716_v34, %v6388_v12  ;;  %v4918_v39 = vpop.f32.mrf.mxu1  ;;  %5217 = vmatmul.mubr.msk.f32.gmra.mxu1 %vm276_vm0, %v7675_v26 }
 0x1d5   :  { %v4862_v8 = vpop.f32.mrf.mxu0  ;;  %5161 = vmatmul.mubr.msk.f32.gmra.mxu0 %vm276_vm0, %v7671_v54  ;;  %5219 = vmatprep.mubr.msk.f32.mxu1 %vm276_vm0, %v7676_v25 }
 0x1d6   :  { %v6563_v11 = vadd.f32 %v1974_v37, %v1717_v44  ;;  %v1735_v16 = vadd.f32 %v4862_v8, %v6392_v58  ;;  %v2010_v49 = vpop.f32.mrf.mxu1  ;;  %5163 = vmatprep.mubr.msk.f32.mxu0 %vm276_vm0, %v7672_v2  ;;  %v7678_v37 = vld [vmem:[#allocation29_spill] sm:$0xff]  ;;  %v7679_v2 = vld [vmem:[#allocation28_spill] sm:$0xff] }
 0x1d7   :  { %v1728_v12 = vpop.f32.mrf.mxu0 }
 0x1d8   :  { %v6568_v15 = vadd.f32 %v4912_v14, %v1735_v16  ;;  %v1729_v28 = vadd.f32 %v1728_v12, %v6398_v20  ;;  %v4921_v24 = vpop.f32.mrf.mxu1  ;;  %5220 = vmatmul.mubr.msk.f32.gmra.mxu1 %vm276_vm0, %v7677_v3 }
 0x1d9   :  { %v4865_v53 = vpop.f32.mrf.mxu0  ;;  %5164 = vmatmul.mubr.msk.f32.gmra.mxu0 %vm276_vm0, %v7673_v63  ;;  %5222 = vmatprep.mubr.msk.f32.mxu1 %vm276_vm0, %v7678_v37 }
 0x1da   :  { %v6577_v58 = vadd.f32 %v1986_v4, %v1729_v28  ;;  %v1747_v55 = vadd.f32 %v4865_v53, %v6402_v35  ;;  %v2022_v36 = vpop.f32.mrf.mxu1  ;;  %5166 = vmatprep.mubr.msk.f32.mxu0 %vm276_vm0, %v7674_v5  ;;  %v7680_v4 = vld [vmem:[#allocation36_spill] sm:$0xff]  ;;  %v7681_v5 = vld [vmem:[#allocation35_spill] sm:$0xff] }
 0x1db   :  { %v1740_v20 = vpop.f32.mrf.mxu0 }
 0x1dc   :  { %v6582_v14 = vadd.f32 %v4915_v23, %v1747_v55  ;;  %v1741_v54 = vadd.f32 %v1740_v20, %v6408_v19  ;;  %v4924_v10 = vpop.f32.mrf.mxu1  ;;  %5223 = vmatmul.mubr.msk.f32.gmra.mxu1 %vm276_vm0, %v7679_v2 }
 0x1dd   :  { %v4868_v46 = vpop.f32.mrf.mxu0  ;;  %5167 = vmatmul.mubr.msk.f32.gmra.mxu0 %vm276_vm0, %v7675_v26  ;;  %5225 = vmatprep.mubr.msk.f32.mxu1 %vm276_vm0, %v7680_v4 }
 0x1de   :  { %v6591_v35 = vadd.f32 %v1998_v9, %v1741_v54  ;;  %v1759_v47 = vadd.f32 %v4868_v46, %v6412_v60  ;;  %v2034_v21 = vpop.f32.mrf.mxu1  ;;  %5169 = vmatprep.mubr.msk.f32.mxu0 %vm276_vm0, %v7676_v25  ;;  %v7682_v9 = vld [vmem:[#allocation44_spill] sm:$0xff]  ;;  %v7684_v25 = vld [vmem:[#allocation43_spill] sm:$0xff] }
 0x1df   :  { %v1752_v19 = vpop.f32.mrf.mxu0 }
 0x1e0   :  { %v6596_v23 = vadd.f32 %v4918_v39, %v1759_v47  ;;  %v1753_v63 = vadd.f32 %v1752_v19, %v6418_v18  ;;  %v4927_v0 = vpop.f32.mrf.mxu1  ;;  %5226 = vmatmul.mubr.msk.f32.gmra.mxu1 %vm276_vm0, %v7681_v5 }
 0x1e1   :  { %v4871_v62 = vpop.f32.mrf.mxu0  ;;  %5170 = vmatmul.mubr.msk.f32.gmra.mxu0 %vm276_vm0, %v7677_v3  ;;  %5228 = vmatprep.mubr.msk.f32.mxu1 %vm276_vm0, %v7682_v9 }
 0x1e2   :  { %v6605_v60 = vadd.f32 %v2010_v49, %v1753_v63  ;;  %v1771_v34 = vadd.f32 %v4871_v62, %v6422_v40  ;;  %v2046_v44 = vpop.f32.mrf.mxu1  ;;  %5172 = vmatprep.mubr.msk.f32.mxu0 %vm276_vm0, %v7678_v37  ;;  %v7685_v49 = vld [vmem:[#allocation52_spill] sm:$0xff]  ;;  %v7688_v37 = vld [vmem:[#allocation51_spill] sm:$0xff] }
 0x1e3   :  { %v1764_v18 = vpop.f32.mrf.mxu0 }
 0x1e4   :  { %v6610_v39 = vadd.f32 %v4921_v24, %v1771_v34  ;;  %v1765_v26 = vadd.f32 %v1764_v18, %v6428_v57  ;;  %v4930_v8 = vpop.f32.mrf.mxu1  ;;  %5229 = vmatmul.mubr.msk.f32.gmra.mxu1 %vm276_vm0, %v7684_v25 }
 0x1e5   :  { %v4874_v16 = vpop.f32.mrf.mxu0  ;;  %5173 = vmatmul.mubr.msk.f32.gmra.mxu0 %vm276_vm0, %v7679_v2  ;;  %5231 = vmatprep.mubr.msk.f32.mxu1 %vm276_vm0, %v7685_v49 }
 0x1e6   :  { %7683 = vst [vmem:[#allocation8_spill] sm:$0xff] %v6610_v39  ;;  %v6619_v40 = vadd.f32 %v2022_v36, %v1765_v26  ;;  %v1783_v12 = vadd.f32 %v4874_v16, %v6432_v32  ;;  %v2058_v28 = vpop.f32.mrf.mxu1  ;;  %5175 = vmatprep.mubr.msk.f32.mxu0 %vm276_vm0, %v7680_v4  ;;  %v7689_v36 = vld [vmem:[#allocation60_spill] sm:$0xff]  ;;  %v7692_v4 = vld [vmem:[#allocation59_spill] sm:$0xff] }
 0x1e7   :  { %v1776_v57 = vpop.f32.mrf.mxu0 }
 0x1e8   :  { %7686 = vst [vmem:[#allocation11_spill] sm:$0xff] %v6619_v40  ;;  %v6624_v24 = vadd.f32 %v4924_v10, %v1783_v12  ;;  %v1777_v3 = vadd.f32 %v1776_v57, %v6438_v45  ;;  %v4933_v53 = vpop.f32.mrf.mxu1  ;;  %5232 = vmatmul.mubr.msk.f32.gmra.mxu1 %vm276_vm0, %v7688_v37 }
 0x1e9   :  { %v4877_v55 = vpop.f32.mrf.mxu0  ;;  %5176 = vmatmul.mubr.msk.f32.gmra.mxu0 %vm276_vm0, %v7681_v5  ;;  %5234 = vmatprep.mubr.msk.f32.mxu1 %vm276_vm0, %v7689_v36 }
 0x1ea   :  { %7687 = vst [vmem:[#allocation12_spill] sm:$0xff] %v6624_v24  ;;  %v6633_v32 = vadd.f32 %v2034_v21, %v1777_v3  ;;  %v1795_v20 = vadd.f32 %v4877_v55, %v6442_v56  ;;  %v2070_v54 = vpop.f32.mrf.mxu1  ;;  %5178 = vmatprep.mubr.msk.f32.mxu0 %vm276_vm0, %v7682_v9  ;;  %v7693_v21 = vld [vmem:[#allocation68_spill] sm:$0xff]  ;;  %v7696_v9 = vld [vmem:[#allocation67_spill] sm:$0xff] }
 0x1eb   :  { %v1788_v45 = vpop.f32.mrf.mxu0 }
 0x1ec   :  { %7690 = vst [vmem:[#allocation98_spill] sm:$0xff] %v6633_v32  ;;  %v6638_v10 = vadd.f32 %v4927_v0, %v1795_v20  ;;  %v1789_v2 = vadd.f32 %v1788_v45, %v6448_v50  ;;  %v4936_v46 = vpop.f32.mrf.mxu1  ;;  %5235 = vmatmul.mubr.msk.f32.gmra.mxu1 %vm276_vm0, %v7692_v4 }
 0x1ed   :  { %v4880_v47 = vpop.f32.mrf.mxu0  ;;  %5179 = vmatmul.mubr.msk.f32.gmra.mxu0 %vm276_vm0, %v7684_v25  ;;  %5237 = vmatprep.mubr.msk.f32.mxu1 %vm276_vm0, %v7693_v21 }
 0x1ee   :  { %7691 = vst [vmem:[#allocation15_spill] sm:$0xff] %v6638_v10  ;;  %v6647_v56 = vadd.f32 %v2046_v44, %v1789_v2  ;;  %v1807_v19 = vadd.f32 %v4880_v47, %v6452_v51  ;;  %v2082_v63 = vpop.f32.mrf.mxu1  ;;  %5181 = vmatprep.mubr.msk.f32.mxu0 %vm276_vm0, %v7685_v49  ;;  %v7697_v44 = vld [vmem:[#allocation76_spill] sm:$0xff]  ;;  %v7700_v49 = vld [vmem:[#allocation75_spill] sm:$0xff] }
 0x1ef   :  { %v1800_v50 = vpop.f32.mrf.mxu0 }
 0x1f0   :  { %7694 = vst [vmem:[#allocation18_spill] sm:$0xff] %v6647_v56  ;;  %v6652_v0 = vadd.f32 %v4930_v8, %v1807_v19  ;;  %v1801_v5 = vadd.f32 %v1800_v50, %v6458_v1  ;;  %v4939_v62 = vpop.f32.mrf.mxu1  ;;  %5238 = vmatmul.mubr.msk.f32.gmra.mxu1 %vm276_vm0, %v7696_v9 }
 0x1f1   :  { %v4883_v34 = vpop.f32.mrf.mxu0  ;;  %5182 = vmatmul.mubr.msk.f32.gmra.mxu0 %vm276_vm0, %v7688_v37  ;;  %5240 = vmatprep.mubr.msk.f32.mxu1 %vm276_vm0, %v7697_v44 }
 0x1f2   :  { %7695 = vst [vmem:[#allocation21_spill] sm:$0xff] %v6652_v0  ;;  %v6661_v51 = vadd.f32 %v2058_v28, %v1801_v5  ;;  %v1819_v18 = vadd.f32 %v4883_v34, %v6462_v38  ;;  %v2094_v26 = vpop.f32.mrf.mxu1  ;;  %5184 = vmatprep.mubr.msk.f32.mxu0 %vm276_vm0, %v7689_v36  ;;  %v7701_v28 = vld [vmem:[#allocation84_spill] sm:$0xff]  ;;  %v7704_v36 = vld [vmem:[#allocation83_spill] sm:$0xff] }
 0x1f3   :  { %v1812_v1 = vpop.f32.mrf.mxu0 }
 0x1f4   :  { %7698 = vst [vmem:[#allocation24_spill] sm:$0xff] %v6661_v51  ;;  %v6666_v8 = vadd.f32 %v4933_v53, %v1819_v18  ;;  %v1813_v25 = vadd.f32 %v1812_v1, %v6468_v52  ;;  %v4942_v16 = vpop.f32.mrf.mxu1  ;;  %5241 = vmatmul.mubr.msk.f32.gmra.mxu1 %vm276_vm0, %v7700_v49 }
 0x1f5   :  { %v4886_v12 = vpop.f32.mrf.mxu0  ;;  %5185 = vmatmul.mubr.msk.f32.gmra.mxu0 %vm276_vm0, %v7692_v4  ;;  %5243 = vmatprep.mubr.msk.f32.mxu1 %vm276_vm0, %v7701_v28 }
 0x1f6   :  { %7699 = vst [vmem:[#allocation27_spill] sm:$0xff] %v6666_v8  ;;  %v6675_v38 = vadd.f32 %v2070_v54, %v1813_v25  ;;  %v1831_v57 = vadd.f32 %v4886_v12, %v6472_v43  ;;  %v2106_v3 = vpop.f32.mrf.mxu1  ;;  %5187 = vmatprep.mubr.msk.f32.mxu0 %vm276_vm0, %v7693_v21  ;;  %v7705_v54 = vld [vmem:[#allocation92_spill] sm:$0xff]  ;;  %v7708_v21 = vld [vmem:[#allocation91_spill] sm:$0xff] }
 0x1f7   :  { %v1824_v52 = vpop.f32.mrf.mxu0 }
 0x1f8   :  { %7702 = vst [vmem:[#allocation30_spill] sm:$0xff] %v6675_v38  ;;  %v6680_v53 = vadd.f32 %v4936_v46, %v1831_v57  ;;  %v1825_v37 = vadd.f32 %v1824_v52, %v6478_v61  ;;  %v4945_v55 = vpop.f32.mrf.mxu1  ;;  %5244 = vmatmul.mubr.msk.f32.gmra.mxu1 %vm276_vm0, %v7704_v36 }
 0x1f9   :  { %v4889_v20 = vpop.f32.mrf.mxu0  ;;  %5188 = vmatmul.mubr.msk.f32.gmra.mxu0 %vm276_vm0, %v7696_v9  ;;  %5246 = vmatprep.mubr.msk.f32.mxu1 %vm276_vm0, %v7705_v54 }
 0x1fa   :  { %7703 = vst [vmem:[#allocation34_spill] sm:$0xff] %v6680_v53  ;;  %v6689_v43 = vadd.f32 %v2082_v63, %v1825_v37  ;;  %v1843_v45 = vadd.f32 %v4889_v20, %v6482_v59  ;;  %v2118_v2 = vpop.f32.mrf.mxu1  ;;  %5190 = vmatprep.mubr.msk.f32.mxu0 %vm276_vm0, %v7697_v44  ;;  %v7709_v63 = vld [vmem:[#allocation100_spill] sm:$0xff] }
 0x1fb   :  { %v1836_v61 = vpop.f32.mrf.mxu0 }
 0x1fc   :  { %7706 = vst [vmem:[#allocation37_spill] sm:$0xff] %v6689_v43  ;;  %v6694_v46 = vadd.f32 %v4939_v62, %v1843_v45  ;;  %v1837_v4 = vadd.f32 %v1836_v61, %v6488_v30  ;;  %v4948_v47 = vpop.f32.mrf.mxu1  ;;  %5247 = vmatmul.mubr.msk.f32.gmra.mxu1 %vm276_vm0, %v7708_v21 }
 0x1fd   :  { %v4892_v19 = vpop.f32.mrf.mxu0  ;;  %5191 = vmatmul.mubr.msk.f32.gmra.mxu0 %vm276_vm0, %v7700_v49  ;;  %5249 = vmatprep.mubr.msk.f32.mxu1 %vm276_vm0, %v7709_v63 }
 0x1fe   :  { %7707 = vst [vmem:[#allocation42_spill] sm:$0xff] %v6694_v46  ;;  %v6703_v59 = vadd.f32 %v2094_v26, %v1837_v4  ;;  %v1855_v50 = vadd.f32 %v4892_v19, %v6492_v13  ;;  %v2130_v5 = vpop.f32.mrf.mxu1  ;;  %5193 = vmatprep.mubr.msk.f32.mxu0 %vm276_vm0, %v7701_v28 }
 0x1ff   :  { %v1848_v30 = vpop.f32.mrf.mxu0 }
 0x200   :  { %7710 = vst [vmem:[#allocation45_spill] sm:$0xff] %v6703_v59  ;;  %v6708_v62 = vadd.f32 %v4942_v16, %v1855_v50  ;;  %v1849_v9 = vadd.f32 %v1848_v30, %v6499_v6  ;;  %v4951_v34 = vpop.f32.mrf.mxu1  ;;  %5250 = vmatmul.mubr.msk.f32.gmra.mxu1 %vm276_vm0, %v5931_v48 }
 0x201   :  { %v4895_v44 = vpop.f32.mrf.mxu0  ;;  %5194 = vmatmul.mubr.msk.f32.gmra.mxu0 %vm276_vm0, %v7704_v36 }
 0x202   :  { %7711 = vst [vmem:[#allocation50_spill] sm:$0xff] %v6708_v62  ;;  %v6715_v18 = vadd.f32 %v2106_v3, %v1849_v9  ;;  %v1867_v13 = vadd.f32 %v4895_v44, %v6504_v33  ;;  %v2142_v26 = vpop.f32.mrf.mxu1  ;;  %5196 = vmatprep.mubr.msk.f32.mxu0 %vm276_vm0, %v7705_v54 }
 0x203   :  { %v1860_v1 = vpop.f32.mrf.mxu0 }
 0x204   :  { %7712 = vst [vmem:[#allocation53_spill] sm:$0xff] %v6715_v18  ;;  %v6720_v25 = vadd.f32 %v4945_v55, %v1867_v13  ;;  %v1861_v6 = vadd.f32 %v1860_v1, %v6511_v27  ;;  %v5006_v16 = vpop.f32.mrf.mxu1 }
 0x205   :  { %v4898_v49 = vpop.f32.mrf.mxu0  ;;  %5197 = vmatmul.mubr.msk.f32.gmra.mxu0 %vm276_vm0, %v7708_v21 }
 0x206   :  { %7713 = vst [vmem:[#allocation58_spill] sm:$0xff] %v6720_v25  ;;  %v6725_v12 = vadd.f32 %v2118_v2, %v1861_v6  ;;  %v1879_v28 = vadd.f32 %v4898_v49, %v6516_v7  ;;  %v2611_v57 = vpop.f32.mrf.mxu1  ;;  %5199 = vmatprep.mubr.msk.f32.mxu0 %vm276_vm0, %v7709_v63 }
 0x207   :  { %v1872_v33 = vpop.f32.mrf.mxu0 }
 0x208   :  { %7714 = vst [vmem:[#allocation61_spill] sm:$0xff] %v6725_v12  ;;  %v6730_v3 = vadd.f32 %v4948_v47, %v1879_v28  ;;  %v1873_v52 = vadd.f32 %v1872_v33, %v6524_v17  ;;  %v5009_v37 = vpop.f32.mrf.mxu1 }
 0x209   :  { %v4901_v27 = vpop.f32.mrf.mxu0  ;;  %5200 = vmatmul.mubr.msk.f32.gmra.mxu0 %vm276_vm0, %v5931_v48 }
 0x20a   :  { %7715 = vst [vmem:[#allocation66_spill] sm:$0xff] %v6730_v3  ;;  %v6735_v55 = vadd.f32 %v2130_v5, %v1873_v52  ;;  %v1891_v36 = vadd.f32 %v4901_v27, %v6529_v41  ;;  %v2623_v20 = vpop.f32.mrf.mxu1 }
 0x20b   :  { %v1884_v7 = vpop.f32.mrf.mxu0 }
 0x20c   :  { %7716 = vst [vmem:[#allocation69_spill] sm:$0xff] %v6735_v55  ;;  %v6738_v54 = vadd.f32 %v4951_v34, %v1891_v36  ;;  %v1885_v45 = vadd.f32 %v1884_v7, %v6538_v29  ;;  %v5012_v2 = vpop.f32.mrf.mxu1 }
 0x20d   :  { %v4956_v61 = vpop.f32.mrf.mxu0 }
 0x20e   :  { %7717 = vst [vmem:[#allocation74_spill] sm:$0xff] %v6738_v54  ;;  %v6741_v4 = vadd.f32 %v2142_v26, %v1885_v45  ;;  %v6743_v17 = vadd.f32 %v5006_v16, %v4956_v61  ;;  %v2635_v47 = vpop.f32.mrf.mxu1 }
 0x20f   :  { %v2225_v21 = vpop.f32.mrf.mxu0 }
 0x210   :  { %7718 = vst [vmem:[#allocation77_spill] sm:$0xff] %v6741_v4  ;;  %v6745_v19 = vadd.f32 %v2611_v57, %v2225_v21  ;;  %v5015_v48 = vpop.f32.mrf.mxu1 }
 0x211   :  { %v4959_v63 = vpop.f32.mrf.mxu0 }
 0x212   :  { %v6747_v50 = vadd.f32 %v5009_v37, %v4959_v63  ;;  %v2647_v41 = vpop.f32.mrf.mxu1 }
 0x213   :  { %v2245_v5 = vpop.f32.mrf.mxu0 }
 0x214   :  { %v6749_v30 = vadd.f32 %v2623_v20, %v2245_v5  ;;  %v5018_v9 = vpop.f32.mrf.mxu1 }
 0x215   :  { %v4962_v29 = vpop.f32.mrf.mxu0 }
 0x216   :  { %v6751_v34 = vadd.f32 %v5012_v2, %v4962_v29  ;;  %v2659_v44 = vpop.f32.mrf.mxu1 }
 0x217   :  { %v2265_v13 = vpop.f32.mrf.mxu0 }
 0x218   :  { %v6753_v26 = vadd.f32 %v2635_v47, %v2265_v13  ;;  %v5021_v1 = vpop.f32.mrf.mxu1 }
 0x219   :  { %v4965_v6 = vpop.f32.mrf.mxu0 }
 0x21a   :  { %v6755_v16 = vadd.f32 %v5015_v48, %v4965_v6  ;;  %v2671_v49 = vpop.f32.mrf.mxu1 }
 0x21b   :  { %v2285_v28 = vpop.f32.mrf.mxu0 }
 0x21c   :  { %v6757_v57 = vadd.f32 %v2647_v41, %v2285_v28  ;;  %v5024_v33 = vpop.f32.mrf.mxu1 }
 0x21d   :  { %v4968_v52 = vpop.f32.mrf.mxu0 }
 0x21e   :  { %v6759_v37 = vadd.f32 %v5018_v9, %v4968_v52  ;;  %v2683_v27 = vpop.f32.mrf.mxu1 }
 0x21f   :  { %v2305_v36 = vpop.f32.mrf.mxu0 }
 0x220   :  { %v6761_v20 = vadd.f32 %v2659_v44, %v2305_v36  ;;  %v5027_v7 = vpop.f32.mrf.mxu1 }
 0x221   :  { %v4971_v45 = vpop.f32.mrf.mxu0 }
 0x222   :  { %v6763_v2 = vadd.f32 %v5021_v1, %v4971_v45  ;;  %v2695_v61 = vpop.f32.mrf.mxu1 }
 0x223   :  { %v2325_v47 = vpop.f32.mrf.mxu0 }
 0x224   :  { %v6765_v21 = vadd.f32 %v2671_v49, %v2325_v47  ;;  %v5030_v48 = vpop.f32.mrf.mxu1 }
 0x225   :  { %v4974_v63 = vpop.f32.mrf.mxu0 }
 0x226   :  { %v6767_v41 = vadd.f32 %v5024_v33, %v4974_v63  ;;  %v2707_v5 = vpop.f32.mrf.mxu1 }
 0x227   :  { %v2345_v29 = vpop.f32.mrf.mxu0 }
 0x228   :  { %v6769_v9 = vadd.f32 %v2683_v27, %v2345_v29  ;;  %v5033_v13 = vpop.f32.mrf.mxu1 }
 0x229   :  { %v4977_v6 = vpop.f32.mrf.mxu0 }
 0x22a   :  { %v6771_v44 = vadd.f32 %v5027_v7, %v4977_v6  ;;  %v2719_v28 = vpop.f32.mrf.mxu1 }
 0x22b   :  { %v2365_v52 = vpop.f32.mrf.mxu0 }
 0x22c   :  { %7719 = vst [vmem:[#allocation82_spill] sm:$0xff] %v6771_v44  ;;  %v6773_v1 = vadd.f32 %v2695_v61, %v2365_v52  ;;  %v5036_v36 = vpop.f32.mrf.mxu1 }
 0x22d   :  { %v4980_v45 = vpop.f32.mrf.mxu0 }
 0x22e   :  { %7720 = vst [vmem:[#allocation85_spill] sm:$0xff] %v6773_v1  ;;  %v6775_v49 = vadd.f32 %v5030_v48, %v4980_v45  ;;  %v2731_v47 = vpop.f32.mrf.mxu1 }
 0x22f   :  { %v2385_v4 = vpop.f32.mrf.mxu0 }
 0x230   :  { %7721 = vst [vmem:[#allocation90_spill] sm:$0xff] %v6775_v49  ;;  %v6777_v33 = vadd.f32 %v2707_v5, %v2385_v4  ;;  %v5039_v63 = vpop.f32.mrf.mxu1 }
 0x231   :  { %v4983_v54 = vpop.f32.mrf.mxu0 }
 0x232   :  { %7722 = vst [vmem:[#allocation93_spill] sm:$0xff] %v6777_v33  ;;  %v6779_v27 = vadd.f32 %v5033_v13, %v4983_v54  ;;  %v2743_v29 = vpop.f32.mrf.mxu1 }
 0x233   :  { %v2405_v55 = vpop.f32.mrf.mxu0 }
 0x234   :  { %7723 = vst [vmem:[#allocation99_spill] sm:$0xff] %v6779_v27  ;;  %v6781_v7 = vadd.f32 %v2719_v28, %v2405_v55  ;;  %v5042_v6 = vpop.f32.mrf.mxu1 }
 0x235   :  { %v4986_v3 = vpop.f32.mrf.mxu0 }
 0x236   :  { %7724 = vst [vmem:[#allocation101_spill] sm:$0xff] %v6781_v7  ;;  %v6783_v61 = vadd.f32 %v5036_v36, %v4986_v3  ;;  %v2755_v52 = vpop.f32.mrf.mxu1 }
 0x237   :  { %v2425_v12 = vpop.f32.mrf.mxu0 }
 0x238   :  { %7725 = vst [vmem:[#allocation106_spill] sm:$0xff] %v6783_v61  ;;  %v6785_v48 = vadd.f32 %v2731_v47, %v2425_v12  ;;  %v5045_v45 = vpop.f32.mrf.mxu1 }
 0x239   :  { %v4989_v25 = vpop.f32.mrf.mxu0 }
 0x23a   :  { %7726 = vst [vmem:[#allocation13_spill] sm:$0xff] %v6785_v48  ;;  %v6787_v4 = vadd.f32 %v5039_v63, %v4989_v25  ;;  %v2767_v5 = vpop.f32.mrf.mxu1 }
 0x23b   :  { %v2445_v18 = vpop.f32.mrf.mxu0 }
 0x23c   :  { %7727 = vst [vmem:[#allocation31_spill] sm:$0xff] %v6787_v4  ;;  %v6789_v54 = vadd.f32 %v2743_v29, %v2445_v18  ;;  %v5048_v13 = vpop.f32.mrf.mxu1 }
 0x23d   :  { %v4992_v62 = vpop.f32.mrf.mxu0 }
 0x23e   :  { %7728 = vst [vmem:[#allocation14_spill] sm:$0xff] %v6789_v54  ;;  %v6791_v55 = vadd.f32 %v5042_v6, %v4992_v62  ;;  %v2779_v28 = vpop.f32.mrf.mxu1 }
 0x23f   :  { %v2465_v59 = vpop.f32.mrf.mxu0 }
 0x240   :  { %7729 = vst [vmem:[#allocation38_spill] sm:$0xff] %v6791_v55  ;;  %v6793_v3 = vadd.f32 %v2755_v52, %v2465_v59  ;;  %v5051_v36 = vpop.f32.mrf.mxu1 }
 0x241   :  { %v4995_v46 = vpop.f32.mrf.mxu0 }
 0x242   :  { %7730 = vst [vmem:[#allocation19_spill] sm:$0xff] %v6793_v3  ;;  %v6795_v12 = vadd.f32 %v5045_v45, %v4995_v46  ;;  %v2791_v47 = vpop.f32.mrf.mxu1 }
 0x243   :  { %v2485_v43 = vpop.f32.mrf.mxu0 }
 0x244   :  { %7731 = vst [vmem:[#allocation39_spill] sm:$0xff] %v6795_v12  ;;  %v6797_v25 = vadd.f32 %v2767_v5, %v2485_v43  ;;  %v6799_v63 = vpop.f32.mrf.mxu1 }
 0x245   :  { %v4998_v18 = vpop.f32.mrf.mxu0 }
 0x246   :  { %7732 = vst [vmem:[#allocation20_spill] sm:$0xff] %v6797_v25  ;;  %v6801_v29 = vadd.f32 %v5048_v13, %v4998_v18  ;;  %v6803_v53 = vpop.f32.mrf.mxu1 }
 0x247   :  { %v2505_v62 = vpop.f32.mrf.mxu0 }
 0x248   :  { %7733 = vst [vmem:[#allocation46_spill] sm:$0xff] %v6801_v29  ;;  %v6805_v6 = vadd.f32 %v2779_v28, %v2505_v62  ;;  %v6807_v59 = vpop.f32.mrf.mxu1 }
 0x249   :  { %v5001_v52 = vpop.f32.mrf.mxu0 }
 0x24a   :  { %7734 = vst [vmem:[#allocation25_spill] sm:$0xff] %v6805_v6  ;;  %v6809_v3 = vadd.f32 %v5051_v36, %v5001_v52  ;;  %v6811_v46 = vpop.f32.mrf.mxu1 }
 0x24b   :  { %v2525_v45 = vpop.f32.mrf.mxu0 }
 0x24c   :  { %7735 = vst [vmem:[#allocation47_spill] sm:$0xff] %v6809_v3  ;;  %v6813_v43 = vadd.f32 %v2791_v47, %v2525_v45  ;;  %v6815_v5 = vpop.f32.mrf.mxu1 }
 0x24d   :  { %v5056_v25 = vpop.f32.mrf.mxu0 }
 0x24e   :  { %7736 = vst [vmem:[#allocation26_spill] sm:$0xff] %v6813_v43  ;;  %v6817_v13 = vpop.f32.mrf.mxu1 }
 0x24f   :  { %v2871_v18 = vpop.f32.mrf.mxu0 }
 0x250   :  { %v6819_v29 = vpop.f32.mrf.mxu1 }
 0x251   :  { %v5059_v28 = vpop.f32.mrf.mxu0 }
 0x252   :  { %v6821_v62 = vpop.f32.mrf.mxu1 }
 0x253   :  { %v6823_v6 = vpop.f32.mrf.mxu0 }
 0x254   :  { %v6825_v36 = vpop.f32.mrf.mxu1 }
 0x255   :  { %v6827_v52 = vpop.f32.mrf.mxu0 }
 0x256   :  { %v6829_v3 = vpop.f32.mrf.mxu1 }
 0x257   :  { %v6831_v47 = vpop.f32.mrf.mxu0 }
 0x258   :  { %v6833_v45 = vpop.f32.mrf.mxu1 }
 0x259   :  { %v6835_v43 = vpop.f32.mrf.mxu0 }
 0x25a   :  { %v6837_v12 = vpop.f32.mrf.mxu1 }
 0x25b   :  { %7737 = vst [vmem:[#allocation54_spill] sm:$0xff] %v6837_v12  ;;  %v6839_v55 = vpop.f32.mrf.mxu0 }
 0x25c   :  { %v6841_v54 = vpop.f32.mrf.mxu1 }
 0x25d   :  { %7738 = vst [vmem:[#allocation32_spill] sm:$0xff] %v6841_v54  ;;  %v6843_v38 = vpop.f32.mrf.mxu0 }
 0x25e   :  { %v6845_v4 = vpop.f32.mrf.mxu1 }
 0x25f   :  { %7739 = vst [vmem:[#allocation55_spill] sm:$0xff] %v6845_v4  ;;  %v6847_v8 = vpop.f32.mrf.mxu0 }
 0x260   :  { %v6849_v48 = vpop.f32.mrf.mxu1 }
 0x261   :  { %7740 = vst [vmem:[#allocation33_spill] sm:$0xff] %v6849_v48  ;;  %v6851_v51 = vpop.f32.mrf.mxu0 }
 0x262   :  { %v6853_v61 = vpop.f32.mrf.mxu1 }
 0x263   :  { %7741 = vst [vmem:[#allocation62_spill] sm:$0xff] %v6853_v61  ;;  %v6855_v0 = vpop.f32.mrf.mxu0 }
 0x264   :  { %v6857_v7 = vpop.f32.mrf.mxu1 }
 0x265   :  { %7742 = vst [vmem:[#allocation40_spill] sm:$0xff] %v6857_v7  ;;  %v6859_v56 = vpop.f32.mrf.mxu0 }
 0x266   :  { %v6861_v27 = vpop.f32.mrf.mxu1 }
 0x267   :  { %7743 = vst [vmem:[#allocation63_spill] sm:$0xff] %v6861_v27  ;;  %v6863_v10 = vpop.f32.mrf.mxu0 }
 0x268   :  { %7744 = vst [vmem:[#allocation41_spill] sm:$0xff] %v6863_v10  ;;  %v6865_v33 = vpop.f32.mrf.mxu1 }
 0x269   :  { %7745 = vst [vmem:[#allocation70_spill] sm:$0xff] %v6865_v33  ;;  %v6867_v32 = vpop.f32.mrf.mxu0 }
 0x26a   :  { %7746 = vst [vmem:[#allocation48_spill] sm:$0xff] %v6867_v32  ;;  %v6869_v49 = vpop.f32.mrf.mxu1 }
 0x26b   :  { %7747 = vst [vmem:[#allocation71_spill] sm:$0xff] %v6869_v49  ;;  %v6871_v48 = vpop.f32.mrf.mxu0 }
 0x26c   :  { %7748 = vst [vmem:[#allocation49_spill] sm:$0xff] %v6871_v48  ;;  %v6873_v24 = vpop.f32.mrf.mxu1 }
 0x26d   :  { %7749 = vst [vmem:[#allocation78_spill] sm:$0xff] %v6873_v24  ;;  %v6875_v61 = vpop.f32.mrf.mxu0 }
 0x26e   :  { %7750 = vst [vmem:[#allocation56_spill] sm:$0xff] %v6875_v61  ;;  %v6877_v1 = vpop.f32.mrf.mxu1 }
 0x26f   :  { %7751 = vst [vmem:[#allocation79_spill] sm:$0xff] %v6877_v1  ;;  %v6879_v7 = vpop.f32.mrf.mxu0 }
 0x270   :  { %7752 = vst [vmem:[#allocation57_spill] sm:$0xff] %v6879_v7  ;;  %v6881_v4 = vpop.f32.mrf.mxu1 }
 0x271   :  { %7753 = vst [vmem:[#allocation86_spill] sm:$0xff] %v6881_v4  ;;  %v6883_v27 = vpop.f32.mrf.mxu0 }
 0x272   :  { %7754 = vst [vmem:[#allocation64_spill] sm:$0xff] %v6883_v27  ;;  %v6885_v40 = vpop.f32.mrf.mxu1 }
 0x273   :  { %7755 = vst [vmem:[#allocation87_spill] sm:$0xff] %v6885_v40  ;;  %v6887_v33 = vpop.f32.mrf.mxu0 }
 0x274   :  { %7756 = vst [vmem:[#allocation65_spill] sm:$0xff] %v6887_v33  ;;  %v6889_v32 = vpop.f32.mrf.mxu1 }
 0x275   :  { %7757 = vst [vmem:[#allocation94_spill] sm:$0xff] %v6889_v32  ;;  %v6891_v49 = vpop.f32.mrf.mxu0 }
 0x276   :  { %7758 = vst [vmem:[#allocation72_spill] sm:$0xff] %v6891_v49  ;;  %v6893_v48 = vpop.f32.mrf.mxu1 }
 0x277   :  { %7759 = vst [vmem:[#allocation95_spill] sm:$0xff] %v6893_v48  ;;  %v6895_v24 = vpop.f32.mrf.mxu0 }
 0x278   :  { %7760 = vst [vmem:[#allocation73_spill] sm:$0xff] %v6895_v24  ;;  %v6897_v61 = vpop.f32.mrf.mxu1 }
 0x279   :  { %7761 = vst [vmem:[#allocation102_spill] sm:$0xff] %v6897_v61  ;;  %v6899_v1 = vpop.f32.mrf.mxu0 }
 0x27a   :  { %7762 = vst [vmem:[#allocation80_spill] sm:$0xff] %v6899_v1  ;;  %v6901_v7 = vpop.f32.mrf.mxu1 }
 0x27b   :  { %7763 = vst [vmem:[#allocation103_spill] sm:$0xff] %v6901_v7  ;;  %v6903_v4 = vpop.f32.mrf.mxu0 }
 0x27c   :  { %7764 = vst [vmem:[#allocation81_spill] sm:$0xff] %v6903_v4  ;;  %v6905_v27 = vpop.f32.mrf.mxu1 }
 0x27d   :  { %7765 = vst [vmem:[#allocation107_spill] sm:$0xff] %v6905_v27  ;;  %v6907_v40 = vpop.f32.mrf.mxu0  ;;  %v2879_v27 = vadd.f32 %v5056_v25, %v6743_v17  ;;  %v17_v17 = vld [vmem:[%s7249_s1] sm:$0xff] }
 0x27e   :  { %7766 = vst [vmem:[#allocation88_spill] sm:$0xff] %v6907_v40  ;;  %v6909_v33 = vpop.f32.mrf.mxu1 }
 0x27f   :  { %7767 = vst [vmem:[#allocation108_spill] sm:$0xff] %v6909_v33  ;;  %v6911_v32 = vpop.f32.mrf.mxu0 }
 0x280   :  { %7768 = vst [vmem:[#allocation89_spill] sm:$0xff] %v6911_v32  ;;  %v6913_v49 = vpop.f32.mrf.mxu1  ;;  %v2872_v32 = vadd.f32 %v2871_v18, %v6745_v19  ;;  %v2886_v19 = vadd.f32 %v6823_v6, %v6749_v30  ;;  %v3932_v30 = vmul.f32 %v6549_v22, %v17_v17  ;;  %v22_v22 = vld [vmem:[%s7249_s1 + $0x28] sm:$0xff] }
 0x281   :  { %7769 = vst [vmem:[#allocation3_spill] sm:$0xff] %v6913_v49  ;;  %v6915_v48 = vpop.f32.mrf.mxu0 }
 0x282   :  { %7770 = vst [vmem:[#allocation96_spill] sm:$0xff] %v6915_v48  ;;  %v6917_v24 = vpop.f32.mrf.mxu1 }
 0x283   :  { %7771 = vst [vmem:[#allocation5_spill] sm:$0xff] %v6917_v24  ;;  %v6919_v61 = vpop.f32.mrf.mxu0  ;;  %v2893_v24 = vadd.f32 %v5059_v28, %v6747_v50  ;;  %v2907_v50 = vadd.f32 %v6827_v52, %v6751_v34  ;;  %v20_v28 = vld [vmem:[%s7249_s1 + $0x18] sm:$0xff]  ;;  %v19_v34 = vld [vmem:[%s7249_s1 + $0x10] sm:$0xff] }
 0x284   :  { %7772 = vst [vmem:[#allocation97_spill] sm:$0xff] %v6919_v61  ;;  %v5206_v1 = vpop.f32.mrf.mxu1  ;;  %v3171_v61 = vadd.f32 %v6799_v63, %v2879_v27 }
 0x285   :  { %v6921_v7 = vpop.f32.mrf.mxu0  ;;  %v3187_v10 = vadd.f32 %v6807_v59, %v2893_v24  ;;  %v3203_v24 = vadd.f32 %v6815_v5, %v2907_v50  ;;  %v21_v5 = vld [vmem:[%s7249_s1 + $0x20] sm:$0xff] }
 0x286   :  { %7773 = vst [vmem:[#allocation2_spill] sm:$0xff] %v6921_v7  ;;  %v3742_v4 = vpop.f32.mrf.mxu1  ;;  %v18_v7 = vld [vmem:[%s7249_s1 + $0x8] sm:$0xff] }
 0x287   :  { %v6923_v44 = vpop.f32.mrf.mxu0  ;;  %v3933_v63 = vmul.f32 %v6540_v42, %v18_v7 }
 0x288   :  { %7774 = vst [vmem:[#allocation104_spill] sm:$0xff] %v6923_v44  ;;  %v5209_v40 = vpop.f32.mrf.mxu1 }
 0x289   :  { %v6926_v33 = vpop.f32.mrf.mxu0 }
 0x28a   :  { %7775 = vst [vmem:[#allocation4_spill] sm:$0xff] %v6926_v33  ;;  %v3754_v49 = vpop.f32.mrf.mxu1 }
 0x28b   :  { %v6929_v54 = vpop.f32.mrf.mxu0 }
 0x28c   :  { %7776 = vst [vmem:[#allocation105_spill] sm:$0xff] %v6929_v54  ;;  %v5212_v48 = vpop.f32.mrf.mxu1  ;;  %v3163_v54 = vadd.f32 %v6803_v53, %v2872_v32  ;;  %v2900_v32 = vadd.f32 %v6831_v47, %v6753_v26  ;;  %v2921_v26 = vadd.f32 %v6835_v43, %v6755_v16  ;;  %v2914_v16 = vadd.f32 %v6839_v55, %v6757_v57 }
 0x28d   :  { %v5156_v44 = vpop.f32.mrf.mxu0 }
 0x28e   :  { %v3491_v25 = vadd.f32 %v5156_v44, %v3171_v61  ;;  %v3766_v18 = vpop.f32.mrf.mxu1  ;;  %v3219_v50 = vadd.f32 %v6819_v29, %v2921_v26  ;;  %v3211_v29 = vadd.f32 %v6821_v62, %v2914_v16 }
 0x28f   :  { %v3484_v27 = vpop.f32.mrf.mxu0 }
 0x290   :  { %v3749_v33 = vadd.f32 %v5206_v1, %v3491_v25  ;;  %v3485_v39 = vadd.f32 %v3484_v27, %v3163_v54  ;;  %v5215_v12 = vpop.f32.mrf.mxu1  ;;  %v3179_v1 = vadd.f32 %v6811_v46, %v2886_v19  ;;  %v3935_v54 = vmul.f32 %v6554_v31, %v20_v28  ;;  %v24_v19 = vld [vmem:[%s7249_s1 + $0x38] sm:$0xff]  ;;  %v23_v27 = vld [vmem:[%s7249_s1 + $0x30] sm:$0xff] }
 0x291   :  { %v5159_v53 = vpop.f32.mrf.mxu0  ;;  %v3934_v31 = vmul.f32 %v6563_v11, %v19_v34  ;;  %v3195_v46 = vadd.f32 %v6817_v13, %v2900_v32  ;;  %v3937_v11 = vmul.f32 %v6568_v15, %v22_v22  ;;  %v2935_v13 = vadd.f32 %v6843_v38, %v6759_v37 }
 0x292   :  { %v3965_v42 = vadd.f32 %v3933_v63, %v3749_v33  ;;  %v3743_v44 = vadd.f32 %v3742_v4, %v3485_v39  ;;  %v3503_v7 = vadd.f32 %v5159_v53, %v3187_v10  ;;  %v3778_v61 = vpop.f32.mrf.mxu1  ;;  %v3936_v15 = vmul.f32 %v6577_v58, %v21_v5  ;;  %v7779_v5 = vld [vmem:[#allocation8_spill] sm:$0xff] }
 0x293   :  { %v3496_v6 = vpop.f32.mrf.mxu0  ;;  %v2928_v38 = vadd.f32 %v6847_v8, %v6761_v20  ;;  %v3939_v58 = vmul.f32 %v6582_v14, %v24_v19  ;;  %v3235_v8 = vadd.f32 %v6825_v36, %v2935_v13  ;;  %v26_v20 = vld [vmem:[%s7249_s1 + $0x48] sm:$0xff]  ;;  %v2949_v53 = vadd.f32 %v6851_v51, %v6763_v2 }
 0x294   :  { %3997 = vst [vmem:[%s7250_s4 + $0x8] sm:$0xff] %v3965_v42  ;;  %v3964_v39 = vadd.f32 %v3932_v30, %v3743_v44  ;;  %v3761_v10 = vadd.f32 %v5209_v40, %v3503_v7  ;;  %v3497_v33 = vadd.f32 %v3496_v6, %v3179_v1  ;;  %v5218_v4 = vpop.f32.mrf.mxu1  ;;  %v3938_v14 = vmul.f32 %v6591_v35, %v23_v27  ;;  %v25_v7 = vld [vmem:[%s7249_s1 + $0x40] sm:$0xff]  ;;  %v7785_v27 = vld [vmem:[#allocation85_spill] sm:$0xff] }
 0x295   :  { %v5162_v59 = vpop.f32.mrf.mxu0  ;;  %v3227_v36 = vadd.f32 %v6829_v3, %v2928_v38  ;;  %v2942_v51 = vadd.f32 %v6855_v0, %v6765_v21  ;;  %v3941_v35 = vmul.f32 %v6596_v23, %v26_v20  ;;  %v2963_v3 = vadd.f32 %v6859_v56, %v6767_v41  ;;  %v7788_v20 = vld [vmem:[#allocation90_spill] sm:$0xff] }
 0x296   :  { %3996 = vst [vmem:[%s7250_s4] sm:$0xff] %v3964_v39  ;;  %v3967_v43 = vadd.f32 %v3935_v54, %v3761_v10  ;;  %v3755_v40 = vadd.f32 %v3754_v49, %v3497_v33  ;;  %v3515_v52 = vadd.f32 %v5162_v59, %v3203_v24  ;;  %v3790_v47 = vpop.f32.mrf.mxu1  ;;  %v28_v24 = vld [vmem:[%s7249_s1 + $0x58] sm:$0xff]  ;;  %v3251_v26 = vadd.f32 %v6833_v45, %v2949_v53  ;;  %v27_v10 = vld [vmem:[%s7249_s1 + $0x50] sm:$0xff] }
 0x297   :  { %v3508_v17 = vpop.f32.mrf.mxu0  ;;  %v3940_v23 = vmul.f32 %v6605_v60, %v25_v7  ;;  %v7777_v39 = vld [vmem:[#allocation41_spill] sm:$0xff]  ;;  %v3943_v60 = vmul.f32 %v7779_v5, %v28_v24  ;;  %v7789_v53 = vld [vmem:[#allocation56_spill] sm:$0xff] }
 0x298   :  { %3999 = vst [vmem:[%s7250_s4 + $0x18] sm:$0xff] %v3967_v43  ;;  %v3966_v57 = vadd.f32 %v3934_v31, %v3755_v40  ;;  %v3773_v55 = vadd.f32 %v5212_v48, %v3515_v52  ;;  %v3509_v25 = vadd.f32 %v3508_v17, %v3195_v46  ;;  %v5221_v49 = vpop.f32.mrf.mxu1  ;;  %v2956_v56 = vadd.f32 %v7777_v39, %v6769_v9  ;;  %v7778_v46 = vld [vmem:[#allocation54_spill] sm:$0xff]  ;;  %v7780_v43 = vld [vmem:[#allocation32_spill] sm:$0xff]  ;;  %v30_v40 = vld [vmem:[%s7249_s1 + $0x68] sm:$0xff] }
 0x299   :  { %v5165_v37 = vpop.f32.mrf.mxu0  ;;  %v3243_v45 = vadd.f32 %v7778_v46, %v2942_v51  ;;  %v3267_v9 = vadd.f32 %v7780_v43, %v2963_v3  ;;  %v7781_v52 = vld [vmem:[#allocation82_spill] sm:$0xff]  ;;  %v7790_v7 = vld [vmem:[#allocation33_spill] sm:$0xff]  ;;  %v31_v24 = vld [vmem:[%s7249_s1 + $0x70] sm:$0xff] }
 0x29a   :  { %3998 = vst [vmem:[%s7250_s4 + $0x10] sm:$0xff] %v3966_v57  ;;  %v3969_v63 = vadd.f32 %v3937_v11, %v3773_v55  ;;  %v3767_v48 = vadd.f32 %v3766_v18, %v3509_v25  ;;  %v3527_v28 = vadd.f32 %v5165_v37, %v3219_v50  ;;  %v3802_v30 = vpop.f32.mrf.mxu1  ;;  %v7782_v11 = vld [vmem:[#allocation48_spill] sm:$0xff]  ;;  %v7783_v55 = vld [vmem:[#allocation11_spill] sm:$0xff]  ;;  %v29_v37 = vld [vmem:[%s7249_s1 + $0x60] sm:$0xff] }
 0x29b   :  { %v3520_v32 = vpop.f32.mrf.mxu0  ;;  %v2977_v13 = vadd.f32 %v7782_v11, %v7781_v52  ;;  %v3942_v25 = vmul.f32 %v7783_v55, %v27_v10  ;;  %v7795_v39 = vld [vmem:[#allocation15_spill] sm:$0xff]  ;;  %v7796_v10 = vld [vmem:[#allocation40_spill] sm:$0xff]  ;;  %v7799_v43 = vld [vmem:[#allocation18_spill] sm:$0xff] }
 0x29c   :  { %4001 = vst [vmem:[%s7250_s4 + $0x28] sm:$0xff] %v3969_v63  ;;  %v3968_v18 = vadd.f32 %v3936_v15, %v3767_v48  ;;  %v3785_v34 = vadd.f32 %v5215_v12, %v3527_v28  ;;  %v3521_v42 = vadd.f32 %v3520_v32, %v3211_v29  ;;  %v5224_v62 = vpop.f32.mrf.mxu1  ;;  %v7784_v15 = vld [vmem:[#allocation55_spill] sm:$0xff]  ;;  %v7786_v63 = vld [vmem:[#allocation49_spill] sm:$0xff]  ;;  %v7787_v32 = vld [vmem:[#allocation12_spill] sm:$0xff] }
 0x29d   :  { %v5168_v44 = vpop.f32.mrf.mxu0  ;;  %v3259_v38 = vadd.f32 %v7784_v15, %v2956_v56  ;;  %v2970_v48 = vadd.f32 %v7786_v63, %v7785_v27  ;;  %v3283_v51 = vadd.f32 %v7790_v7, %v2977_v13  ;;  %v7798_v46 = vld [vmem:[#allocation64_spill] sm:$0xff]  ;;  %v7800_v52 = vld [vmem:[#allocation63_spill] sm:$0xff]  ;;  %v33_v13 = vld [vmem:[%s7249_s1 + $0x80] sm:$0xff] }
 0x29e   :  { %4000 = vst [vmem:[%s7250_s4 + $0x20] sm:$0xff] %v3968_v18  ;;  %v3971_v2 = vadd.f32 %v3939_v58, %v3785_v34  ;;  %v3779_v12 = vadd.f32 %v3778_v61, %v3521_v42  ;;  %v3539_v1 = vadd.f32 %v5168_v44, %v3235_v8  ;;  %v3814_v54 = vpop.f32.mrf.mxu1  ;;  %v3945_v8 = vmul.f32 %v7787_v32, %v30_v40  ;;  %v32_v42 = vld [vmem:[%s7249_s1 + $0x78] sm:$0xff]  ;;  %v7805_v27 = vld [vmem:[#allocation72_spill] sm:$0xff] }
 0x29f   :  { %v3532_v6 = vpop.f32.mrf.mxu0  ;;  %v2991_v18 = vadd.f32 %v7789_v53, %v7788_v20  ;;  %v3947_v56 = vmul.f32 %v7795_v39, %v32_v42  ;;  %v7803_v15 = vld [vmem:[#allocation21_spill] sm:$0xff]  ;;  %v7807_v53 = vld [vmem:[#allocation24_spill] sm:$0xff] }
 0x2a0   :  { %4003 = vst [vmem:[%s7250_s4 + $0x38] sm:$0xff] %v3971_v2  ;;  %v3970_v0 = vadd.f32 %v3938_v14, %v3779_v12  ;;  %v3797_v21 = vadd.f32 %v5218_v4, %v3539_v1  ;;  %v3533_v22 = vadd.f32 %v3532_v6, %v3227_v36  ;;  %v5227_v61 = vpop.f32.mrf.mxu1  ;;  %v7791_v2 = vld [vmem:[#allocation98_spill] sm:$0xff]  ;;  %v7792_v1 = vld [vmem:[#allocation93_spill] sm:$0xff] }
 0x2a1   :  { %v5171_v41 = vpop.f32.mrf.mxu0  ;;  %v3944_v12 = vmul.f32 %v7791_v2, %v29_v37  ;;  %v7804_v37 = vld [vmem:[#allocation106_spill] sm:$0xff]  ;;  %v7809_v42 = vld [vmem:[#allocation73_spill] sm:$0xff] }
 0x2a2   :  { %4002 = vst [vmem:[%s7250_s4 + $0x30] sm:$0xff] %v3970_v0  ;;  %v3973_v33 = vadd.f32 %v3941_v35, %v3797_v21  ;;  %v3791_v4 = vadd.f32 %v3790_v47, %v3533_v22  ;;  %v3551_v31 = vadd.f32 %v5171_v41, %v3251_v26  ;;  %v3826_v59 = vpop.f32.mrf.mxu1  ;;  %v7793_v35 = vld [vmem:[#allocation57_spill] sm:$0xff]  ;;  %v7794_v26 = vld [vmem:[#allocation62_spill] sm:$0xff]  ;;  %v3019_v63 = vadd.f32 %v7805_v27, %v7804_v37 }
 0x2a3   :  { %v3544_v16 = vpop.f32.mrf.mxu0  ;;  %v2984_v3 = vadd.f32 %v7793_v35, %v7792_v1  ;;  %v7811_v35 = vld [vmem:[#allocation27_spill] sm:$0xff]  ;;  %v7823_v37 = vld [vmem:[#allocation37_spill] sm:$0xff] }
 0x2a4   :  { %4005 = vst [vmem:[%s7250_s4 + $0x48] sm:$0xff] %v3973_v33  ;;  %v3972_v47 = vadd.f32 %v3940_v23, %v3791_v4  ;;  %v3809_v17 = vadd.f32 %v5221_v49, %v3551_v31  ;;  %v3545_v19 = vadd.f32 %v3544_v16, %v3243_v45  ;;  %v5230_v57 = vpop.f32.mrf.mxu1  ;;  %v3275_v23 = vadd.f32 %v7794_v26, %v2970_v48  ;;  %v34_v4 = vld [vmem:[%s7249_s1 + $0x88] sm:$0xff]  ;;  %v7814_v26 = vld [vmem:[#allocation80_spill] sm:$0xff] }
 0x2a5   :  { %v5174_v50 = vpop.f32.mrf.mxu0  ;;  %v3299_v33 = vadd.f32 %v7796_v10, %v2991_v18  ;;  %v7797_v31 = vld [vmem:[#allocation99_spill] sm:$0xff]  ;;  %v3291_v11 = vadd.f32 %v7800_v52, %v2984_v3  ;;  %v3948_v18 = vmul.f32 %v7807_v53, %v33_v13  ;;  %v7815_v10 = vld [vmem:[#allocation30_spill] sm:$0xff] }
 0x2a6   :  { %4004 = vst [vmem:[%s7250_s4 + $0x40] sm:$0xff] %v3972_v47  ;;  %v3975_v28 = vadd.f32 %v3943_v60, %v3809_v17  ;;  %v3803_v49 = vadd.f32 %v3802_v30, %v3545_v19  ;;  %v3563_v29 = vadd.f32 %v5174_v50, %v3267_v9  ;;  %v3838_v58 = vpop.f32.mrf.mxu1  ;;  %v3005_v45 = vadd.f32 %v7798_v46, %v7797_v31  ;;  %v7801_v47 = vld [vmem:[#allocation101_spill] sm:$0xff]  ;;  %v7816_v31 = vld [vmem:[#allocation79_spill] sm:$0xff]  ;;  %v7819_v52 = vld [vmem:[#allocation34_spill] sm:$0xff] }
 0x2a7   :  { %v3556_v34 = vpop.f32.mrf.mxu0  ;;  %v3946_v9 = vmul.f32 %v7799_v43, %v31_v24  ;;  %v7802_v17 = vld [vmem:[#allocation65_spill] sm:$0xff]  ;;  %v7812_v24 = vld [vmem:[#allocation78_spill] sm:$0xff]  ;;  %v7826_v53 = vld [vmem:[#allocation87_spill] sm:$0xff] }
 0x2a8   :  { %4007 = vst [vmem:[%s7250_s4 + $0x58] sm:$0xff] %v3975_v28  ;;  %v3974_v14 = vadd.f32 %v3942_v25, %v3803_v49  ;;  %v3821_v44 = vadd.f32 %v5224_v62, %v3563_v29  ;;  %v3557_v36 = vadd.f32 %v3556_v34, %v3259_v38  ;;  %v5233_v30 = vpop.f32.mrf.mxu1  ;;  %v2998_v19 = vadd.f32 %v7802_v17, %v7801_v47  ;;  %v36_v28 = vld [vmem:[%s7249_s1 + $0x98] sm:$0xff]  ;;  %v7820_v13 = vld [vmem:[#allocation38_spill] sm:$0xff]  ;;  %v7821_v47 = vld [vmem:[#allocation88_spill] sm:$0xff] }
 0x2a9   :  { %v5177_v6 = vpop.f32.mrf.mxu0  ;;  %v3949_v38 = vmul.f32 %v7803_v15, %v34_v4  ;;  %v7808_v34 = vld [vmem:[#allocation13_spill] sm:$0xff]  ;;  %v3951_v3 = vmul.f32 %v7811_v35, %v36_v28  ;;  %v3047_v17 = vadd.f32 %v7821_v47, %v7820_v13  ;;  %v7841_v47 = vld [vmem:[#allocation104_spill] sm:$0xff] }
 0x2aa   :  { %4006 = vst [vmem:[%s7250_s4 + $0x50] sm:$0xff] %v3974_v14  ;;  %v3977_v0 = vadd.f32 %v3945_v8, %v3821_v44  ;;  %v3815_v62 = vadd.f32 %v3814_v54, %v3557_v36  ;;  %v3575_v21 = vadd.f32 %v5177_v6, %v3283_v51  ;;  %v3850_v22 = vpop.f32.mrf.mxu1  ;;  %v7806_v8 = vld [vmem:[#allocation70_spill] sm:$0xff]  ;;  %v3012_v14 = vadd.f32 %v7809_v42, %v7808_v34  ;;  %v35_v36 = vld [vmem:[%s7249_s1 + $0x90] sm:$0xff]  ;;  %v7840_v13 = vld [vmem:[#allocation25_spill] sm:$0xff] }
 0x2ab   :  { %v3568_v41 = vpop.f32.mrf.mxu0  ;;  %v3315_v20 = vadd.f32 %v7806_v8, %v3005_v45  ;;  %v37_v45 = vld [vmem:[%s7249_s1 + $0xa0] sm:$0xff] }
 0x2ac   :  { %4009 = vst [vmem:[%s7250_s4 + $0x68] sm:$0xff] %v3977_v0  ;;  %v3976_v54 = vadd.f32 %v3944_v12, %v3815_v62  ;;  %v3833_v5 = vadd.f32 %v5227_v61, %v3575_v21  ;;  %v3569_v60 = vadd.f32 %v3568_v41, %v3275_v23  ;;  %v5236_v16 = vpop.f32.mrf.mxu1  ;;  %v7810_v12 = vld [vmem:[#allocation71_spill] sm:$0xff]  ;;  %v3331_v0 = vadd.f32 %v7812_v24, %v3019_v63  ;;  %v7827_v34 = vld [vmem:[#allocation42_spill] sm:$0xff] }
 0x2ad   :  { %v5180_v40 = vpop.f32.mrf.mxu0  ;;  %v3307_v1 = vadd.f32 %v7810_v12, %v2998_v19  ;;  %v38_v62 = vld [vmem:[%s7249_s1 + $0xa8] sm:$0xff]  ;;  %v3323_v46 = vadd.f32 %v7816_v31, %v3012_v14  ;;  %v3952_v27 = vmul.f32 %v7823_v37, %v37_v45  ;;  %v7836_v31 = vld [vmem:[#allocation46_spill] sm:$0xff] }
 0x2ae   :  { %4008 = vst [vmem:[%s7250_s4 + $0x60] sm:$0xff] %v3976_v54  ;;  %v3979_v55 = vadd.f32 %v3947_v56, %v3833_v5  ;;  %v3827_v61 = vadd.f32 %v3826_v59, %v3569_v60  ;;  %v3587_v25 = vadd.f32 %v5180_v40, %v3299_v33  ;;  %v3862_v50 = vpop.f32.mrf.mxu1  ;;  %v7813_v21 = vld [vmem:[#allocation31_spill] sm:$0xff]  ;;  %v3950_v33 = vmul.f32 %v7815_v10, %v35_v36  ;;  %v7817_v54 = vld [vmem:[#allocation14_spill] sm:$0xff]  ;;  %v7818_v5 = vld [vmem:[#allocation81_spill] sm:$0xff] }
 0x2af   :  { %v3580_v48 = vpop.f32.mrf.mxu0  ;;  %v3033_v23 = vadd.f32 %v7814_v26, %v7813_v21  ;;  %v3026_v60 = vadd.f32 %v7818_v5, %v7817_v54  ;;  %v7824_v63 = vld [vmem:[#allocation19_spill] sm:$0xff]  ;;  %v41_v26 = vld [vmem:[%s7249_s1 + $0xc0] sm:$0xff]  ;;  %v44_v5 = vld [vmem:[%s7249_s1 + $0xd8] sm:$0xff] }
 0x2b0   :  { %4011 = vst [vmem:[%s7250_s4 + $0x78] sm:$0xff] %v3979_v55  ;;  %v3978_v49 = vadd.f32 %v3946_v9, %v3827_v61  ;;  %v3845_v29 = vadd.f32 %v5230_v57, %v3587_v25  ;;  %v3581_v32 = vadd.f32 %v3580_v48, %v3291_v11  ;;  %v5239_v59 = vpop.f32.mrf.mxu1  ;;  %v3953_v11 = vmul.f32 %v7819_v52, %v38_v62  ;;  %v40_v55 = vld [vmem:[%s7249_s1 + $0xb8] sm:$0xff]  ;;  %v7832_v62 = vld [vmem:[#allocation95_spill] sm:$0xff]  ;;  %v7843_v37 = vld [vmem:[#allocation58_spill] sm:$0xff] }
 0x2b1   :  { %v5183_v44 = vpop.f32.mrf.mxu0  ;;  %v7825_v48 = vld [vmem:[#allocation89_spill] sm:$0xff]  ;;  %v3955_v42 = vmul.f32 %v7827_v34, %v40_v55 }
 0x2b2   :  { %4010 = vst [vmem:[%s7250_s4 + $0x70] sm:$0xff] %v3978_v49  ;;  %v3981_v7 = vadd.f32 %v3949_v38, %v3845_v29  ;;  %v3839_v57 = vadd.f32 %v3838_v58, %v3581_v32  ;;  %v3599_v51 = vadd.f32 %v5183_v44, %v3315_v20  ;;  %v3874_v2 = vpop.f32.mrf.mxu1  ;;  %v3040_v28 = vadd.f32 %v7825_v48, %v7824_v63  ;;  %v39_v32 = vld [vmem:[%s7249_s1 + $0xb0] sm:$0xff]  ;;  %v7828_v44 = vld [vmem:[#allocation94_spill] sm:$0xff]  ;;  %v7839_v52 = vld [vmem:[#allocation53_spill] sm:$0xff] }
 0x2b3   :  { %v3592_v6 = vpop.f32.mrf.mxu0  ;;  %v3363_v36 = vadd.f32 %v7828_v44, %v3047_v17  ;;  %v3068_v17 = vadd.f32 %v7841_v47, %v7840_v13  ;;  %v7844_v48 = vld [vmem:[#allocation107_spill] sm:$0xff]  ;;  %v7848_v44 = vld [vmem:[#allocation108_spill] sm:$0xff] }
 0x2b4   :  { %4013 = vst [vmem:[%s7250_s4 + $0x88] sm:$0xff] %v3981_v7  ;;  %v3980_v58 = vadd.f32 %v3948_v18, %v3839_v57  ;;  %v3857_v39 = vadd.f32 %v5233_v30, %v3599_v51  ;;  %v3593_v56 = vadd.f32 %v3592_v6, %v3307_v1  ;;  %v5242_v41 = vpop.f32.mrf.mxu1  ;;  %v3339_v18 = vadd.f32 %v7826_v53, %v3026_v60  ;;  %v42_v7 = vld [vmem:[%s7249_s1 + $0xc8] sm:$0xff]  ;;  %v7830_v51 = vld [vmem:[#allocation96_spill] sm:$0xff] }
 0x2b5   :  { %v5186_v4 = vpop.f32.mrf.mxu0  ;;  %v7829_v57 = vld [vmem:[#allocation39_spill] sm:$0xff]  ;;  %v3355_v21 = vadd.f32 %v7832_v62, %v3040_v28 }
 0x2b6   :  { %4012 = vst [vmem:[%s7250_s4 + $0x80] sm:$0xff] %v3980_v58  ;;  %v3983_v43 = vadd.f32 %v3951_v3, %v3857_v39  ;;  %v3851_v30 = vadd.f32 %v3850_v22, %v3593_v56  ;;  %v3611_v9 = vadd.f32 %v5186_v4, %v3331_v0  ;;  %v3886_v40 = vpop.f32.mrf.mxu1  ;;  %v7822_v22 = vld [vmem:[#allocation86_spill] sm:$0xff]  ;;  %v3061_v12 = vadd.f32 %v7830_v51, %v7829_v57  ;;  %v7831_v3 = vld [vmem:[#allocation45_spill] sm:$0xff] }
 0x2b7   :  { %v3604_v19 = vpop.f32.mrf.mxu0  ;;  %v3347_v38 = vadd.f32 %v7822_v22, %v3033_v23  ;;  %v3954_v6 = vmul.f32 %v7831_v3, %v39_v32  ;;  %v7833_v23 = vld [vmem:[#allocation20_spill] sm:$0xff]  ;;  %v7834_v58 = vld [vmem:[#allocation97_spill] sm:$0xff]  ;;  %v7842_v22 = vld [vmem:[#allocation103_spill] sm:$0xff] }
 0x2b8   :  { %4015 = vst [vmem:[%s7250_s4 + $0x98] sm:$0xff] %v3983_v43  ;;  %v3982_v61 = vadd.f32 %v3950_v33, %v3851_v30  ;;  %v3869_v25 = vadd.f32 %v5236_v16, %v3611_v9  ;;  %v3605_v15 = vadd.f32 %v3604_v19, %v3323_v46  ;;  %v5245_v49 = vpop.f32.mrf.mxu1  ;;  %v3054_v39 = vadd.f32 %v7834_v58, %v7833_v23  ;;  %v7835_v33 = vld [vmem:[#allocation50_spill] sm:$0xff]  ;;  %v7845_v32 = vld [vmem:[#allocation47_spill] sm:$0xff]  ;;  %v7850_v51 = vld [vmem:[#allocation105_spill] sm:$0xff] }
 0x2b9   :  { %v5189_v29 = vpop.f32.mrf.mxu0  ;;  %v3957_v4 = vmul.f32 %v7835_v33, %v42_v7  ;;  %v7837_v46 = vld [vmem:[#allocation2_spill] sm:$0xff]  ;;  %v7853_v58 = vld [vmem:[#allocation69_spill] sm:$0xff] }
 0x2ba   :  { %4014 = vst [vmem:[%s7250_s4 + $0x90] sm:$0xff] %v3982_v61  ;;  %v3985_v8 = vadd.f32 %v3953_v11, %v3869_v25  ;;  %v3863_v16 = vadd.f32 %v3862_v50, %v3605_v15  ;;  %v3623_v20 = vadd.f32 %v5189_v29, %v3347_v38  ;;  %v3898_v24 = vpop.f32.mrf.mxu1  ;;  %v3075_v45 = vadd.f32 %v7837_v46, %v7836_v31  ;;  %v7838_v9 = vld [vmem:[#allocation102_spill] sm:$0xff]  ;;  %v43_v61 = vld [vmem:[%s7249_s1 + $0xd0] sm:$0xff]  ;;  %v46_v29 = vld [vmem:[%s7249_s1 + $0xe8] sm:$0xff] }
 0x2bb   :  { %v3616_v14 = vpop.f32.mrf.mxu0  ;;  %v3956_v11 = vmul.f32 %v7839_v52, %v41_v26  ;;  %v3371_v38 = vadd.f32 %v7842_v22, %v3054_v39  ;;  %v45_v7 = vld [vmem:[%s7249_s1 + $0xe0] sm:$0xff]  ;;  %v7852_v26 = vld [vmem:[#allocation3_spill] sm:$0xff]  ;;  %v7854_v31 = vld [vmem:[#allocation5_spill] sm:$0xff] }
 0x2bc   :  { %4017 = vst [vmem:[%s7250_s4 + $0xa8] sm:$0xff] %v3985_v8  ;;  %v3984_v50 = vadd.f32 %v3952_v27, %v3863_v16  ;;  %v3881_v1 = vadd.f32 %v5239_v59, %v3623_v20  ;;  %v3617_v35 = vadd.f32 %v3616_v14, %v3339_v18  ;;  %v5248_v19 = vpop.f32.mrf.mxu1  ;;  %v3959_v27 = vmul.f32 %v7843_v37, %v44_v5  ;;  %v7846_v8 = vld [vmem:[#allocation4_spill] sm:$0xff]  ;;  %v7847_v18 = vld [vmem:[#allocation61_spill] sm:$0xff]  ;;  %v7849_v57 = vld [vmem:[#allocation26_spill] sm:$0xff] }
 0x2bd   :  { %v5192_v0 = vpop.f32.mrf.mxu0  ;;  %v3395_v28 = vadd.f32 %v7844_v48, %v3075_v45  ;;  %v3089_v16 = vadd.f32 %v7846_v8, %v7845_v32  ;;  %v3958_v34 = vmul.f32 %v7847_v18, %v43_v61  ;;  %v3960_v39 = vmul.f32 %v7853_v58, %v45_v7  ;;  %v47_v45 = vld [vmem:[%s7249_s1 + $0xf0] sm:$0xff]  ;;  %v7855_v5 = vld [vmem:[#allocation74_spill] sm:$0xff]  ;;  %v7856_v52 = vld [vmem:[#allocation77_spill] sm:$0xff] }
 0x2be   :  { %4016 = vst [vmem:[%s7250_s4 + $0xa0] sm:$0xff] %v3984_v50  ;;  %v3987_v56 = vadd.f32 %v3955_v42, %v3881_v1  ;;  %v3875_v59 = vadd.f32 %v3874_v2, %v3617_v35  ;;  %v3635_v10 = vadd.f32 %v5192_v0, %v3363_v36  ;;  %v3379_v2 = vadd.f32 %v7838_v9, %v3061_v12  ;;  %v3910_v42 = vpop.f32.mrf.mxu1  ;;  %v7851_v35 = vld [vmem:[#allocation66_spill] sm:$0xff] }
 0x2bf   :  { %v3628_v54 = vpop.f32.mrf.mxu0  ;;  %v3387_v36 = vadd.f32 %v7848_v44, %v3068_v17  ;;  %v3082_v12 = vadd.f32 %v7850_v51, %v7849_v57  ;;  %v3961_v3 = vmul.f32 %v7851_v35, %v46_v29  ;;  %v3411_v23 = vadd.f32 %v7852_v26, %v3089_v16 }
 0x2c0   :  { %4019 = vst [vmem:[%s7250_s4 + $0xb8] sm:$0xff] %v3987_v56  ;;  %v3986_v60 = vadd.f32 %v3954_v6, %v3875_v59  ;;  %v3893_v43 = vadd.f32 %v5242_v41, %v3635_v10  ;;  %v3629_v30 = vadd.f32 %v3628_v54, %v3355_v21  ;;  %v48_v56 = vld [vmem:[%s7249_s1 + $0xf8] sm:$0xff] }
 0x2c1   :  { %v5195_v55 = vpop.f32.mrf.mxu0  ;;  %v3403_v46 = vadd.f32 %v7854_v31, %v3082_v12 }
 0x2c2   :  { %4018 = vst [vmem:[%s7250_s4 + $0xb0] sm:$0xff] %v3986_v60  ;;  %v3989_v25 = vadd.f32 %v3957_v4, %v3893_v43  ;;  %v3887_v41 = vadd.f32 %v3886_v40, %v3629_v30  ;;  %v3647_v15 = vadd.f32 %v5195_v55, %v3379_v2  ;;  %v3963_v60 = vmul.f32 %v7855_v5, %v48_v56 }
 0x2c3   :  { %v3640_v63 = vpop.f32.mrf.mxu0 }
 0x2c4   :  { %4021 = vst [vmem:[%s7250_s4 + $0xc8] sm:$0xff] %v3989_v25  ;;  %v3988_v40 = vadd.f32 %v3956_v11, %v3887_v41  ;;  %v3905_v20 = vadd.f32 %v5245_v49, %v3647_v15  ;;  %v3641_v53 = vadd.f32 %v3640_v63, %v3371_v38  ;;  %v3962_v11 = vmul.f32 %v7856_v52, %v47_v45 }
 0x2c5   :  { %v5198_v14 = vpop.f32.mrf.mxu0 }
 0x2c6   :  { %4020 = vst [vmem:[%s7250_s4 + $0xc0] sm:$0xff] %v3988_v40  ;;  %v3991_v50 = vadd.f32 %v3959_v27, %v3905_v20  ;;  %v3899_v49 = vadd.f32 %v3898_v24, %v3641_v53  ;;  %v3659_v1 = vadd.f32 %v5198_v14, %v3395_v28  ;;  %v5251_v24 = vpop.f32.mrf.mxu1 }
 0x2c7   :  { %v3652_v6 = vpop.f32.mrf.mxu0 }
 0x2c8   :  { %4023 = vst [vmem:[%s7250_s4 + $0xd8] sm:$0xff] %v3991_v50  ;;  %v3990_v0 = vadd.f32 %v3958_v34, %v3899_v49  ;;  %v3917_v62 = vadd.f32 %v5248_v19, %v3659_v1  ;;  %v3653_v21 = vadd.f32 %v3652_v6, %v3387_v36  ;;  %v3922_v2 = vpop.f32.mrf.mxu1 }
 0x2c9   :  { %v5201_v59 = vpop.f32.mrf.mxu0 }
 0x2ca   :  { %4022 = vst [vmem:[%s7250_s4 + $0xd0] sm:$0xff] %v3990_v0  ;;  %v3993_v10 = vadd.f32 %v3961_v3, %v3917_v62  ;;  %v3911_v33 = vadd.f32 %v3910_v42, %v3653_v21  ;;  %v3671_v4 = vadd.f32 %v5201_v59, %v3411_v23 }
 0x2cb   :  { %v3664_v54 = vpop.f32.mrf.mxu0 }
 0x2cc   :  { %4025 = vst [vmem:[%s7250_s4 + $0xe8] sm:$0xff] %v3993_v10  ;;  %v3992_v43 = vadd.f32 %v3960_v39, %v3911_v33  ;;  %v3929_v30 = vadd.f32 %v5251_v24, %v3671_v4  ;;  %v3665_v9 = vadd.f32 %v3664_v54, %v3403_v46 }
 0x2ce   :  { %4024 = vst [vmem:[%s7250_s4 + $0xe0] sm:$0xff] %v3992_v43  ;;  %v3995_v13 = vadd.f32 %v3963_v60, %v3929_v30  ;;  %v3923_v47 = vadd.f32 %v3922_v2, %v3665_v9 }
 0x2d0   :  { %4027 = vst [vmem:[%s7250_s4 + $0xf8] sm:$0xff] %v3995_v13  ;;  %v3994_v17 = vadd.f32 %v3962_v11, %v3923_v47 }
 0x2d2   :  { %4026 = vst [vmem:[%s7250_s4 + $0xf0] sm:$0xff] %v3994_v17 }

</bundles_post_ra>
